<compile_context>
chip_gen: v7x
topology: tpu7x:2x2x1
jax: 0.10.0
libtpu: 0.0.40
codegen_flags: <defaults>
</compile_context>

<pallas_src>
import math
import numpy as np
import jax
import jax.numpy as jnp
from jax.experimental import pallas as pl
from jax.experimental.pallas import tpu as pltpu

BN_EPS = 1e-5


# ----------------------------- Pallas kernel ------------------------------ #
def _stack_kernel(x_ref, w1_ref, b1_ref, wk_ref, bk_ref, o_ref):
    x = x_ref[0]                                   # (L, Cin) f32
    L = x.shape[0]
    C = w1_ref.shape[1]
    f32 = jnp.float32

    # ---- conv1x1 (pointwise) : one (L,Cin)@(Cin,C) dot + bias ----------------
    z = jnp.dot(x, w1_ref[...], preferred_element_type=f32) + b1_ref[...]   # (L, C)

    # ---- Conv1d(k=5, pad=2) [+ folded BN] as ONE (L,5C)@(5C,C) dot -----------
    def conv5(v, idx):
        zpad = jnp.zeros((2, C), f32)
        vp = jnp.concatenate([zpad, v, zpad], axis=0)                        # (L+4, C)
        cols = jnp.concatenate([vp[t:t + L, :] for t in range(5)], axis=1)   # (L, 5C)
        return (jnp.dot(cols, wk_ref[idx], preferred_element_type=f32)
                + bk_ref[idx])                                               # (L, C)

    # ---- two BasicResidualUnits: conv-bn-relu-conv-bn + skip (no final relu) -
    for u in range(2):
        r = z
        h = jnp.maximum(conv5(z, 2 * u), 0.0)
        z = conv5(h, 2 * u + 1) + r

    # ---- MaxPool1d(kernel_size=3, stride=2, padding=1) -----------------------
    pad = jnp.full((1, C), jnp.finfo(f32).min, f32)      # -inf-equivalent padding
    zp = jnp.concatenate([pad, z, pad], axis=0)          # (L+2, C); zp[k] = z[k-1]
    m = jnp.maximum(jnp.maximum(zp[0:L, :], zp[1:L + 1, :]), zp[2:L + 2, :])  # (L, C)
    # m[l] = max(z[l-1], z[l], z[l+1]); output[j] = m[2j]  (stride-2 row pick)
    row_ids = jax.lax.broadcasted_iota(jnp.int32, (L // 2, L), 0)
    col_ids = jax.lax.broadcasted_iota(jnp.int32, (L // 2, L), 1)
    sel = (col_ids == 2 * row_ids).astype(f32)           # (L//2, L) selection matrix
    o_ref[0] = jnp.dot(sel, m, preferred_element_type=f32)


# ------------------------------ JAX wrapper -------------------------------- #
def basic_residual_stack_pallas(x, packed):
    """x: (B, Cin, L) in PyTorch layout -> (B, Cout, L//2)."""
    B, Cin, L = x.shape
    C = packed['w1'].shape[1]
    assert L % 2 == 0, "sequence length must be even (pad in the caller otherwise)"

    xt = jnp.transpose(x, (0, 2, 1)).astype(jnp.float32)     # (B, L, Cin): channels on lanes

    out = pl.pallas_call(
        _stack_kernel,
        out_shape=jax.ShapeDtypeStruct((B, L // 2, C), jnp.float32),
        grid=(B,),
        in_specs=[
            pl.BlockSpec((1, L, Cin), lambda b: (b, 0, 0)),      # x (per batch element)
            pl.BlockSpec((Cin, C), lambda b: (0, 0)),            # conv1x1 weight
            pl.BlockSpec((1, C), lambda b: (0, 0)),              # conv1x1 bias
            pl.BlockSpec((4, 5 * C, C), lambda b: (0, 0, 0)),    # 4 packed k=5 convs (BN folded)
            pl.BlockSpec((4, 1, C), lambda b: (0, 0, 0)),        # 4 packed biases (BN folded)
        ],
        out_specs=pl.BlockSpec((1, L // 2, C), lambda b: (b, 0, 0)),
        compiler_params=pltpu.CompilerParams(dimension_semantics=("parallel",)),
    )(xt, packed['w1'], packed['b1'], packed['wk'], packed['bk'])

    return jnp.transpose(out, (0, 2, 1))                      # (B, C, L//2)


# --------------------------- parameter handling ---------------------------- #
def init_params(key, in_channels, out_channels):
    C = out_channels
    ks = iter(jax.random.split(key, 32))

    def u(shape, fan_in):
        b = 1.0 / math.sqrt(fan_in)
        return jax.random.uniform(next(ks), shape, jnp.float32, -b, b)

    def bn(c):
        return {
            'gamma': jax.random.uniform(next(ks), (c,), jnp.float32, 0.5, 1.5),
            'beta': jax.random.uniform(next(ks), (c,), jnp.float32, -0.5, 0.5),
            'mean': jax.random.uniform(next(ks), (c,), jnp.float32, -0.5, 0.5),
            'var': jax.random.uniform(next(ks), (c,), jnp.float32, 0.5, 1.5),
        }

    p = {
        'conv1x1_w': u((C, in_channels, 1), in_channels),
        'conv1x1_b': u((C,), in_channels),
        'units': [],
    }
    for _ in range(2):
        p['units'].append({
            'conv1_w': u((C, C, 5), C * 5), 'conv1_b': u((C,), C * 5), 'bn1': bn(C),
            'conv2_w': u((C, C, 5), C * 5), 'conv2_b': u((C,), C * 5), 'bn2': bn(C),
        })
    return p


def _fold_bn(w, b, bn, eps=BN_EPS):
    # BN(conv(x)) == conv'(x) with w' = w*s (per out-channel), b' = b*s + (beta - mean*s)
    s = bn['gamma'] / jnp.sqrt(bn['var'] + eps)
    return w * s[:, None, None], b * s + (bn['beta'] - bn['mean'] * s)


def pack_params(p):
    packed = {
        'w1': p['conv1x1_w'][:, :, 0].T,                       # (Cin, C)
        'b1': p['conv1x1_b'].reshape(1, -1),                   # (1, C)
    }
    wks, bks = [], []
    for unit in p['units']:
        for cw, cb, s in ((unit['conv1_w'], unit['conv1_b'], unit['bn1']),
                          (unit['conv2_w'], unit['conv2_b'], unit['bn2'])):
            wf, bf = _fold_bn(cw, cb, s)
            # im2col weight: rows = concat over tap t of w[:, :, t].T  -> (5*C, C)
            wks.append(jnp.concatenate([wf[:, :, t].T for t in range(5)], axis=0))
            bks.append(bf.reshape(1, -1))
    packed['wk'] = jnp.stack(wks, axis=0)                      # (4, 5C, C)
    packed['bk'] = jnp.stack(bks, axis=0)                      # (4, 1, C)
    return packed


# ----------------------- pure-JAX reference (PyTorch semantics) ------------ #
def ref_forward(x, p, eps=BN_EPS):
    hp = jax.lax.Precision.HIGHEST

    def conv1d(z, w, b):                       # z: (B, Ci, L), w: (Co, Ci, K), pad=K//2
        K = w.shape[2]
        padz = K // 2
        L = z.shape[2]
        zp = jnp.pad(z, ((0, 0), (0, 0), (padz, padz)))
        out = sum(jnp.einsum('bil,oi->bol', zp[:, :, t:t + L], w[:, :, t], precision=hp)
                  for t in range(K))
        return out + b[None, :, None]

    def bn(z, s):
        sc = s['gamma'] / jnp.sqrt(s['var'] + eps)
        return z * sc[None, :, None] + (s['beta'] - s['mean'] * sc)[None, :, None]

    z = conv1d(x, p['conv1x1_w'], p['conv1x1_b'])
    for unit in p['units']:
        r = z
        h = jax.nn.relu(bn(conv1d(z, unit['conv1_w'], unit['conv1_b']), unit['bn1']))
        z = bn(conv1d(h, unit['conv2_w'], unit['conv2_b']), unit['bn2']) + r
    return jax.lax.reduce_window(
        z, -jnp.inf, jax.lax.max,
        window_dimensions=(1, 1, 3), window_strides=(1, 1, 2),
        padding=((0, 0), (0, 0), (1, 1)))


# ----------------------------------- main ---------------------------------- #
if __name__ == "__main__":
    key = jax.random.PRNGKey(0)
    k_p, k_x = jax.random.split(key)

    batch, in_channels, out_channels, length = 2, 16, 128, 64
    params = init_params(k_p, in_channels, out_channels)
    packed = pack_params(params)

    x = jax.random.normal(k_x, (batch, in_channels, length), jnp.float32)

    out = basic_residual_stack_pallas(x, packed)
    out = jax.block_until_ready(out)

    ref = ref_forward(x, params)
    assert out.shape == (batch, out_channels, length // 2), out.shape
    np.testing.assert_allclose(np.asarray(out), np.asarray(ref), rtol=2e-3, atol=2e-3)
    print("KERNEL_OK")
</pallas_src>

<mosaic_0001>
module attributes {stable_mosaic.version = 11 : i64} {
  func.func @_stack_kernel(%arg0: i32, %arg1: memref<1x64x16xf32, #tpu.memory_space<vmem>>, %arg2: memref<16x128xf32, #tpu.memory_space<vmem>>, %arg3: memref<1x128xf32, #tpu.memory_space<vmem>>, %arg4: memref<4x640x128xf32, #tpu.memory_space<vmem>>, %arg5: memref<4x1x128xf32, #tpu.memory_space<vmem>>, %arg6: memref<1x32x128xf32, #tpu.memory_space<vmem>>) attributes {dimension_semantics = [#tpu.dimension_semantics<parallel>], iteration_bounds = array<i64: 2>, scalar_prefetch = 0 : i64, scratch_operands = 0 : i64, tpu.core_type = #tpu.core_type<tc>, window_params = [{transform_indices = @transform_0, window_bounds = array<i64: 1, 64, 16>}, {pipeline_mode = #tpu.pipeline_mode<synchronous>, transform_indices = @transform_1, window_bounds = array<i64: 16, 128>}, {pipeline_mode = #tpu.pipeline_mode<synchronous>, transform_indices = @transform_2, window_bounds = array<i64: 1, 128>}, {pipeline_mode = #tpu.pipeline_mode<synchronous>, transform_indices = @transform_3, window_bounds = array<i64: 4, 640, 128>}, {pipeline_mode = #tpu.pipeline_mode<synchronous>, transform_indices = @transform_4, window_bounds = array<i64: 4, 1, 128>}, {transform_indices = @transform_5, window_bounds = array<i64: 1, 32, 128>}]} {
    %c0 = arith.constant 0 : index
    %c0_0 = arith.constant 0 : index
    %c0_1 = arith.constant 0 : index
    %0 = vector.load %arg1[%c0, %c0_0, %c0_1] : memref<1x64x16xf32, #tpu.memory_space<vmem>>, vector<1x64x16xf32>
    %1 = vector.shape_cast %0 : vector<1x64x16xf32> to vector<64x16xf32>
    %c0_2 = arith.constant 0 : index
    %c0_3 = arith.constant 0 : index
    %2 = vector.load %arg2[%c0_2, %c0_3] : memref<16x128xf32, #tpu.memory_space<vmem>>, vector<16x128xf32>
    %cst = arith.constant dense<0.000000e+00> : vector<64x128xf32>
    %3 = tpu.matmul %1, %2, %cst {dimension_numbers = #tpu.dot_dimension_numbers<[1], [0], [0], [1], [0, 0, 1, 1], [], []>} : vector<64x16xf32>, vector<16x128xf32>, vector<64x128xf32> -> vector<64x128xf32>
    %c0_4 = arith.constant 0 : index
    %c0_5 = arith.constant 0 : index
    %4 = vector.load %arg3[%c0_4, %c0_5] : memref<1x128xf32, #tpu.memory_space<vmem>>, vector<1x128xf32>
    %5 = vector.broadcast %4 : vector<1x128xf32> to vector<64x128xf32>
    %6 = arith.addf %3, %5 : vector<64x128xf32>
    %cst_6 = arith.constant 0.000000e+00 : f32
    %7 = vector.broadcast %cst_6 : f32 to vector<2x128xf32>
    %8 = tpu.concatenate %7, %6, %7 in 0 : vector<2x128xf32>, vector<64x128xf32>, vector<2x128xf32> -> vector<68x128xf32>
    %9 = vector.extract_strided_slice %8 {offsets = [0, 0], sizes = [64, 128], strides = [1, 1]} : vector<68x128xf32> to vector<64x128xf32>
    %10 = vector.extract_strided_slice %8 {offsets = [1, 0], sizes = [64, 128], strides = [1, 1]} : vector<68x128xf32> to vector<64x128xf32>
    %11 = vector.extract_strided_slice %8 {offsets = [2, 0], sizes = [64, 128], strides = [1, 1]} : vector<68x128xf32> to vector<64x128xf32>
    %12 = vector.extract_strided_slice %8 {offsets = [3, 0], sizes = [64, 128], strides = [1, 1]} : vector<68x128xf32> to vector<64x128xf32>
    %13 = vector.extract_strided_slice %8 {offsets = [4, 0], sizes = [64, 128], strides = [1, 1]} : vector<68x128xf32> to vector<64x128xf32>
    %14 = tpu.concatenate %9, %10, %11, %12, %13 in 1 : vector<64x128xf32>, vector<64x128xf32>, vector<64x128xf32>, vector<64x128xf32>, vector<64x128xf32> -> vector<64x640xf32>
    %c0_7 = arith.constant 0 : index
    %c0_8 = arith.constant 0 : index
    %c0_9 = arith.constant 0 : index
    %15 = vector.load %arg4[%c0_7, %c0_8, %c0_9] : memref<4x640x128xf32, #tpu.memory_space<vmem>>, vector<1x640x128xf32>
    %16 = vector.shape_cast %15 : vector<1x640x128xf32> to vector<640x128xf32>
    %cst_10 = arith.constant dense<0.000000e+00> : vector<64x128xf32>
    %17 = tpu.matmul %14, %16, %cst_10 {dimension_numbers = #tpu.dot_dimension_numbers<[1], [0], [0], [1], [0, 0, 1, 1], [], []>} : vector<64x640xf32>, vector<640x128xf32>, vector<64x128xf32> -> vector<64x128xf32>
    %c0_11 = arith.constant 0 : index
    %c0_12 = arith.constant 0 : index
    %c0_13 = arith.constant 0 : index
    %18 = vector.load %arg5[%c0_11, %c0_12, %c0_13] : memref<4x1x128xf32, #tpu.memory_space<vmem>>, vector<1x1x128xf32>
    %19 = vector.shape_cast %18 : vector<1x1x128xf32> to vector<1x128xf32>
    %20 = vector.broadcast %19 : vector<1x128xf32> to vector<64x128xf32>
    %21 = arith.addf %17, %20 : vector<64x128xf32>
    %cst_14 = arith.constant 0.000000e+00 : f32
    %22 = vector.broadcast %cst_14 : f32 to vector<64x128xf32>
    %23 = arith.maximumf %21, %22 : vector<64x128xf32>
    %cst_15 = arith.constant 0.000000e+00 : f32
    %24 = vector.broadcast %cst_15 : f32 to vector<2x128xf32>
    %25 = tpu.concatenate %24, %23, %24 in 0 : vector<2x128xf32>, vector<64x128xf32>, vector<2x128xf32> -> vector<68x128xf32>
    %26 = vector.extract_strided_slice %25 {offsets = [0, 0], sizes = [64, 128], strides = [1, 1]} : vector<68x128xf32> to vector<64x128xf32>
    %27 = vector.extract_strided_slice %25 {offsets = [1, 0], sizes = [64, 128], strides = [1, 1]} : vector<68x128xf32> to vector<64x128xf32>
    %28 = vector.extract_strided_slice %25 {offsets = [2, 0], sizes = [64, 128], strides = [1, 1]} : vector<68x128xf32> to vector<64x128xf32>
    %29 = vector.extract_strided_slice %25 {offsets = [3, 0], sizes = [64, 128], strides = [1, 1]} : vector<68x128xf32> to vector<64x128xf32>
    %30 = vector.extract_strided_slice %25 {offsets = [4, 0], sizes = [64, 128], strides = [1, 1]} : vector<68x128xf32> to vector<64x128xf32>
    %31 = tpu.concatenate %26, %27, %28, %29, %30 in 1 : vector<64x128xf32>, vector<64x128xf32>, vector<64x128xf32>, vector<64x128xf32>, vector<64x128xf32> -> vector<64x640xf32>
    %c1 = arith.constant 1 : index
    %c0_16 = arith.constant 0 : index
    %c0_17 = arith.constant 0 : index
    %32 = vector.load %arg4[%c1, %c0_16, %c0_17] : memref<4x640x128xf32, #tpu.memory_space<vmem>>, vector<1x640x128xf32>
    %33 = vector.shape_cast %32 : vector<1x640x128xf32> to vector<640x128xf32>
    %cst_18 = arith.constant dense<0.000000e+00> : vector<64x128xf32>
    %34 = tpu.matmul %31, %33, %cst_18 {dimension_numbers = #tpu.dot_dimension_numbers<[1], [0], [0], [1], [0, 0, 1, 1], [], []>} : vector<64x640xf32>, vector<640x128xf32>, vector<64x128xf32> -> vector<64x128xf32>
    %c1_19 = arith.constant 1 : index
    %c0_20 = arith.constant 0 : index
    %c0_21 = arith.constant 0 : index
    %35 = vector.load %arg5[%c1_19, %c0_20, %c0_21] : memref<4x1x128xf32, #tpu.memory_space<vmem>>, vector<1x1x128xf32>
    %36 = vector.shape_cast %35 : vector<1x1x128xf32> to vector<1x128xf32>
    %37 = vector.broadcast %36 : vector<1x128xf32> to vector<64x128xf32>
    %38 = arith.addf %34, %37 : vector<64x128xf32>
    %39 = arith.addf %38, %6 : vector<64x128xf32>
    %cst_22 = arith.constant 0.000000e+00 : f32
    %40 = vector.broadcast %cst_22 : f32 to vector<2x128xf32>
    %41 = tpu.concatenate %40, %39, %40 in 0 : vector<2x128xf32>, vector<64x128xf32>, vector<2x128xf32> -> vector<68x128xf32>
    %42 = vector.extract_strided_slice %41 {offsets = [0, 0], sizes = [64, 128], strides = [1, 1]} : vector<68x128xf32> to vector<64x128xf32>
    %43 = vector.extract_strided_slice %41 {offsets = [1, 0], sizes = [64, 128], strides = [1, 1]} : vector<68x128xf32> to vector<64x128xf32>
    %44 = vector.extract_strided_slice %41 {offsets = [2, 0], sizes = [64, 128], strides = [1, 1]} : vector<68x128xf32> to vector<64x128xf32>
    %45 = vector.extract_strided_slice %41 {offsets = [3, 0], sizes = [64, 128], strides = [1, 1]} : vector<68x128xf32> to vector<64x128xf32>
    %46 = vector.extract_strided_slice %41 {offsets = [4, 0], sizes = [64, 128], strides = [1, 1]} : vector<68x128xf32> to vector<64x128xf32>
    %47 = tpu.concatenate %42, %43, %44, %45, %46 in 1 : vector<64x128xf32>, vector<64x128xf32>, vector<64x128xf32>, vector<64x128xf32>, vector<64x128xf32> -> vector<64x640xf32>
    %c2 = arith.constant 2 : index
    %c0_23 = arith.constant 0 : index
    %c0_24 = arith.constant 0 : index
    %48 = vector.load %arg4[%c2, %c0_23, %c0_24] : memref<4x640x128xf32, #tpu.memory_space<vmem>>, vector<1x640x128xf32>
    %49 = vector.shape_cast %48 : vector<1x640x128xf32> to vector<640x128xf32>
    %cst_25 = arith.constant dense<0.000000e+00> : vector<64x128xf32>
    %50 = tpu.matmul %47, %49, %cst_25 {dimension_numbers = #tpu.dot_dimension_numbers<[1], [0], [0], [1], [0, 0, 1, 1], [], []>} : vector<64x640xf32>, vector<640x128xf32>, vector<64x128xf32> -> vector<64x128xf32>
    %c2_26 = arith.constant 2 : index
    %c0_27 = arith.constant 0 : index
    %c0_28 = arith.constant 0 : index
    %51 = vector.load %arg5[%c2_26, %c0_27, %c0_28] : memref<4x1x128xf32, #tpu.memory_space<vmem>>, vector<1x1x128xf32>
    %52 = vector.shape_cast %51 : vector<1x1x128xf32> to vector<1x128xf32>
    %53 = vector.broadcast %52 : vector<1x128xf32> to vector<64x128xf32>
    %54 = arith.addf %50, %53 : vector<64x128xf32>
    %cst_29 = arith.constant 0.000000e+00 : f32
    %55 = vector.broadcast %cst_29 : f32 to vector<64x128xf32>
    %56 = arith.maximumf %54, %55 : vector<64x128xf32>
    %cst_30 = arith.constant 0.000000e+00 : f32
    %57 = vector.broadcast %cst_30 : f32 to vector<2x128xf32>
    %58 = tpu.concatenate %57, %56, %57 in 0 : vector<2x128xf32>, vector<64x128xf32>, vector<2x128xf32> -> vector<68x128xf32>
    %59 = vector.extract_strided_slice %58 {offsets = [0, 0], sizes = [64, 128], strides = [1, 1]} : vector<68x128xf32> to vector<64x128xf32>
    %60 = vector.extract_strided_slice %58 {offsets = [1, 0], sizes = [64, 128], strides = [1, 1]} : vector<68x128xf32> to vector<64x128xf32>
    %61 = vector.extract_strided_slice %58 {offsets = [2, 0], sizes = [64, 128], strides = [1, 1]} : vector<68x128xf32> to vector<64x128xf32>
    %62 = vector.extract_strided_slice %58 {offsets = [3, 0], sizes = [64, 128], strides = [1, 1]} : vector<68x128xf32> to vector<64x128xf32>
    %63 = vector.extract_strided_slice %58 {offsets = [4, 0], sizes = [64, 128], strides = [1, 1]} : vector<68x128xf32> to vector<64x128xf32>
    %64 = tpu.concatenate %59, %60, %61, %62, %63 in 1 : vector<64x128xf32>, vector<64x128xf32>, vector<64x128xf32>, vector<64x128xf32>, vector<64x128xf32> -> vector<64x640xf32>
    %c3 = arith.constant 3 : index
    %c0_31 = arith.constant 0 : index
    %c0_32 = arith.constant 0 : index
    %65 = vector.load %arg4[%c3, %c0_31, %c0_32] : memref<4x640x128xf32, #tpu.memory_space<vmem>>, vector<1x640x128xf32>
    %66 = vector.shape_cast %65 : vector<1x640x128xf32> to vector<640x128xf32>
    %cst_33 = arith.constant dense<0.000000e+00> : vector<64x128xf32>
    %67 = tpu.matmul %64, %66, %cst_33 {dimension_numbers = #tpu.dot_dimension_numbers<[1], [0], [0], [1], [0, 0, 1, 1], [], []>} : vector<64x640xf32>, vector<640x128xf32>, vector<64x128xf32> -> vector<64x128xf32>
    %c3_34 = arith.constant 3 : index
    %c0_35 = arith.constant 0 : index
    %c0_36 = arith.constant 0 : index
    %68 = vector.load %arg5[%c3_34, %c0_35, %c0_36] : memref<4x1x128xf32, #tpu.memory_space<vmem>>, vector<1x1x128xf32>
    %69 = vector.shape_cast %68 : vector<1x1x128xf32> to vector<1x128xf32>
    %70 = vector.broadcast %69 : vector<1x128xf32> to vector<64x128xf32>
    %71 = arith.addf %67, %70 : vector<64x128xf32>
    %72 = arith.addf %71, %39 : vector<64x128xf32>
    %cst_37 = arith.constant -3.40282347E+38 : f32
    %73 = vector.broadcast %cst_37 : f32 to vector<1x128xf32>
    %74 = tpu.concatenate %73, %72, %73 in 0 : vector<1x128xf32>, vector<64x128xf32>, vector<1x128xf32> -> vector<66x128xf32>
    %75 = vector.extract_strided_slice %74 {offsets = [0, 0], sizes = [64, 128], strides = [1, 1]} : vector<66x128xf32> to vector<64x128xf32>
    %76 = vector.extract_strided_slice %74 {offsets = [1, 0], sizes = [64, 128], strides = [1, 1]} : vector<66x128xf32> to vector<64x128xf32>
    %77 = arith.maximumf %75, %76 : vector<64x128xf32>
    %78 = vector.extract_strided_slice %74 {offsets = [2, 0], sizes = [64, 128], strides = [1, 1]} : vector<66x128xf32> to vector<64x128xf32>
    %79 = arith.maximumf %77, %78 : vector<64x128xf32>
    %80 = tpu.iota {dimensions = array<i32: 0>} : vector<32x64xi32>
    %81 = tpu.iota {dimensions = array<i32: 1>} : vector<32x64xi32>
    %c2_i32 = arith.constant 2 : i32
    %82 = vector.broadcast %c2_i32 : i32 to vector<32x64xi32>
    %83 = arith.muli %82, %80 : vector<32x64xi32>
    %84 = arith.cmpi eq, %81, %83 : vector<32x64xi32>
    %85 = arith.extui %84 : vector<32x64xi1> to vector<32x64xi32>
    %86 = arith.sitofp %85 : vector<32x64xi32> to vector<32x64xf32>
    %cst_38 = arith.constant dense<0.000000e+00> : vector<32x128xf32>
    %87 = tpu.matmul %86, %79, %cst_38 {dimension_numbers = #tpu.dot_dimension_numbers<[1], [0], [0], [1], [0, 0, 1, 1], [], []>} : vector<32x64xf32>, vector<64x128xf32>, vector<32x128xf32> -> vector<32x128xf32>
    %c0_39 = arith.constant 0 : index
    %c0_40 = arith.constant 0 : index
    %c0_41 = arith.constant 0 : index
    %88 = vector.load %arg6[%c0_39, %c0_40, %c0_41] : memref<1x32x128xf32, #tpu.memory_space<vmem>>, vector<1x32x128xf32>
    %89 = vector.shape_cast %88 : vector<1x32x128xf32> to vector<32x128xf32>
    %90 = vector.shape_cast %87 : vector<32x128xf32> to vector<1x32x128xf32>
    tpu.vector_store %arg6[%c0_39, %c0_40, %c0_41], %90 {strides = array<i32>} : memref<1x32x128xf32, #tpu.memory_space<vmem>>, vector<1x32x128xf32>,
    return
  }
  func.func @transform_0(%arg0: i32) -> (i32, i32, i32) {
    %c0_i32 = arith.constant 0 : i32
    %c0_i32_0 = arith.constant 0 : i32
    %c0_i32_1 = arith.constant 0 : i32
    return %arg0, %c0_i32, %c0_i32_0 : i32, i32, i32
  }
  func.func @transform_1(%arg0: i32) -> (i32, i32) {
    %c0_i32 = arith.constant 0 : i32
    %c0_i32_0 = arith.constant 0 : i32
    %c0_i32_1 = arith.constant 0 : i32
    return %c0_i32, %c0_i32_0 : i32, i32
  }
  func.func @transform_2(%arg0: i32) -> (i32, i32) {
    %c0_i32 = arith.constant 0 : i32
    %c0_i32_0 = arith.constant 0 : i32
    %c0_i32_1 = arith.constant 0 : i32
    return %c0_i32, %c0_i32_0 : i32, i32
  }
  func.func @transform_3(%arg0: i32) -> (i32, i32, i32) {
    %c0_i32 = arith.constant 0 : i32
    %c0_i32_0 = arith.constant 0 : i32
    %c0_i32_1 = arith.constant 0 : i32
    %c0_i32_2 = arith.constant 0 : i32
    return %c0_i32, %c0_i32_0, %c0_i32_1 : i32, i32, i32
  }
  func.func @transform_4(%arg0: i32) -> (i32, i32, i32) {
    %c0_i32 = arith.constant 0 : i32
    %c0_i32_0 = arith.constant 0 : i32
    %c0_i32_1 = arith.constant 0 : i32
    %c0_i32_2 = arith.constant 0 : i32
    return %c0_i32, %c0_i32_0, %c0_i32_1 : i32, i32, i32
  }
  func.func @transform_5(%arg0: i32) -> (i32, i32, i32) {
    %c0_i32 = arith.constant 0 : i32
    %c0_i32_0 = arith.constant 0 : i32
    %c0_i32_1 = arith.constant 0 : i32
    return %arg0, %c0_i32, %c0_i32_0 : i32, i32, i32
  }
}

</mosaic_0001>

<bundles_post_ra>
// kernel: tpu_custom_call.1
= control target key start
LH: loop header
LB: loop body
LE: loop exit
PB: predicated region body
PF: predicated region fallthrough
CT: control target
= control target key end

     0   :  { %s5338_s0 = inlined_call_operand.vmem [shape: f32[2,64,16], index: 0, kind: input, shape index: {}]   ;;  %s5339_s1 = inlined_call_operand.hbm [shape: f32[16,128], index: 1, kind: input, shape index: {}]   ;;  %s5340_s2 = inlined_call_operand.hbm [shape: f32[1,128], index: 2, kind: input, shape index: {}]   ;;  %s5341_s3 = inlined_call_operand.hbm [shape: f32[4,640,128], index: 3, kind: input, shape index: {}]   ;;  %s5342_s4 = inlined_call_operand.hbm [shape: f32[4,1,128], index: 4, kind: input, shape index: {}]   ;;  %s5343_s5 = inlined_call_operand.hbm [shape: f32[2,32,128], index: 5, kind: output, shape index: {}]  }
   0x1   :  { %5347 = sst [smem:[#allocation15_spill]] %s5339_s1 }
   0x2   :  { %10 = vsyncpa [#allocation3], 0 }
   0x3   :  { %11 = vsyncpa [#allocation6], 0 }
   0x4   :  { %12 = vsyncpa [#allocation9], 0 }
   0x5   :  { %13 = vsyncpa [#allocation4], 0 }
   0x6   :  { %15 = vsyncpa [#allocation4 + $0x1], 0  ;;  %s4519_s18 = smov 0   ;;  %s4521_s19 = smov 0  }
   0x7   :  { %s4523_s20 = smov 0   ;;  %s4525_s21 = smov 0  }
   0x8 LB: > { %s4540_s22 = sadd.s32 4294967295, %s4475_s21   ;;  %s2967_s23 = sadd.s32 4294967294, %s4475_s21   ;;  %s4475_s21 = sphi %s4525_s21, %s5368_s21   ;;  %s4471_s20 = sphi %s4523_s20, %s5367_s20   ;;  %s4467_s19 = sphi %s4521_s19, %s5366_s19   ;;  %s4463_s18 = sphi %s4519_s18, %s5365_s18  }
   0x9   : > { %s4544_s24 = sadd.s32 1, %s4475_s21   ;;  %s138_s25 = sadd.s32 1, %s4471_s20 }
   0xa   : > { %s135_s26 = ssub.s32 %s4475_s21, %s4544_s24  ;;  %p148_p0 = scmp.ne.s32.totalorder %s4471_s20, %s4467_s19 }
   0xb   : > { %p136_p1 = scmp.eq.s32.totalorder %s135_s26, 0  ;;  %p149_p2 = scmp.eq.s32.totalorder %s4540_s22, 1 }
   0xc   : > { %p154_p3 = scmp.ne.s32.totalorder %s4467_s19, %s4463_s18  ;;  %p155_p4 = scmp.eq.s32.totalorder %s2967_s23, 1 }
   0xd   : > { %s4555_s27 = scalar_select %p136_p1, %s4471_s20, %s138_s25  }
   0xe   : > { %p4557_p5 = por %p149_p2, %p148_p0  ;;  %p4561_p6 = por %p155_p4, %p154_p3 }
   0xf   : > { %p2968_p7 = scmp.ge.s32.totalorder %s4475_s21, 1  ;;  %p162_p8 = scmp.lt.s32.totalorder %s4475_s21, 3 }
  0x10   : > { %s5348_s28 = scalar_select %p4557_p5, 1, 0 }
  0x11   : > { %s5349_s29 = scalar_select %p4561_p6, 1, 0 }
  0x12   : > { %p5344_p9 = scmp.eq.s32.totalorder %s4540_s22, 0  ;;  %p4568_p10 = pnand %p2968_p7, %p162_p8 }
  0x13   : > { %s4477_s6 = smov [#allocation5]   ;;  %s4478_s8 = smov [#allocation2]  }
  0x14   : > { %s5350_s30 = scalar_select %p4568_p10, 1, 0 }
  0x15   : > { %s188_s7 = sshll.u32 %s4477_s6, 4  ;;  %p4220_p11 = pneg %p4568_p10  ;;  %s189_s7 = int_to_ptr.vmem [resolvable:$true] %s188_s7 }
  0x16   : > { %s174_s9 = sshll.u32 %s4478_s8, 4  ;;  %s4479_s11 = smov [#allocation7]   ;;  %s4580_s9 = int_to_ptr.vmem [resolvable:$true] %s174_s9 }
  0x17   : > { %p4576_p12 = pnand %p5344_p9, %p4220_p11  ;;  %s4582_s12 = sshll.u32 %s4479_s11, 4  ;;  %s199_s12 = int_to_ptr.vmem [resolvable:$true] %s4582_s12 }
  0x18   : > { %s4289_s15 = scalar_lea.hbm %s5340_s2, 16 }
  0x19   : > { %p4290_p13 = scmp.ne.s32.totalorder %s5340_s2, %s4289_s15  ;;  %p4592_p0 = pneg %p4576_p12 }
  0x1a   : > { %p4296_p3 = scmp.lt.u32.totalorder %s4289_s15, %s5340_s2 }
  0x1b   : > { %p4292_p1 = pnand %p4592_p0, %p4290_p13 }
  0x1d   : > { %p4293_p2 = pneg %p4292_p1 }
  0x1f   : > { %p4298_p4 = pnand %p4296_p3, %p4293_p2 }
  0x21   : > { %4301 = shalt.err (!%p4298_p4)
}
  0x22   : > { %s4302_s6 = scalar_lea.vmem %s189_s7, 16  ;;  %s4309_s8 = scalar_lea.vmem %s189_s7, 32 }
  0x23   : > { %p4303_p7 = scmp.ne.s32.totalorder %s189_s7, %s4302_s6  ;;  %p4310_p9 = scmp.lt.s32.totalorder %s189_s7, %s189_s7 }
  0x24   : > { %p4311_p6 = scmp.lt.s32.totalorder %s4309_s8, %s4302_s6 }
  0x25   : > { %p4305_p8 = pnand %p4303_p7, %p4592_p0 }
  0x26   : > { %p4312_p5 = por %p4311_p6, %p4310_p9 }
  0x27   : > { %p4306_p11 = pneg %p4305_p8 }
  0x29   : > { %p4313_p10 = pnand %p4312_p5, %p4306_p11 }
  0x2b   : > { %4316 = shalt.err (!%p4313_p10)
}
  0x2c   : > { %4226 = dma.hbm_to_vmem [thread:$0]  (!%p4576_p12), %s5340_s2, 16, %s189_s7, [#allocation6]  }
  0x2d   : > { %s5353_s1 = sld [smem:[#allocation15_spill]] }
  0x33   : > { %s4317_s16 = scalar_lea.hbm %s5353_s1, 256 }
  0x34   : > { %p4318_p13 = scmp.ne.s32.totalorder %s5353_s1, %s4317_s16  ;;  %p4324_p5 = scmp.lt.u32.totalorder %s4317_s16, %s5353_s1 }
  0x36   : > { %p4320_p1 = pnand %p4318_p13, %p4592_p0 }
  0x38   : > { %p4321_p6 = pneg %p4320_p1 }
  0x3a   : > { %p4326_p9 = pnand %p4324_p5, %p4321_p6 }
  0x3c   : > { %4329 = shalt.err (!%p4326_p9)
}
  0x3d   : > { %s4330_s7 = scalar_lea.vmem %s4580_s9, 256  ;;  %p4338_p4 = scmp.lt.s32.totalorder %s4580_s9, %s4580_s9 }
  0x3e   : > { %p4331_p10 = scmp.ne.s32.totalorder %s4580_s9, %s4330_s7  ;;  %p4339_p7 = scmp.lt.s32.totalorder %s4330_s7, %s4330_s7 }
  0x40   : > { %p4333_p2 = pnand %p4331_p10, %p4592_p0  ;;  %p4340_p8 = por %p4339_p7, %p4338_p4 }
  0x42   : > { %p4334_p3 = pneg %p4333_p2 }
  0x44   : > { %p4341_p11 = pnand %p4340_p8, %p4334_p3 }
  0x46   : > { %4344 = shalt.err (!%p4341_p11)
}
  0x47   : > { %s4480_s8 = smov 128   ;;  %s4481_s11 = smov 8  }
  0x48   : > { %4223 = dma.hbm_to_vmem [thread:$0]  (!%p4576_p12), %s5353_s1, 256, %s4580_s9, [#allocation3], %s4480_s8, %s4480_s8, %s4481_s11  }
  0x49   : > { %s4345_s17 = scalar_lea.hbm %s5341_s3, 40960 }
  0x4a   : > { %p4346_p13 = scmp.ne.s32.totalorder %s5341_s3, %s4345_s17  ;;  %p4352_p5 = scmp.lt.u32.totalorder %s4345_s17, %s5341_s3 }
  0x4c   : > { %p4348_p1 = pnand %p4346_p13, %p4592_p0 }
  0x4e   : > { %p4349_p6 = pneg %p4348_p1 }
  0x50   : > { %p4354_p9 = pnand %p4352_p5, %p4349_p6 }
  0x52   : > { %4357 = shalt.err (!%p4354_p9)
}
  0x53   : > { %s4358_s13 = scalar_lea.vmem %s199_s12, 40960  ;;  %p4366_p4 = scmp.lt.s32.totalorder %s199_s12, %s199_s12 }
  0x54   : > { %p4359_p10 = scmp.ne.s32.totalorder %s199_s12, %s4358_s13  ;;  %p4367_p7 = scmp.lt.s32.totalorder %s4358_s13, %s4358_s13 }
  0x56   : > { %p4361_p2 = pnand %p4359_p10, %p4592_p0  ;;  %p4368_p8 = por %p4367_p7, %p4366_p4 }
  0x58   : > { %p4362_p3 = pneg %p4361_p2 }
  0x5a   : > { %p4369_p11 = pnand %p4368_p8, %p4362_p3 }
  0x5c   : > { %4372 = shalt.err (!%p4369_p11)
}
  0x5d   : > { %4229 = dma.hbm_to_vmem [thread:$0]  (!%p4576_p12), %s5341_s3, 40960, %s199_s12, [#allocation6], %s4480_s8, %s4480_s8, %s4481_s11  }
  0x5e   : > { %s4482_s15 = smov [#allocation8]   ;;  %s4373_s26 = scalar_lea.hbm %s5342_s4, 64 }
  0x5f   : > { %s211_s16 = sshll.u32 %s4482_s15, 4  ;;  %p4374_p13 = scmp.ne.s32.totalorder %s5342_s4, %s4373_s26  ;;  %s212_s16 = int_to_ptr.vmem [resolvable:$true] %s211_s16 }
  0x60   : > { %p4380_p5 = scmp.lt.u32.totalorder %s4373_s26, %s5342_s4 }
  0x61   : > { %p4376_p1 = pnand %p4374_p13, %p4592_p0 }
  0x63   : > { %p4377_p6 = pneg %p4376_p1 }
  0x65   : > { %p4382_p9 = pnand %p4380_p5, %p4377_p6 }
  0x67   : > { %4385 = shalt.err (!%p4382_p9)
}
  0x68   : > { %s4386_s12 = scalar_lea.vmem %s212_s16, 64  ;;  %p4394_p4 = scmp.lt.s32.totalorder %s212_s16, %s212_s16 }
  0x69   : > { %p4387_p10 = scmp.ne.s32.totalorder %s212_s16, %s4386_s12  ;;  %p4395_p7 = scmp.lt.s32.totalorder %s4386_s12, %s4386_s12 }
  0x6b   : > { %p4389_p2 = pnand %p4387_p10, %p4592_p0  ;;  %p4396_p8 = por %p4395_p7, %p4394_p4 }
  0x6d   : > { %p4390_p3 = pneg %p4389_p2 }
  0x6f   : > { %p4397_p11 = pnand %p4396_p8, %p4390_p3 }
  0x71   : > { %4400 = shalt.err (!%p4397_p11)
}
  0x72   : > { %s4483_s8 = smov 16   ;;  %s4484_s11 = smov 1  }
  0x73   : > { %4232 = dma.hbm_to_vmem [thread:$0]  (!%p4576_p12), %s5342_s4, 64, %s212_s16, [#allocation9], %s4483_s8, %s4483_s8, %s4484_s11  }
  0x74   : > { %p5354_p13 = scmp.ne.s32.totalorder %s5350_s30, 0 }
  0x75   : > { %p5355_p1 = scmp.eq.s32.totalorder (!%p5354_p13), %s4540_s22, 0 }
  0x76   : > { %235 = sbr.rel (%p5354_p13) target bundleno = 1653 (0x675), region = 40 }
  0x7d   : > { %4446 = dma.done.wait (%p5355_p1), [#allocation3], 256   ;;  %p5356_p0 = pmov %p5355_p1 }
  0x7f   : > { %4448 = vsyncadd (%p5356_p0), [#allocation3], 4294967040  ;;  %p5357_p6 = pmov %p5356_p0 }
  0x80   : > { %p5358_p5 = pmov %p5356_p0 }
  0x81   : > { %4450 = dma.done.wait (%p5357_p6), [#allocation6], 40976  }
  0x82   : > { %4452 = vsyncadd (%p5358_p5), [#allocation6], 4294926320  ;;  %p5359_p9 = pmov %p5356_p0 }
  0x83   : > { %p5360_p12 = pmov %p5356_p0 }
  0x84   : > { %4454 = dma.done.wait (%p5359_p9), [#allocation9], 64  }
  0x85   : > { %4456 = vsyncadd (%p5360_p12), [#allocation9], 4294967232  ;;  %p275_p10 = scmp.lt.s32.totalorder %s4540_s22, 1  ;;  %vm297_vm0 = vcmask 130048   ;;  %v288_v0 = vld [vmem:[#allocation2] sm:$0xff]  ;;  %v289_v1 = vld [vmem:[#allocation2 + $0x8] sm:$0xff] }
  0x86   : > { %v3798_v3 = vpack.c.bf16 %v289_v1, %v288_v0  ;;  %v584_v6 = vld [vmem:[#allocation7 + $0x80] sm:$0xff]  ;;  %v585_v7 = vld [vmem:[#allocation7 + $0x88] sm:$0xff]  ;;  %v586_v19 = vld [vmem:[#allocation7 + $0x90] sm:$0xff]  ;;  %vm435_vm1 = vcmask 1041408   ;;  %vm464_vm2 = vcmask 1046528   ;;  %vm516_vm3 = vcmask 1044480  }
  0x87   : > { %s276_s30 = scalar_select %p275_p10, %s4540_s22, 1  ;;  %v3802_v8 = vpack.c.bf16 %v585_v7, %v584_v6  ;;  %v616_v9 = vld [vmem:[#allocation7 + $0x180] sm:$0xff]  ;;  %v617_v10 = vld [vmem:[#allocation7 + $0x188] sm:$0xff]  ;;  %v587_v20 = vld [vmem:[#allocation7 + $0x98] sm:$0xff]  ;;  %vm490_vm4 = vcmask 1045504   ;;  %vm542_vm6 = vcmask 1043456  }
  0x88   : > { %3799 = vmatprep.subr.bf16.mxu0 %v3798_v3  ;;  %v568_v11 = vld [vmem:[#allocation7] sm:$0xff]  ;;  %v3834_v12 = vpack.c.bf16 %v617_v10, %v616_v9  ;;  %v569_v13 = vld [vmem:[#allocation7 + $0x8] sm:$0xff]  ;;  %v618_v21 = vld [vmem:[#allocation7 + $0x190] sm:$0xff]  ;;  %v3806_v23 = vpack.c.bf16 %v587_v20, %v586_v19  ;;  %vm2748_vm7 = vcmask 523264   ;;  %vm2630_vm12 = vcmask 1040384   ;;  %s272_s16 = sand.u32 1, %s4467_s19  }
  0x89   : > { %s3016_s10 = sshll.u32 %s276_s30, 6  ;;  %3801 = vmatpush3.bf16.msra.mxu0 %v3798_v3  ;;  %v600_v14 = vld [vmem:[#allocation7 + $0x100] sm:$0xff]  ;;  %v601_v15 = vld [vmem:[#allocation7 + $0x108] sm:$0xff]  ;;  %3803 = vmatprep.subr.bf16.mxu1 %v3802_v8  ;;  %v3804_v17 = vpack.c.bf16 %v569_v13, %v568_v11  ;;  %v619_v24 = vld [vmem:[#allocation7 + $0x198] sm:$0xff]  ;;  %s2979_s17 = sshll.u32 %s272_s16, 5 }
  0x8a   : > { %s4687_s15 = scalar_lea.vmem %s5338_s0, %s3016_s10  ;;  %v3836_v18 = vpack.c.bf16 %v601_v15, %v600_v14  ;;  %3835 = vmatprep.subr.bf16.mxu0 %v3834_v12  ;;  %v570_v25 = vld [vmem:[#allocation7 + $0x10] sm:$0xff]  ;;  %v571_v26 = vld [vmem:[#allocation7 + $0x18] sm:$0xff]  ;;  %v3838_v27 = vpack.c.bf16 %v619_v24, %v618_v21  ;;  %v588_v31 = vld [vmem:[#allocation7 + $0xa0] sm:$0xff]  ;;  %s274_s25 = scalar_lea.vmem [#allocation10], %s2979_s17 }
  0x8b   : > { %v280_v2 = vld [vmem:[%s4687_s15] sm:$0xff]  ;;  %v281_v4 = vld [vmem:[%s4687_s15 + $0x8] sm:$0xff]  ;;  %v282_v5 = vld [vmem:[%s4687_s15 + $0x10] sm:$0xff]  ;;  %3805 = vmatpush3.bf16.msra.mxu1 %v3804_v17  ;;  %v3808_v28 = vpack.c.bf16 %v571_v26, %v570_v25  ;;  %s2864_s26 = sshll.u32 %s274_s25, 4  ;;  %s3017_s6 = sshll.u32 %s4540_s22, 9  ;;  %s5290_s26 = int_to_ptr.vmem [resolvable:$true] %s2864_s26 }
  0x8c   : > { %3588 = vmatprep.mubr.msk.f32.mxu0 %vm297_vm0, %v280_v2  ;;  %v283_v16 = vld [vmem:[%s4687_s15 + $0x18] sm:$0xff]  ;;  %v284_v22 = vld [vmem:[%s4687_s15 + $0x20] sm:$0xff]  ;;  %v603_v30 = vld [vmem:[#allocation7 + $0x118] sm:$0xff]  ;;  %3807 = vmatprep.subr.bf16.mxu1 %v3806_v23  ;;  %s5295_s12 = scalar_lea.hbm %s5343_s5, %s3017_s6  ;;  %s5297_s8 = scalar_lea.sflag [#allocation4], %s272_s16 }
  0x8d   : > { %3589 = vmatmul.mubr.msk.f32.vlgmr.msra.gmra.mrb[0].mxu0 %vm297_vm0, %v281_v4  ;;  %v602_v29 = vld [vmem:[#allocation7 + $0x110] sm:$0xff]  ;;  %v589_v33 = vld [vmem:[#allocation7 + $0xa8] sm:$0xff]  ;;  %v620_v34 = vld [vmem:[#allocation7 + $0x1a0] sm:$0xff]  ;;  %s4401_s11 = scalar_lea.vmem %s5290_s26, 512  ;;  %p5363_p3 = scmp.ne.s32.totalorder %s5348_s28, 0 }
  0x8e   : > { %3591 = vmatprep.mubr.msk.f32.mxu0 %vm297_vm0, %v282_v5  ;;  %3837 = vmatpush3.bf16.msra.mxu0 %v3836_v18  ;;  %v3840_v32 = vpack.c.bf16 %v603_v30, %v602_v29  ;;  %v621_v35 = vld [vmem:[#allocation7 + $0x1a8] sm:$0xff]  ;;  %v285_v36 = vld [vmem:[%s4687_s15 + $0x28] sm:$0xff]  ;;  %v3810_v37 = vpack.c.bf16 %v589_v33, %v588_v31  ;;  %v572_v39 = vld [vmem:[#allocation7 + $0x20] sm:$0xff]  ;;  %p4402_p2 = scmp.ne.s32.totalorder %s5290_s26, %s4401_s11  ;;  %s4486_s22 = smov [#allocation10]  }
  0x8f   : > { %3839 = vmatprep.subr.bf16.mxu0 %v3838_v27  ;;  %v3842_v38 = vpack.c.bf16 %v621_v35, %v620_v34  ;;  %v573_v40 = vld [vmem:[#allocation7 + $0x28] sm:$0xff]  ;;  %v604_v41 = vld [vmem:[#allocation7 + $0x120] sm:$0xff]  ;;  %v590_v43 = vld [vmem:[#allocation7 + $0xb0] sm:$0xff]  ;;  %3809 = vmatpush3.bf16.msra.mxu1 %v3808_v28  ;;  %s4405_s9 = sshll.u32 %s4486_s22, 4  ;;  %s4406_s9 = int_to_ptr.vmem [resolvable:$false] %s4405_s9 }
  0x90   : > { %v605_v42 = vld [vmem:[#allocation7 + $0x128] sm:$0xff]  ;;  %v591_v44 = vld [vmem:[#allocation7 + $0xb8] sm:$0xff]  ;;  %v3812_v46 = vpack.c.bf16 %v573_v40, %v572_v39  ;;  %v622_v47 = vld [vmem:[#allocation7 + $0x1b0] sm:$0xff]  ;;  %3811 = vmatprep.subr.bf16.mxu1 %v3810_v37  ;;  %p4403_p4 = pnand %p4402_p2, %p5363_p3  ;;  %s4407_s1 = scalar_lea.vmem %s4406_s9, 1024 }
  0x91   : > { %3592 = vmatmul.mubr.msk.f32.gmra.mrb[2].mxu0 %vm297_vm0, %v283_v16  ;;  %v286_v45 = vld [vmem:[%s4687_s15 + $0x30] sm:$0xff]  ;;  %v3844_v49 = vpack.c.bf16 %v605_v42, %v604_v41  ;;  %v3814_v50 = vpack.c.bf16 %v591_v44, %v590_v43  ;;  %v574_v51 = vld [vmem:[#allocation7 + $0x30] sm:$0xff]  ;;  %v593_v57 = vld [vmem:[#allocation7 + $0xc8] sm:$0xff]  ;;  %p4408_p8 = scmp.lt.s32.totalorder %s5290_s26, %s4406_s9  ;;  %p4409_p11 = scmp.lt.s32.totalorder %s4407_s1, %s4401_s11 }
  0x92   : > { %3594 = vmatprep.mubr.msk.f32.mxu0 %vm297_vm0, %v284_v22  ;;  %v623_v48 = vld [vmem:[#allocation7 + $0x1b8] sm:$0xff]  ;;  %3841 = vmatpush3.bf16.msra.mxu0 %v3840_v32  ;;  %v606_v53 = vld [vmem:[#allocation7 + $0x130] sm:$0xff]  ;;  %v592_v56 = vld [vmem:[#allocation7 + $0xc0] sm:$0xff]  ;;  %p4404_p7 = pneg %p4403_p4 }
  0x93   : > { %v575_v52 = vld [vmem:[#allocation7 + $0x38] sm:$0xff]  ;;  %3843 = vmatprep.subr.bf16.mxu0 %v3842_v38  ;;  %v3846_v54 = vpack.c.bf16 %v623_v48, %v622_v47  ;;  %v624_v58 = vld [vmem:[#allocation7 + $0x1c0] sm:$0xff]  ;;  %v625_v59 = vld [vmem:[#allocation7 + $0x1c8] sm:$0xff]  ;;  %3813 = vmatpush3.bf16.msra.mxu1 %v3812_v46  ;;  %v3818_v63 = vpack.c.bf16 %v593_v57, %v592_v56  ;;  %p4410_p13 = por %p4409_p11, %p4408_p8 }
  0x94   : > { %v607_v55 = vld [vmem:[#allocation7 + $0x138] sm:$0xff]  ;;  %v287_v60 = vld [vmem:[%s4687_s15 + $0x38] sm:$0xff]  ;;  %v3816_v61 = vpack.c.bf16 %v575_v52, %v574_v51  ;;  %3815 = vmatprep.subr.bf16.mxu1 %v3814_v50  ;;  %v3850_v3 = vpack.c.bf16 %v625_v59, %v624_v58  ;;  %v594_v5 = vld [vmem:[#allocation7 + $0xd0] sm:$0xff] }
  0x95   : > { %3595 = vmatmul.mubr.msk.f32.gmra.mrb[4].mxu0 %vm297_vm0, %v285_v36  ;;  %v3848_v62 = vpack.c.bf16 %v607_v55, %v606_v53  ;;  %v576_v0 = vld [vmem:[#allocation7 + $0x40] sm:$0xff]  ;;  %v577_v1 = vld [vmem:[#allocation7 + $0x48] sm:$0xff]  ;;  %v595_v6 = vld [vmem:[#allocation7 + $0xd8] sm:$0xff]  ;;  %p4411_p1 = pnand %p4410_p13, %p4404_p7 }
  0x96   : > { %3597 = vmatprep.mubr.msk.f32.mxu0 %vm297_vm0, %v286_v45  ;;  %3845 = vmatpush3.bf16.msra.mxu0 %v3844_v49  ;;  %v608_v2 = vld [vmem:[#allocation7 + $0x140] sm:$0xff]  ;;  %v609_v4 = vld [vmem:[#allocation7 + $0x148] sm:$0xff]  ;;  %v626_v7 = vld [vmem:[#allocation7 + $0x1d0] sm:$0xff]  ;;  %v3820_v9 = vpack.c.bf16 %v577_v1, %v576_v0  ;;  %v3822_v11 = vpack.c.bf16 %v595_v6, %v594_v5 }
  0x97   : > { %3847 = vmatprep.subr.bf16.mxu0 %v3846_v54  ;;  %v627_v8 = vld [vmem:[#allocation7 + $0x1d8] sm:$0xff]  ;;  %3817 = vmatpush3.bf16.msra.mxu1 %v3816_v61  ;;  %v3852_v10 = vpack.c.bf16 %v609_v4, %v608_v2  ;;  %v578_v13 = vld [vmem:[#allocation7 + $0x50] sm:$0xff]  ;;  %v596_v19 = vld [vmem:[#allocation7 + $0xe0] sm:$0xff] }
  0x98   : > { %3819 = vmatprep.subr.bf16.mxu1 %v3818_v63  ;;  %v3854_v12 = vpack.c.bf16 %v627_v8, %v626_v7  ;;  %v579_v14 = vld [vmem:[#allocation7 + $0x58] sm:$0xff]  ;;  %v610_v15 = vld [vmem:[#allocation7 + $0x150] sm:$0xff]  ;;  %v597_v20 = vld [vmem:[#allocation7 + $0xe8] sm:$0xff] }
  0x99   : > { %3598 = vmatmul.mubr.msk.f32.gmra.mrb[6].mxu0 %vm297_vm0, %v287_v60  ;;  %v3824_v16 = vpack.c.bf16 %v579_v14, %v578_v13  ;;  %v611_v17 = vld [vmem:[#allocation7 + $0x158] sm:$0xff]  ;;  %v3826_v21 = vpack.c.bf16 %v597_v20, %v596_v19  ;;  %v628_v22 = vld [vmem:[#allocation7 + $0x1e0] sm:$0xff]  ;;  %v629_v23 = vld [vmem:[#allocation7 + $0x1e8] sm:$0xff] }
  0x9a   : > { %3849 = vmatpush3.bf16.msra.mxu0 %v3848_v62  ;;  %v3856_v18 = vpack.c.bf16 %v611_v17, %v610_v15  ;;  %v580_v24 = vld [vmem:[#allocation7 + $0x60] sm:$0xff]  ;;  %v3858_v25 = vpack.c.bf16 %v629_v23, %v628_v22  ;;  %v581_v26 = vld [vmem:[#allocation7 + $0x68] sm:$0xff]  ;;  %v598_v31 = vld [vmem:[#allocation7 + $0xf0] sm:$0xff] }
  0x9b   : > { %3851 = vmatprep.subr.bf16.mxu0 %v3850_v3  ;;  %3821 = vmatpush3.bf16.msra.mxu1 %v3820_v9  ;;  %v612_v27 = vld [vmem:[#allocation7 + $0x160] sm:$0xff]  ;;  %v613_v28 = vld [vmem:[#allocation7 + $0x168] sm:$0xff]  ;;  %v3828_v29 = vpack.c.bf16 %v581_v26, %v580_v24  ;;  %v599_v32 = vld [vmem:[#allocation7 + $0xf8] sm:$0xff] }
  0x9c   : > { %3823 = vmatprep.subr.bf16.mxu1 %v3822_v11  ;;  %v3860_v30 = vpack.c.bf16 %v613_v28, %v612_v27  ;;  %v630_v33 = vld [vmem:[#allocation7 + $0x1f0] sm:$0xff]  ;;  %v3830_v34 = vpack.c.bf16 %v599_v32, %v598_v31  ;;  %v631_v35 = vld [vmem:[#allocation7 + $0x1f8] sm:$0xff]  ;;  %v632_v43 = vld [vmem:[#allocation7 + $0x200] sm:$0xff] }
  0x9d   : > { %v582_v36 = vld [vmem:[#allocation7 + $0x70] sm:$0xff]  ;;  %v583_v37 = vld [vmem:[#allocation7 + $0x78] sm:$0xff]  ;;  %v3862_v38 = vpack.c.bf16 %v631_v35, %v630_v33  ;;  %v633_v44 = vld [vmem:[#allocation7 + $0x208] sm:$0xff] }
  0x9e   : > { %3853 = vmatpush3.bf16.msra.mxu0 %v3852_v10  ;;  %v3832_v39 = vpack.c.bf16 %v583_v37, %v582_v36  ;;  %v614_v40 = vld [vmem:[#allocation7 + $0x170] sm:$0xff]  ;;  %v615_v41 = vld [vmem:[#allocation7 + $0x178] sm:$0xff]  ;;  %v3866_v45 = vpack.c.bf16 %v633_v44, %v632_v43  ;;  %vm4728_vm5 = vmneg %vm435_vm1 }
  0x9f   : > { %3855 = vmatprep.subr.bf16.mxu0 %v3854_v12  ;;  %3825 = vmatpush3.bf16.msra.mxu1 %v3824_v16  ;;  %v3864_v42 = vpack.c.bf16 %v615_v41, %v614_v40  ;;  %v2982_v46 = vld [vmem:[#allocation5] ss:$0 sm:$0xff]  ;;  %v634_v59 = vld [vmem:[#allocation7 + $0x210] sm:$0xff]  ;;  %v636_v15 = vld [vmem:[#allocation7 + $0x220] sm:$0xff] }
  0xa0   : > { %3827 = vmatprep.subr.bf16.mxu1 %v3826_v21  ;;  %v635_v60 = vld [vmem:[#allocation7 + $0x218] sm:$0xff]  ;;  %v637_v16 = vld [vmem:[#allocation7 + $0x228] sm:$0xff]  ;;  %v638_v37 = vld [vmem:[#allocation7 + $0x230] sm:$0xff] }
  0xa1   : > { %v3870_v10 = vpack.c.bf16 %v635_v60, %v634_v59 }
  0xa2   : > { %3857 = vmatpush3.bf16.msra.mxu0 %v3856_v18 }
  0xa3   : > { %3859 = vmatprep.subr.bf16.mxu0 %v3858_v25  ;;  %3829 = vmatpush3.bf16.msra.mxu1 %v3828_v29  ;;  %v3874_v29 = vpack.c.bf16 %v637_v16, %v636_v15  ;;  %v644_v16 = vld [vmem:[#allocation7 + $0x260] sm:$0xff] }
  0xa4   : > { %3831 = vmatprep.subr.bf16.mxu1 %v3830_v34 }
  0xa6   : > { %3861 = vmatpush3.bf16.msra.mxu0 %v3860_v30 }
  0xa7   : > { %3863 = vmatprep.subr.bf16.mxu0 %v3862_v38  ;;  %3833 = vmatpush3.bf16.msra.mxu1 %v3832_v39  ;;  %v639_v38 = vld [vmem:[#allocation7 + $0x238] sm:$0xff] }
  0xa8   : > { %3867 = vmatprep.subr.bf16.mxu1 %v3866_v45  ;;  %v3878_v43 = vpack.c.bf16 %v639_v38, %v638_v37 }
  0xaa   : > { %3865 = vmatpush3.bf16.msra.mxu0 %v3864_v42 }
 0x160   : > { %v3590_v47 = vpop.f32.mrb[0].mxu0 }
 0x161   : > { %v4705_v48 = vadd.f32 %v3590_v47, %v2982_v46  ;;  %v388_v49 = vpop.f32.mrb[1].mxu0 }
 0x162   : > { %v4707_v50 = vadd.f32 %v2982_v46, %v388_v49  ;;  %v640_v49 = vld [vmem:[#allocation7 + $0x240] sm:$0xff] }
 0x163   : > { %v437_v51 = vrot.slane %v4705_v48, 6 }
 0x164   : > { %v436_v52 = vrot.slane %v4707_v50, 6  ;;  %v3593_v53 = vpop.f32.mrb[2].mxu0 }
 0x165   : > { %v4711_v54 = vadd.f32 %v3593_v53, %v2982_v46  ;;  %v398_v55 = vpop.f32.mrb[3].mxu0 }
 0x166   : > { %v4714_v56 = vsel %vm435_vm1, %v436_v52, %v437_v51  ;;  %v4717_v57 = vsel %vm435_vm1, 0.0, %v436_v52  ;;  %v4719_v58 = vadd.f32 %v2982_v46, %v398_v55 }
 0x167   : > { %v441_v61 = vrot.slane %v4711_v54, 6  ;;  %v465_v62 = vrot.slane %v4717_v57, 1  ;;  %v466_v63 = vrot.slane %v4714_v56, 1  ;;  %v517_v0 = vrot.slane %v4717_v57, 3 }
 0x168   : > { %v439_v1 = vrot.slane %v4719_v58, 6  ;;  %v3596_v2 = vpop.f32.mrb[4].mxu0  ;;  %v518_v3 = vrot.slane %v4714_v56, 3  ;;  %v491_v5 = vrot.slane %v4717_v57, 2  ;;  %v492_v6 = vrot.slane %v4714_v56, 2 }
 0x169   : > { %v4734_v7 = vadd.f32 %v3596_v2, %v2982_v46  ;;  %v408_v8 = vpop.f32.mrb[5].mxu0  ;;  %v467_v9 = vsel %vm464_vm2, %v465_v62, %v466_v63  ;;  %v643_v2 = vld [vmem:[#allocation7 + $0x258] sm:$0xff] }
 0x16a   : > { %v4738_v11 = vsel %vm435_vm1, %v437_v51, %v439_v1  ;;  %v4741_v12 = vsel %vm435_vm1, %v439_v1, %v441_v61  ;;  %v4743_v13 = vadd.f32 %v2982_v46, %v408_v8  ;;  %719 = vmatprep.mubr.f32.mxu1 %v467_v9  ;;  %v519_v14 = vsel %vm516_vm3, %v517_v0, %v518_v3  ;;  %v641_v51 = vld [vmem:[#allocation7 + $0x248] sm:$0xff]  ;;  %v642_v1 = vld [vmem:[#allocation7 + $0x250] sm:$0xff] }
 0x16b   : > { %v445_v17 = vrot.slane %v4734_v7, 6  ;;  %824 = vmatprep.mubr.f32.mxu0 %v519_v14  ;;  %2993 = vmatmul.mubr.msk.f32.vlgmr.msra.gmra.mrb[0].mxu1 %vm4728_vm5, %v436_v52  ;;  %v493_v18 = vsel %vm490_vm4, %v491_v5, %v492_v6  ;;  %v468_v19 = vrot.slane %v4738_v11, 1  ;;  %v520_v20 = vrot.slane %v4738_v11, 3 }
 0x16c   : > { %v443_v21 = vrot.slane %v4743_v13, 6  ;;  %825 = vmatmul.mubr.f32.vlgmr.msra.gmra.mrb[8].mxu0 %v493_v18  ;;  %v3599_v22 = vpop.f32.mrb[6].mxu0  ;;  %3869 = vmatpush3.bf16.msra.mxu1 %v3866_v45  ;;  %v494_v23 = vrot.slane %v4738_v11, 2  ;;  %v470_v24 = vrot.slane %v4741_v12, 1  ;;  %v522_v25 = vrot.slane %v4741_v12, 3 }
 0x16d   : > { %v418_v26 = vpop.f32.mrb[7].mxu0  ;;  %v469_v27 = vsel %vm464_vm2, %v466_v63, %v468_v19  ;;  %v521_v28 = vsel %vm516_vm3, %v518_v3, %v520_v20  ;;  %3871 = vmatprep.subr.bf16.mxu1 %v3870_v10  ;;  %v4761_v31 = vadd.f32 %v3599_v22, %v2982_v46  ;;  %v496_v36 = vrot.slane %v4741_v12, 2 }
 0x16e   : > { %v4759_v30 = vsel %vm435_vm1, %v441_v61, %v443_v21  ;;  %v4763_v32 = vadd.f32 %v2982_v46, %v418_v26  ;;  %724 = vmatprep.mubr.f32.mxu1 %v469_v27  ;;  %829 = vmatprep.mubr.f32.mxu0 %v521_v28  ;;  %v4766_v33 = vsel %vm435_vm1, %v443_v21, %v445_v17  ;;  %v646_v26 = vld [vmem:[#allocation7 + $0x270] sm:$0xff]  ;;  %v647_v27 = vld [vmem:[#allocation7 + $0x278] sm:$0xff] }
 0x16f   : > { %725 = vmatmul.mubr.f32.gmra.mrb[2].mxu1 %v4714_v56  ;;  %v495_v34 = vsel %vm490_vm4, %v492_v6, %v494_v23  ;;  %v471_v35 = vsel %vm464_vm2, %v468_v19, %v470_v24  ;;  %v523_v40 = vsel %vm516_vm3, %v520_v20, %v522_v25  ;;  %v472_v41 = vrot.slane %v4759_v30, 1 }
 0x170   : > { %v447_v39 = vrot.slane %v4763_v32, 6  ;;  %830 = vmatmul.mubr.f32.gmra.mrb[10].mxu0 %v495_v34  ;;  %729 = vmatprep.mubr.f32.mxu1 %v471_v35  ;;  %v524_v42 = vrot.slane %v4759_v30, 3  ;;  %v497_v44 = vsel %vm490_vm4, %v494_v23, %v496_v36  ;;  %v498_v46 = vrot.slane %v4759_v30, 2 }
 0x171   : > { %834 = vmatprep.mubr.f32.mxu0 %v523_v40  ;;  %3873 = vmatpush3.bf16.msra.mxu1 %v3870_v10  ;;  %v473_v45 = vsel %vm464_vm2, %v470_v24, %v472_v41  ;;  %v474_v47 = vrot.slane %v4766_v33, 1  ;;  %v449_v52 = vrot.slane %v4761_v31, 6  ;;  %v526_v59 = vrot.slane %v4766_v33, 3 }
 0x172   : > { %3875 = vmatprep.subr.bf16.mxu1 %v3874_v29  ;;  %v4783_v53 = vsel %vm435_vm1, %v445_v17, %v447_v39  ;;  %v525_v55 = vsel %vm516_vm3, %v522_v25, %v524_v42  ;;  %v3882_v60 = vpack.c.bf16 %v641_v51, %v640_v49  ;;  %v499_v61 = vsel %vm490_vm4, %v496_v36, %v498_v46  ;;  %v645_v17 = vld [vmem:[#allocation7 + $0x268] sm:$0xff] }
 0x173   : > { %730 = vmatmul.mubr.f32.gmra.mrb[4].mxu1 %v4738_v11  ;;  %v475_v62 = vsel %vm464_vm2, %v472_v41, %v474_v47  ;;  %v500_v63 = vrot.slane %v4766_v33, 2  ;;  %v476_v0 = vrot.slane %v4783_v53, 1  ;;  %v4793_v3 = vsel %vm435_vm1, %v447_v39, %v449_v52 }
 0x174   : > { %835 = vmatmul.mubr.f32.gmra.mrb[12].mxu0 %v497_v44  ;;  %734 = vmatprep.mubr.f32.mxu1 %v473_v45  ;;  %v527_v5 = vsel %vm516_vm3, %v524_v42, %v526_v59  ;;  %v528_v6 = vrot.slane %v4783_v53, 3  ;;  %v3886_v8 = vpack.c.bf16 %v643_v2, %v642_v1  ;;  %v502_v14 = vrot.slane %v4783_v53, 2  ;;  %v1147_v2 = vld [vmem:[#allocation7 + $0x380] sm:$0xff] }
 0x175   : > { %839 = vmatprep.mubr.f32.mxu0 %v525_v55  ;;  %3877 = vmatpush3.bf16.msra.mxu1 %v3874_v29  ;;  %v501_v9 = vsel %vm490_vm4, %v498_v46, %v500_v63  ;;  %v477_v10 = vsel %vm464_vm2, %v474_v47, %v476_v0  ;;  %v478_v15 = vrot.slane %v4793_v3, 1  ;;  %v4803_v18 = vsel %vm435_vm1, %v449_v52, 0.0  ;;  %v1131_v55 = vld [vmem:[#allocation7 + $0x300] sm:$0xff] }
 0x176   : > { %3879 = vmatprep.subr.bf16.mxu1 %v3878_v43  ;;  %v529_v19 = vsel %vm516_vm3, %v526_v59, %v528_v6  ;;  %v530_v20 = vrot.slane %v4793_v3, 3  ;;  %v3890_v21 = vpack.c.bf16 %v645_v17, %v644_v16  ;;  %v503_v22 = vsel %vm490_vm4, %v500_v63, %v502_v14  ;;  %v1132_v59 = vld [vmem:[#allocation7 + $0x308] sm:$0xff]  ;;  %v1118_v16 = vld [vmem:[#allocation7 + $0x298] sm:$0xff] }
 0x177   : > { %735 = vmatmul.mubr.f32.gmra.mrb[6].mxu1 %v4741_v12  ;;  %v479_v23 = vsel %vm464_vm2, %v476_v0, %v478_v15  ;;  %v504_v24 = vrot.slane %v4793_v3, 2  ;;  %v480_v25 = vrot.slane %v4803_v18, 1  ;;  %v532_v29 = vrot.slane %v4803_v18, 3  ;;  %v1116_v63 = vld [vmem:[#allocation7 + $0x288] sm:$0xff] }
 0x178   : > { %840 = vmatmul.mubr.f32.gmra.mrb[14].mxu0 %v499_v61  ;;  %739 = vmatprep.mubr.f32.mxu1 %v475_v62  ;;  %v531_v28 = vsel %vm516_vm3, %v528_v6, %v530_v20  ;;  %v3894_v34 = vpack.c.bf16 %v647_v27, %v646_v26  ;;  %v543_v35 = vrot.slane %v4717_v57, 4  ;;  %v506_v38 = vrot.slane %v4803_v18, 2  ;;  %v1164_v61 = vld [vmem:[#allocation7 + $0x408] sm:$0xff]  ;;  %v1115_v62 = vld [vmem:[#allocation7 + $0x280] sm:$0xff]  ;;  %v1133_v6 = vld [vmem:[#allocation7 + $0x310] sm:$0xff] }
 0x179   : > { %844 = vmatprep.mubr.f32.mxu0 %v527_v5  ;;  %3881 = vmatpush3.bf16.msra.mxu1 %v3878_v43  ;;  %v505_v36 = vsel %vm490_vm4, %v502_v14, %v504_v24  ;;  %v481_v37 = vsel %vm464_vm2, %v478_v15, %v480_v25  ;;  %v544_v39 = vrot.slane %v4714_v56, 4  ;;  %v533_v40 = vsel %vm516_vm3, %v530_v20, %v532_v29  ;;  %v1166_v14 = vld [vmem:[#allocation7 + $0x418] sm:$0xff]  ;;  %v1117_v15 = vld [vmem:[#allocation7 + $0x290] sm:$0xff]  ;;  %v1168_v26 = vld [vmem:[#allocation7 + $0x428] sm:$0xff] }
 0x17a   : > { %3883 = vmatprep.subr.bf16.mxu1 %v3882_v60  ;;  %v507_v57 = vsel %vm490_vm4, %v504_v24, %v506_v38  ;;  %v546_v42 = vrot.slane %v4738_v11, 4  ;;  %v548_v56 = vrot.slane %v4741_v12, 4  ;;  %v550_v44 = vrot.slane %v4759_v30, 4  ;;  %v1150_v20 = vld [vmem:[#allocation7 + $0x398] sm:$0xff]  ;;  %v1167_v24 = vld [vmem:[#allocation7 + $0x420] sm:$0xff]  ;;  %v1137_v38 = vld [vmem:[#allocation7 + $0x330] sm:$0xff] }
 0x17b   : > { %740 = vmatmul.mubr.f32.gmra.mrb[8].mxu1 %v4759_v30  ;;  %v545_v41 = vsel %vm542_vm6, %v543_v35, %v544_v39  ;;  %v552_v46 = vrot.slane %v4766_v33, 4  ;;  %v554_v49 = vrot.slane %v4783_v53, 4  ;;  %v556_v12 = vrot.slane %v4793_v3, 4  ;;  %v1119_v27 = vld [vmem:[#allocation7 + $0x2a0] sm:$0xff] }
 0x17c   : > { %845 = vmatmul.mubr.f32.gmra.mrb[16].mxu0 %v501_v9  ;;  %744 = vmatprep.mubr.f32.mxu1 %v477_v10  ;;  %v547_v43 = vsel %vm542_vm6, %v544_v39, %v546_v42  ;;  %v549_v45 = vsel %vm542_vm6, %v546_v42, %v548_v56  ;;  %v551_v47 = vsel %vm542_vm6, %v548_v56, %v550_v44  ;;  %v558_v30 = vrot.slane %v4803_v18, 4  ;;  %v1165_v9 = vld [vmem:[#allocation7 + $0x410] sm:$0xff]  ;;  %v1151_v35 = vld [vmem:[#allocation7 + $0x3a0] sm:$0xff]  ;;  %v1138_v39 = vld [vmem:[#allocation7 + $0x338] sm:$0xff] }
 0x17d   : > { %849 = vmatprep.mubr.f32.mxu0 %v529_v19  ;;  %3885 = vmatpush3.bf16.msra.mxu1 %v3882_v60  ;;  %v553_v11 = vsel %vm542_vm6, %v550_v44, %v552_v46  ;;  %v555_v51 = vsel %vm542_vm6, %v552_v46, %v554_v49  ;;  %v557_v52 = vsel %vm542_vm6, %v554_v49, %v556_v12  ;;  %v1149_v19 = vld [vmem:[#allocation7 + $0x390] sm:$0xff]  ;;  %v1122_v56 = vld [vmem:[#allocation7 + $0x2b8] sm:$0xff]  ;;  %v1139_v49 = vld [vmem:[#allocation7 + $0x340] sm:$0xff] }
 0x17e   : > { %3887 = vmatprep.subr.bf16.mxu1 %v3886_v8  ;;  %v3898_v60 = vpack.c.bf16 %v1132_v59, %v1131_v55  ;;  %v3900_v1 = vpack.c.bf16 %v1116_v63, %v1115_v62  ;;  %v3934_v17 = vpack.c.bf16 %v1166_v14, %v1165_v9  ;;  %v3904_v18 = vpack.c.bf16 %v1118_v16, %v1117_v15  ;;  %v1121_v42 = vld [vmem:[#allocation7 + $0x2b0] sm:$0xff]  ;;  %v1154_v46 = vld [vmem:[#allocation7 + $0x3b8] sm:$0xff]  ;;  %v1143_v15 = vld [vmem:[#allocation7 + $0x360] sm:$0xff] }
 0x17f   : > { %745 = vmatmul.mubr.f32.gmra.mrb[10].mxu1 %v4766_v33  ;;  %v559_v33 = vsel %vm542_vm6, %v556_v12, %v558_v30  ;;  %v3938_v29 = vpack.c.bf16 %v1168_v26, %v1167_v24  ;;  %v3912_v44 = vpack.c.bf16 %v1122_v56, %v1121_v42  ;;  %v1171_v12 = vld [vmem:[#allocation7 + $0x440] sm:$0xff]  ;;  %v1172_v30 = vld [vmem:[#allocation7 + $0x448] sm:$0xff]  ;;  %v1141_v62 = vld [vmem:[#allocation7 + $0x350] sm:$0xff] }
 0x180   : > { %850 = vmatmul.mubr.f32.gmra.mrb[18].mxu0 %v503_v22  ;;  %749 = vmatprep.mubr.f32.mxu1 %v479_v23  ;;  %v1135_v22 = vld [vmem:[#allocation7 + $0x320] sm:$0xff]  ;;  %v1136_v23 = vld [vmem:[#allocation7 + $0x328] sm:$0xff]  ;;  %v3946_v55 = vpack.c.bf16 %v1172_v30, %v1171_v12  ;;  %v1142_v63 = vld [vmem:[#allocation7 + $0x358] sm:$0xff] }
 0x181   : > { %854 = vmatprep.mubr.f32.mxu0 %v531_v28  ;;  %3889 = vmatpush3.bf16.msra.mxu1 %v3886_v8  ;;  %v1134_v8 = vld [vmem:[#allocation7 + $0x318] sm:$0xff]  ;;  %v3906_v25 = vpack.c.bf16 %v1136_v23, %v1135_v22  ;;  %v1120_v28 = vld [vmem:[#allocation7 + $0x2a8] sm:$0xff]  ;;  %v1157_v9 = vld [vmem:[#allocation7 + $0x3d0] sm:$0xff] }
 0x182   : > { %3891 = vmatprep.subr.bf16.mxu1 %v3890_v21  ;;  %3899 = vmatprep.subr.bf16.mxu0 %v3898_v60  ;;  %v3902_v10 = vpack.c.bf16 %v1134_v8, %v1133_v6  ;;  %v1156_v60 = vld [vmem:[#allocation7 + $0x3c8] sm:$0xff]  ;;  %v1159_v24 = vld [vmem:[#allocation7 + $0x3e0] sm:$0xff] }
 0x183   : > { %750 = vmatmul.mubr.f32.gmra.mrb[12].mxu1 %v4783_v53  ;;  %v1163_v53 = vld [vmem:[#allocation7 + $0x400] sm:$0xff]  ;;  %3901 = vmatpush3.bf16.msra.mxu0 %v3900_v1  ;;  %v3918_v1 = vpack.c.bf16 %v1142_v63, %v1141_v62  ;;  %v1144_v16 = vld [vmem:[#allocation7 + $0x368] sm:$0xff] }
 0x184   : > { %855 = vmatmul.mubr.f32.gmra.mrb[20].mxu0 %v505_v36  ;;  %754 = vmatprep.mubr.f32.mxu1 %v481_v37  ;;  %v3930_v0 = vpack.c.bf16 %v1164_v61, %v1163_v53  ;;  %v1152_v36 = vld [vmem:[#allocation7 + $0x3a8] sm:$0xff]  ;;  %v1155_v53 = vld [vmem:[#allocation7 + $0x3c0] sm:$0xff] }
 0x185   : > { %859 = vmatprep.mubr.f32.mxu0 %v533_v40  ;;  %3893 = vmatpush3.bf16.msra.mxu1 %v3890_v21  ;;  %v3936_v21 = vpack.c.bf16 %v1150_v20, %v1149_v19  ;;  %v3940_v37 = vpack.c.bf16 %v1152_v36, %v1151_v35  ;;  %v1169_v40 = vld [vmem:[#allocation7 + $0x430] sm:$0xff]  ;;  %v3948_v61 = vpack.c.bf16 %v1156_v60, %v1155_v53  ;;  %v1176_v19 = vld [vmem:[#allocation7 + $0x468] sm:$0xff]  ;;  %v1127_v20 = vld [vmem:[#allocation7 + $0x2e0] sm:$0xff] }
 0x186   : > { %3895 = vmatprep.subr.bf16.mxu1 %v3894_v34  ;;  %3903 = vmatprep.subr.bf16.mxu0 %v3902_v10  ;;  %v1158_v10 = vld [vmem:[#allocation7 + $0x3d8] sm:$0xff]  ;;  %v1129_v36 = vld [vmem:[#allocation7 + $0x2f0] sm:$0xff]  ;;  %v1179_v42 = vld [vmem:[#allocation7 + $0x480] sm:$0xff] }
 0x187   : > { %755 = vmatmul.mubr.f32.gmra.mrb[14].mxu1 %v4793_v3  ;;  %v1148_v3 = vld [vmem:[#allocation7 + $0x388] sm:$0xff]  ;;  %3905 = vmatpush3.bf16.msra.mxu0 %v3904_v18  ;;  %v3952_v14 = vpack.c.bf16 %v1158_v10, %v1157_v9  ;;  %v3922_v18 = vpack.c.bf16 %v1144_v16, %v1143_v15  ;;  %v1178_v35 = vld [vmem:[#allocation7 + $0x478] sm:$0xff] }
 0x188   : > { %860 = vmatmul.mubr.f32.gmra.mrb[22].mxu0 %v507_v57  ;;  %3632 = vmatprep.mubr.f32.mxu1 %v545_v41  ;;  %v3932_v5 = vpack.c.bf16 %v1148_v3, %v1147_v2  ;;  %v3910_v57 = vpack.c.bf16 %v1138_v39, %v1137_v38  ;;  %v1170_v41 = vld [vmem:[#allocation7 + $0x438] sm:$0xff]  ;;  %v1125_v3 = vld [vmem:[#allocation7 + $0x2d0] sm:$0xff]  ;;  %v1180_v56 = vld [vmem:[#allocation7 + $0x488] sm:$0xff] }
 0x189   : > { %3897 = vmatpush3.bf16.msra.mxu1 %v3894_v34  ;;  %v3908_v34 = vpack.c.bf16 %v1120_v28, %v1119_v27  ;;  %3907 = vmatprep.subr.bf16.mxu0 %v3906_v25  ;;  %v1174_v2 = vld [vmem:[#allocation7 + $0x458] sm:$0xff]  ;;  %v1160_v25 = vld [vmem:[#allocation7 + $0x3e8] sm:$0xff]  ;;  %v1145_v27 = vld [vmem:[#allocation7 + $0x370] sm:$0xff] }
 0x18a   : > { %3931 = vmatprep.subr.bf16.mxu1 %v3930_v0  ;;  %v1173_v0 = vld [vmem:[#allocation7 + $0x450] sm:$0xff]  ;;  %v3956_v26 = vpack.c.bf16 %v1160_v25, %v1159_v24  ;;  %v1146_v28 = vld [vmem:[#allocation7 + $0x378] sm:$0xff] }
 0x18b   : > { %3909 = vmatpush3.bf16.msra.mxu0 %v3908_v34  ;;  %v3950_v6 = vpack.c.bf16 %v1174_v2, %v1173_v0  ;;  %v3926_v34 = vpack.c.bf16 %v1146_v28, %v1145_v27 }
 0x18c   : > { %3633 = vmatmul.mubr.f32.vlgmr.msra.gmra.mrb[16].mxu1 %v547_v43  ;;  %v3942_v43 = vpack.c.bf16 %v1170_v41, %v1169_v40  ;;  %3911 = vmatprep.subr.bf16.mxu0 %v3910_v57  ;;  %v1161_v40 = vld [vmem:[#allocation7 + $0x3f0] sm:$0xff]  ;;  %v1162_v57 = vld [vmem:[#allocation7 + $0x3f8] sm:$0xff] }
 0x18d   : > { %3635 = vmatprep.mubr.f32.mxu1 %v549_v45  ;;  %3933 = vmatpush3.bf16.msra.mxu1 %v3932_v5  ;;  %v1153_v45 = vld [vmem:[#allocation7 + $0x3b0] sm:$0xff]  ;;  %v1126_v5 = vld [vmem:[#allocation7 + $0x2d8] sm:$0xff]  ;;  %v3960_v41 = vpack.c.bf16 %v1162_v57, %v1161_v40 }
 0x18e   : > { %3935 = vmatprep.subr.bf16.mxu1 %v3934_v17  ;;  %v3920_v8 = vpack.c.bf16 %v1126_v5, %v1125_v3  ;;  %v1175_v17 = vld [vmem:[#allocation7 + $0x460] sm:$0xff] }
 0x18f   : > { %3913 = vmatpush3.bf16.msra.mxu0 %v3912_v44  ;;  %v3954_v22 = vpack.c.bf16 %v1176_v19, %v1175_v17 }
 0x190   : > { %3636 = vmatmul.mubr.f32.gmra.mrb[18].mxu1 %v551_v47  ;;  %v3944_v47 = vpack.c.bf16 %v1154_v46, %v1153_v45  ;;  %v2991_v46 = vld [vmem:[#allocation8] ss:$0 sm:$0xff] }
 0x191   : > { %3638 = vmatprep.mubr.f32.mxu1 %v553_v11  ;;  %3937 = vmatpush3.bf16.msra.mxu1 %v3936_v21  ;;  %v1140_v11 = vld [vmem:[#allocation7 + $0x348] sm:$0xff] }
 0x192   : > { %3939 = vmatprep.subr.bf16.mxu1 %v3938_v29  ;;  %v1128_v21 = vld [vmem:[#allocation7 + $0x2e8] sm:$0xff]  ;;  %v1177_v29 = vld [vmem:[#allocation7 + $0x470] sm:$0xff] }
 0x193   : > { %v3924_v23 = vpack.c.bf16 %v1128_v21, %v1127_v20  ;;  %v3958_v38 = vpack.c.bf16 %v1178_v35, %v1177_v29 }
 0x194   : > { %3639 = vmatmul.mubr.f32.gmra.mrb[20].mxu1 %v555_v51  ;;  %v3914_v51 = vpack.c.bf16 %v1140_v11, %v1139_v49 }
 0x195   : > { %3641 = vmatprep.mubr.f32.mxu1 %v557_v52  ;;  %3941 = vmatpush3.bf16.msra.mxu1 %v3940_v37  ;;  %v1123_v52 = vld [vmem:[#allocation7 + $0x2c0] sm:$0xff]  ;;  %v1130_v37 = vld [vmem:[#allocation7 + $0x2f8] sm:$0xff] }
 0x196   : > { %3943 = vmatprep.subr.bf16.mxu1 %v3942_v43  ;;  %3915 = vmatprep.subr.bf16.mxu0 %v3914_v51  ;;  %v3928_v39 = vpack.c.bf16 %v1130_v37, %v1129_v36  ;;  %v4838_v43 = vpack.c.bf16 %v1180_v56, %v1179_v42 }
 0x198   : > { %3642 = vmatmul.mubr.f32.gmra.mrb[22].mxu1 %v559_v33  ;;  %v1124_v33 = vld [vmem:[#allocation7 + $0x2c8] sm:$0xff] }
 0x199   : > { %3945 = vmatpush3.bf16.msra.mxu1 %v3944_v47  ;;  %v3916_v59 = vpack.c.bf16 %v1124_v33, %v1123_v52 }
 0x19a   : > { %3947 = vmatprep.subr.bf16.mxu1 %v3946_v55 }
 0x19b   : > { %3917 = vmatpush3.bf16.msra.mxu0 %v3916_v59 }
 0x19c   : > { %3919 = vmatprep.subr.bf16.mxu0 %v3918_v1 }
 0x19d   : > { %3949 = vmatpush3.bf16.msra.mxu1 %v3948_v61 }
 0x19e   : > { %3951 = vmatprep.subr.bf16.mxu1 %v3950_v6 }
 0x19f   : > { %3921 = vmatpush3.bf16.msra.mxu0 %v3920_v8 }
 0x1a0   : > { %3923 = vmatprep.subr.bf16.mxu0 %v3922_v18 }
 0x1a1   : > { %3953 = vmatpush3.bf16.msra.mxu1 %v3952_v14 }
 0x1a2   : > { %3955 = vmatprep.subr.bf16.mxu1 %v3954_v22 }
 0x1a3   : > { %3925 = vmatpush3.bf16.msra.mxu0 %v3924_v23 }
 0x1a4   : > { %3927 = vmatprep.subr.bf16.mxu0 %v3926_v34 }
 0x1a5   : > { %3957 = vmatpush3.bf16.msra.mxu1 %v3956_v26 }
 0x1a6   : > { %3959 = vmatprep.subr.bf16.mxu1 %v3958_v38 }
 0x1a7   : > { %3929 = vmatpush3.bf16.msra.mxu0 %v3928_v39 }
 0x1a8   : > { %3963 = vmatprep.subr.bf16.mxu0 %v4838_v43 }
 0x1a9   : > { %3961 = vmatpush3.bf16.msra.mxu1 %v3960_v41 }
 0x23e   : > { %v3060_v44 = vpop.f32.mrb[0].mxu1 }
 0x23f   : > { %v3116_v45 = vpop.f32.mrb[8].mxu0  ;;  %v3061_v47 = vpop.f32.mrb[1].mxu1 }
 0x240   : > { %v3062_v49 = vadd.f32 %v3061_v47, %v3060_v44  ;;  %v3117_v11 = vpop.f32.mrb[9].mxu0 }
 0x241   : > { %v3118_v12 = vadd.f32 %v3117_v11, %v3116_v45 }
 0x242   : > { %v722_v51 = vadd.f32 %v3062_v49, %v2991_v46  ;;  %v3063_v30 = vpop.f32.mrb[2].mxu1 }
 0x243   : > { %v3119_v52 = vpop.f32.mrb[10].mxu0  ;;  %v3064_v33 = vpop.f32.mrb[3].mxu1 }
 0x244   : > { %v3065_v55 = vadd.f32 %v3064_v33, %v3063_v30  ;;  %v3120_v59 = vpop.f32.mrb[11].mxu0  ;;  %v827_v53 = vadd.f32 %v3118_v12, %v722_v51 }
 0x245   : > { %v3121_v60 = vadd.f32 %v3120_v59, %v3119_v52 }
 0x246   : > { %v727_v61 = vadd.f32 %v3065_v55, %v2991_v46  ;;  %v3066_v62 = vpop.f32.mrb[4].mxu1 }
 0x247   : > { %v3122_v63 = vpop.f32.mrb[12].mxu0  ;;  %v3067_v0 = vpop.f32.mrb[5].mxu1 }
 0x248   : > { %v3068_v1 = vadd.f32 %v3067_v0, %v3066_v62  ;;  %v3123_v2 = vpop.f32.mrb[13].mxu0  ;;  %v832_v3 = vadd.f32 %v3121_v60, %v727_v61  ;;  %v1182_v0 = vld [vmem:[#allocation7 + $0x498] sm:$0xff] }
 0x249   : > { %v3124_v5 = vadd.f32 %v3123_v2, %v3122_v63  ;;  %v1181_v63 = vld [vmem:[#allocation7 + $0x490] sm:$0xff]  ;;  %v1183_v2 = vld [vmem:[#allocation7 + $0x4a0] sm:$0xff] }
 0x24a   : > { %v732_v6 = vadd.f32 %v3068_v1, %v2991_v46  ;;  %v3069_v8 = vpop.f32.mrb[6].mxu1 }
 0x24b   : > { %v3125_v9 = vpop.f32.mrb[14].mxu0  ;;  %v3070_v10 = vpop.f32.mrb[7].mxu1 }
 0x24c   : > { %v3071_v14 = vadd.f32 %v3070_v10, %v3069_v8  ;;  %v3126_v15 = vpop.f32.mrb[15].mxu0  ;;  %v837_v16 = vadd.f32 %v3124_v5, %v732_v6  ;;  %v1184_v5 = vld [vmem:[#allocation7 + $0x4a8] sm:$0xff]  ;;  %v1185_v6 = vld [vmem:[#allocation7 + $0x4b0] sm:$0xff]  ;;  %v1186_v10 = vld [vmem:[#allocation7 + $0x4b8] sm:$0xff] }
 0x24d   : > { %v3127_v17 = vadd.f32 %v3126_v15, %v3125_v9  ;;  %v1188_v15 = vld [vmem:[#allocation7 + $0x4c8] sm:$0xff] }
 0x24e   : > { %v737_v18 = vadd.f32 %v3071_v14, %v2991_v46  ;;  %v3072_v19 = vpop.f32.mrb[8].mxu1  ;;  %v1187_v14 = vld [vmem:[#allocation7 + $0x4c0] sm:$0xff] }
 0x24f   : > { %v3128_v20 = vpop.f32.mrb[16].mxu0  ;;  %v3073_v21 = vpop.f32.mrb[9].mxu1 }
 0x250   : > { %v3074_v22 = vadd.f32 %v3073_v21, %v3072_v19  ;;  %v3129_v23 = vpop.f32.mrb[17].mxu0  ;;  %v842_v24 = vadd.f32 %v3127_v17, %v737_v18 }
 0x251   : > { %v3130_v25 = vadd.f32 %v3129_v23, %v3128_v20  ;;  %v1190_v20 = vld [vmem:[#allocation7 + $0x4d8] sm:$0xff]  ;;  %v4843_v23 = vpack.c.bf16 %v1184_v5, %v1183_v2 }
 0x252   : > { %v742_v26 = vadd.f32 %v3074_v22, %v2991_v46  ;;  %v3075_v27 = vpop.f32.mrb[10].mxu1  ;;  %v4841_v22 = vpack.c.bf16 %v1182_v0, %v1181_v63 }
 0x253   : > { %v3131_v28 = vpop.f32.mrb[18].mxu0  ;;  %v3076_v29 = vpop.f32.mrb[11].mxu1 }
 0x254   : > { %v3077_v34 = vadd.f32 %v3076_v29, %v3075_v27  ;;  %v3132_v35 = vpop.f32.mrb[19].mxu0  ;;  %v847_v36 = vadd.f32 %v3130_v25, %v742_v26  ;;  %v4845_v25 = vpack.c.bf16 %v1186_v10, %v1185_v6  ;;  %v4847_v26 = vpack.c.bf16 %v1188_v15, %v1187_v14 }
 0x255   : > { %v3133_v37 = vadd.f32 %v3132_v35, %v3131_v28 }
 0x256   : > { %v747_v38 = vadd.f32 %v3077_v34, %v2991_v46  ;;  %v3078_v39 = vpop.f32.mrb[12].mxu1 }
 0x257   : > { %v3134_v40 = vpop.f32.mrb[20].mxu0  ;;  %v3079_v57 = vpop.f32.mrb[13].mxu1 }
 0x258   : > { %v3080_v41 = vadd.f32 %v3079_v57, %v3078_v39  ;;  %v3135_v42 = vpop.f32.mrb[21].mxu0  ;;  %v852_v56 = vadd.f32 %v3133_v37, %v747_v38 }
 0x259   : > { %v3136_v44 = vadd.f32 %v3135_v42, %v3134_v40 }
 0x25a   : > { %v752_v45 = vadd.f32 %v3080_v41, %v2991_v46  ;;  %v3081_v47 = vpop.f32.mrb[14].mxu1 }
 0x25b   : > { %v3137_v49 = vpop.f32.mrb[22].mxu0  ;;  %v3082_v11 = vpop.f32.mrb[15].mxu1 }
 0x25c   : > { %v3083_v12 = vadd.f32 %v3082_v11, %v3081_v47  ;;  %v3138_v51 = vpop.f32.mrb[23].mxu0  ;;  %v857_v30 = vadd.f32 %v3136_v44, %v752_v45 }
 0x25d   : > { %v3139_v52 = vadd.f32 %v3138_v51, %v3137_v49 }
 0x25e   : > { %v757_v33 = vadd.f32 %v3083_v12, %v2991_v46  ;;  %v1189_v46 = vld [vmem:[#allocation7 + $0x4d0] sm:$0xff] }
 0x25f   : > { %v3634_v55 = vpop.f32.mrb[16].mxu1  ;;  %v4855_v34 = vpack.c.bf16 %v1190_v20, %v1189_v46 }
 0x260   : > { %v937_v59 = vadd.f32 %v3634_v55, %v832_v3  ;;  %v931_v60 = vpop.f32.mrb[17].mxu1  ;;  %v862_v61 = vadd.f32 %v3139_v52, %v757_v33 }
 0x261   : > { %v932_v62 = vadd.f32 %v931_v60, %v827_v53 }
 0x262   : > { %v971_v1 = vmax.f32 %v937_v59, 0.0 }
 0x263   : > { %v970_v8 = vmax.f32 %v932_v62, 0.0  ;;  %v3637_v9 = vpop.f32.mrb[18].mxu1 }
 0x264   : > { %v987_v17 = vrot.slane %v971_v1, 6  ;;  %v947_v18 = vadd.f32 %v3637_v9, %v842_v24  ;;  %v941_v19 = vpop.f32.mrb[19].mxu1 }
 0x265   : > { %v986_v3 = vrot.slane %v970_v8, 6  ;;  %v942_v21 = vadd.f32 %v941_v19, %v837_v16 }
 0x266   : > { %v973_v53 = vmax.f32 %v947_v18, 0.0 }
 0x267   : > { %v4850_v27 = vsel %vm435_vm1, %v986_v3, %v987_v17  ;;  %v4853_v28 = vsel %vm435_vm1, 0.0, %v986_v3  ;;  %v972_v24 = vmax.f32 %v942_v21, 0.0  ;;  %v3640_v29 = vpop.f32.mrb[20].mxu1 }
 0x268   : > { %v1039_v16 = vrot.slane %v4853_v28, 2  ;;  %v991_v35 = vrot.slane %v973_v53, 6  ;;  %v957_v37 = vadd.f32 %v3640_v29, %v852_v56  ;;  %v951_v38 = vpop.f32.mrb[21].mxu1  ;;  %v1014_v39 = vrot.slane %v4853_v28, 1 }
 0x269   : > { %v989_v40 = vrot.slane %v972_v24, 6  ;;  %v952_v57 = vadd.f32 %v951_v38, %v847_v36  ;;  %v1015_v41 = vrot.slane %v4850_v27, 1  ;;  %v1064_v42 = vrot.slane %v4853_v28, 3 }
 0x26a   : > { %v975_v44 = vmax.f32 %v957_v37, 0.0  ;;  %v1065_v45 = vrot.slane %v4850_v27, 3  ;;  %v1040_v47 = vrot.slane %v4850_v27, 2  ;;  %v1089_v49 = vrot.slane %v4853_v28, 4 }
 0x26b   : > { %v4865_v11 = vsel %vm435_vm1, %v987_v17, %v989_v40  ;;  %v4868_v56 = vsel %vm435_vm1, %v989_v40, %v991_v35  ;;  %v974_v12 = vmax.f32 %v952_v57, 0.0  ;;  %v3643_v51 = vpop.f32.mrb[22].mxu1  ;;  %v1016_v36 = vsel %vm464_vm2, %v1014_v39, %v1015_v41 }
 0x26c   : > { %v995_v52 = vrot.slane %v975_v44, 6  ;;  %v967_v33 = vadd.f32 %v3643_v51, %v862_v61  ;;  %1267 = vmatprep.mubr.f32.mxu0 %v1016_v36  ;;  %v1066_v55 = vsel %vm516_vm3, %v1064_v42, %v1065_v45  ;;  %v961_v59 = vpop.f32.mrb[23].mxu1  ;;  %v1041_v60 = vsel %vm490_vm4, %v1039_v16, %v1040_v47 }
 0x26d   : > { %v993_v62 = vrot.slane %v974_v12, 6  ;;  %1372 = vmatprep.mubr.f32.mxu1 %v1066_v55  ;;  %v962_v63 = vadd.f32 %v961_v59, %v857_v30  ;;  %2996 = vmatmul.mubr.msk.f32.vlgmr.msra.gmra.mrb[24].mxu0 %vm4728_vm5, %v986_v3  ;;  %v1017_v0 = vrot.slane %v4865_v11, 1  ;;  %v1067_v1 = vrot.slane %v4865_v11, 3 }
 0x26e   : > { %v977_v2 = vmax.f32 %v967_v33, 0.0  ;;  %1373 = vmatmul.mubr.f32.vlgmr.msra.gmra.mrb[24].mxu1 %v1041_v60  ;;  %3965 = vmatpush3.bf16.msra.mxu0 %v4838_v43  ;;  %v1042_v61 = vrot.slane %v4865_v11, 2  ;;  %v1019_v5 = vrot.slane %v4868_v56, 1  ;;  %v1069_v6 = vrot.slane %v4868_v56, 3 }
 0x26f   : > { %v4882_v8 = vsel %vm435_vm1, %v991_v35, %v993_v62  ;;  %v4885_v30 = vsel %vm435_vm1, %v993_v62, %v995_v52  ;;  %v976_v9 = vmax.f32 %v962_v63, 0.0  ;;  %v1018_v10 = vsel %vm464_vm2, %v1015_v41, %v1017_v0  ;;  %3967 = vmatprep.subr.bf16.mxu0 %v4841_v22 }
 0x270   : > { %v999_v14 = vrot.slane %v977_v2, 6  ;;  %1272 = vmatprep.mubr.f32.mxu0 %v1018_v10  ;;  %v1068_v43 = vsel %vm516_vm3, %v1065_v45, %v1067_v1  ;;  %v1043_v15 = vsel %vm490_vm4, %v1040_v47, %v1042_v61  ;;  %v1020_v17 = vsel %vm464_vm2, %v1017_v0, %v1019_v5 }
 0x271   : > { %v997_v18 = vrot.slane %v976_v9, 6  ;;  %1377 = vmatprep.mubr.f32.mxu1 %v1068_v43  ;;  %1273 = vmatmul.mubr.f32.gmra.mrb[26].mxu0 %v4850_v27  ;;  %v1070_v19 = vsel %vm516_vm3, %v1067_v1, %v1069_v6  ;;  %v1044_v46 = vrot.slane %v4868_v56, 2  ;;  %v1021_v20 = vrot.slane %v4882_v8, 1 }
 0x272   : > { %v4897_v3 = vsel %vm435_vm1, %v999_v14, 0.0  ;;  %1378 = vmatmul.mubr.f32.gmra.mrb[26].mxu1 %v1043_v15  ;;  %1277 = vmatprep.mubr.f32.mxu0 %v1020_v17  ;;  %v1071_v21 = vrot.slane %v4882_v8, 3  ;;  %v1046_v53 = vrot.slane %v4882_v8, 2  ;;  %v1023_v24 = vrot.slane %v4885_v30, 1  ;;  %v1191_v17 = vld [vmem:[#allocation7 + $0x4e0] sm:$0xff] }
 0x273   : > { %v4903_v29 = vsel %vm435_vm1, %v995_v52, %v997_v18  ;;  %v4906_v16 = vsel %vm435_vm1, %v997_v18, %v999_v14  ;;  %1382 = vmatprep.mubr.f32.mxu1 %v1070_v19  ;;  %3969 = vmatpush3.bf16.msra.mxu0 %v4841_v22  ;;  %v1045_v35 = vsel %vm490_vm4, %v1042_v61, %v1044_v46  ;;  %v1073_v37 = vrot.slane %v4885_v30, 3  ;;  %v1192_v18 = vld [vmem:[#allocation7 + $0x4e8] sm:$0xff] }
 0x274   : > { %3971 = vmatprep.subr.bf16.mxu0 %v4843_v23  ;;  %v1022_v38 = vsel %vm464_vm2, %v1019_v5, %v1021_v20  ;;  %v1072_v39 = vsel %vm516_vm3, %v1069_v6, %v1071_v21  ;;  %v1047_v40 = vsel %vm490_vm4, %v1044_v46, %v1046_v53  ;;  %v1024_v57 = vsel %vm464_vm2, %v1021_v20, %v1023_v24 }
 0x275   : > { %1278 = vmatmul.mubr.f32.gmra.mrb[28].mxu0 %v4865_v11  ;;  %v1074_v41 = vsel %vm516_vm3, %v1071_v21, %v1073_v37  ;;  %v1048_v22 = vrot.slane %v4885_v30, 2  ;;  %v1025_v42 = vrot.slane %v4903_v29, 1  ;;  %v1075_v44 = vrot.slane %v4903_v29, 3  ;;  %v1193_v21 = vld [vmem:[#allocation7 + $0x4f0] sm:$0xff] }
 0x276   : > { %1383 = vmatmul.mubr.f32.gmra.mrb[28].mxu1 %v1045_v35  ;;  %1282 = vmatprep.mubr.f32.mxu0 %v1022_v38  ;;  %v1050_v45 = vrot.slane %v4903_v29, 2  ;;  %v1027_v47 = vrot.slane %v4906_v16, 1  ;;  %v1077_v12 = vrot.slane %v4906_v16, 3  ;;  %v1052_v51 = vrot.slane %v4906_v16, 2  ;;  %v1663_v35 = vld [vmem:[#allocation7 + $0x500] sm:$0xff] }
 0x277   : > { %1387 = vmatprep.mubr.f32.mxu1 %v1072_v39  ;;  %3973 = vmatpush3.bf16.msra.mxu0 %v4843_v23  ;;  %v1049_v36 = vsel %vm490_vm4, %v1046_v53, %v1048_v22  ;;  %v1026_v52 = vsel %vm464_vm2, %v1023_v24, %v1025_v42  ;;  %v1076_v33 = vsel %vm516_vm3, %v1073_v37, %v1075_v44  ;;  %v1029_v55 = vrot.slane %v4897_v3, 1  ;;  %v1194_v53 = vld [vmem:[#allocation7 + $0x4f8] sm:$0xff]  ;;  %v1664_v37 = vld [vmem:[#allocation7 + $0x508] sm:$0xff] }
 0x278   : > { %3975 = vmatprep.subr.bf16.mxu0 %v4845_v25  ;;  %v1051_v59 = vsel %vm490_vm4, %v1048_v22, %v1050_v45  ;;  %v1028_v60 = vsel %vm464_vm2, %v1025_v42, %v1027_v47  ;;  %v1078_v62 = vsel %vm516_vm3, %v1075_v44, %v1077_v12  ;;  %v1053_v63 = vsel %vm490_vm4, %v1050_v45, %v1052_v51  ;;  %v1682_v22 = vld [vmem:[#allocation7 + $0x598] sm:$0xff]  ;;  %v1713_v42 = vld [vmem:[#allocation7 + $0x690] sm:$0xff] }
 0x279   : > { %1283 = vmatmul.mubr.f32.gmra.mrb[30].mxu0 %v4868_v56  ;;  %v1030_v23 = vsel %vm464_vm2, %v1027_v47, %v1029_v55  ;;  %v1079_v0 = vrot.slane %v4897_v3, 3  ;;  %v1054_v1 = vrot.slane %v4897_v3, 2  ;;  %v1090_v2 = vrot.slane %v4850_v27, 4  ;;  %v1714_v45 = vld [vmem:[#allocation7 + $0x698] sm:$0xff]  ;;  %v1665_v47 = vld [vmem:[#allocation7 + $0x510] sm:$0xff] }
 0x27a   : > { %1388 = vmatmul.mubr.f32.gmra.mrb[30].mxu1 %v1047_v40  ;;  %1287 = vmatprep.mubr.f32.mxu0 %v1024_v57  ;;  %v1092_v61 = vrot.slane %v4865_v11, 4  ;;  %v1094_v5 = vrot.slane %v4868_v56, 4  ;;  %v1096_v6 = vrot.slane %v4882_v8, 4  ;;  %v1098_v9 = vrot.slane %v4885_v30, 4  ;;  %v1696_v40 = vld [vmem:[#allocation7 + $0x608] sm:$0xff] }
 0x27b   : > { %1392 = vmatprep.mubr.f32.mxu1 %v1074_v41  ;;  %3977 = vmatpush3.bf16.msra.mxu0 %v4845_v25  ;;  %v1080_v10 = vsel %vm516_vm3, %v1077_v12, %v1079_v0  ;;  %v1055_v14 = vsel %vm490_vm4, %v1052_v51, %v1054_v1  ;;  %v1091_v27 = vsel %vm542_vm6, %v1089_v49, %v1090_v2  ;;  %v1100_v43 = vrot.slane %v4903_v29, 4  ;;  %v1681_v41 = vld [vmem:[#allocation7 + $0x590] sm:$0xff]  ;;  %v1666_v12 = vld [vmem:[#allocation7 + $0x518] sm:$0xff]  ;;  %v1667_v0 = vld [vmem:[#allocation7 + $0x520] sm:$0xff] }
 0x27c   : > { %3979 = vmatprep.subr.bf16.mxu0 %v4847_v26  ;;  %v1093_v11 = vsel %vm542_vm6, %v1090_v2, %v1092_v61  ;;  %v1095_v56 = vsel %vm542_vm6, %v1092_v61, %v1094_v5  ;;  %v1097_v15 = vsel %vm542_vm6, %v1094_v5, %v1096_v6  ;;  %v1099_v25 = vsel %vm542_vm6, %v1096_v6, %v1098_v9  ;;  %v1668_v1 = vld [vmem:[#allocation7 + $0x528] sm:$0xff]  ;;  %v1699_v5 = vld [vmem:[#allocation7 + $0x620] sm:$0xff] }
 0x27d   : > { %1288 = vmatmul.mubr.f32.gmra.mrb[32].mxu0 %v4882_v8  ;;  %v1101_v28 = vsel %vm542_vm6, %v1098_v9, %v1100_v43  ;;  %v1102_v49 = vrot.slane %v4906_v16, 4  ;;  %v1104_v19 = vrot.slane %v4897_v3, 4  ;;  %v3986_v8 = vpack.c.bf16 %v1192_v18, %v1191_v17  ;;  %v1700_v6 = vld [vmem:[#allocation7 + $0x628] sm:$0xff]  ;;  %v1701_v18 = vld [vmem:[#allocation7 + $0x630] sm:$0xff] }
 0x27e   : > { %1393 = vmatmul.mubr.f32.gmra.mrb[32].mxu1 %v1049_v36  ;;  %1292 = vmatprep.mubr.f32.mxu0 %v1026_v52  ;;  %v3990_v3 = vpack.c.bf16 %v1194_v53, %v1193_v21  ;;  %v3996_v39 = vpack.c.bf16 %v1664_v37, %v1663_v35  ;;  %v3998_v44 = vpack.c.bf16 %v1682_v22, %v1681_v41  ;;  %v1697_v52 = vld [vmem:[#allocation7 + $0x610] sm:$0xff]  ;;  %v1720_v21 = vld [vmem:[#allocation7 + $0x6c8] sm:$0xff]  ;;  %v1671_v53 = vld [vmem:[#allocation7 + $0x540] sm:$0xff] }
 0x27f   : > { %1397 = vmatprep.mubr.f32.mxu1 %v1076_v33  ;;  %3981 = vmatpush3.bf16.msra.mxu0 %v4847_v26  ;;  %v1103_v46 = vsel %vm542_vm6, %v1100_v43, %v1102_v49  ;;  %v1105_v20 = vsel %vm542_vm6, %v1102_v49, %v1104_v19  ;;  %v1679_v26 = vld [vmem:[#allocation7 + $0x580] sm:$0xff]  ;;  %v4030_v51 = vpack.c.bf16 %v1714_v45, %v1713_v42  ;;  %v1698_v33 = vld [vmem:[#allocation7 + $0x618] sm:$0xff]  ;;  %v1689_v35 = vld [vmem:[#allocation7 + $0x5d0] sm:$0xff] }
 0x280   : > { %3983 = vmatprep.subr.bf16.mxu0 %v4855_v34  ;;  %v4000_v36 = vpack.c.bf16 %v1666_v12, %v1665_v47  ;;  %v4032_v55 = vpack.c.bf16 %v1698_v33, %v1697_v52  ;;  %v4004_v61 = vpack.c.bf16 %v1668_v1, %v1667_v0  ;;  %v4036_v9 = vpack.c.bf16 %v1700_v6, %v1699_v5  ;;  %v1687_v19 = vld [vmem:[#allocation7 + $0x5c0] sm:$0xff]  ;;  %v1690_v37 = vld [vmem:[#allocation7 + $0x5d8] sm:$0xff]  ;;  %v1705_v42 = vld [vmem:[#allocation7 + $0x650] sm:$0xff] }
 0x281   : > { %1293 = vmatmul.mubr.f32.gmra.mrb[34].mxu0 %v4885_v30  ;;  %v1711_v30 = vld [vmem:[#allocation7 + $0x680] sm:$0xff]  ;;  %v1692_v12 = vld [vmem:[#allocation7 + $0x5e8] sm:$0xff]  ;;  %v1693_v0 = vld [vmem:[#allocation7 + $0x5f0] sm:$0xff] }
 0x282   : > { %1398 = vmatmul.mubr.f32.gmra.mrb[34].mxu1 %v1051_v59  ;;  %1297 = vmatprep.mubr.f32.mxu0 %v1028_v60  ;;  %v1683_v59 = vld [vmem:[#allocation7 + $0x5a0] sm:$0xff]  ;;  %v1684_v60 = vld [vmem:[#allocation7 + $0x5a8] sm:$0xff]  ;;  %v1694_v1 = vld [vmem:[#allocation7 + $0x5f8] sm:$0xff] }
 0x283   : > { %1402 = vmatprep.mubr.f32.mxu1 %v1078_v62  ;;  %3985 = vmatpush3.bf16.msra.mxu0 %v4855_v34  ;;  %v1680_v34 = vld [vmem:[#allocation7 + $0x588] sm:$0xff]  ;;  %v1715_v62 = vld [vmem:[#allocation7 + $0x6a0] sm:$0xff]  ;;  %v1726_v5 = vld [vmem:[#allocation7 + $0x6f8] sm:$0xff] }
 0x284   : > { %3987 = vmatprep.subr.bf16.mxu0 %v3986_v8  ;;  %v3994_v24 = vpack.c.bf16 %v1680_v34, %v1679_v26  ;;  %v1691_v47 = vld [vmem:[#allocation7 + $0x5e0] sm:$0xff]  ;;  %v1724_v52 = vld [vmem:[#allocation7 + $0x6e8] sm:$0xff]  ;;  %v1677_v6 = vld [vmem:[#allocation7 + $0x570] sm:$0xff] }
 0x285   : > { %1298 = vmatmul.mubr.f32.gmra.mrb[36].mxu0 %v4903_v29  ;;  %v1712_v29 = vld [vmem:[#allocation7 + $0x688] sm:$0xff]  ;;  %v1675_v33 = vld [vmem:[#allocation7 + $0x560] sm:$0xff] }
 0x286   : > { %1403 = vmatmul.mubr.f32.gmra.mrb[36].mxu1 %v1053_v63  ;;  %1302 = vmatprep.mubr.f32.mxu0 %v1030_v23  ;;  %v4026_v38 = vpack.c.bf16 %v1712_v29, %v1711_v30  ;;  %v4002_v63 = vpack.c.bf16 %v1684_v60, %v1683_v59  ;;  %v1716_v23 = vld [vmem:[#allocation7 + $0x6a8] sm:$0xff]  ;;  %v1703_v30 = vld [vmem:[#allocation7 + $0x640] sm:$0xff] }
 0x287   : > { %1407 = vmatprep.mubr.f32.mxu1 %v1080_v10  ;;  %3989 = vmatpush3.bf16.msra.mxu0 %v3986_v8  ;;  %v4034_v2 = vpack.c.bf16 %v1716_v23, %v1715_v62  ;;  %v1685_v10 = vld [vmem:[#allocation7 + $0x5b0] sm:$0xff]  ;;  %v1707_v62 = vld [vmem:[#allocation7 + $0x660] sm:$0xff] }
 0x288   : > { %3991 = vmatprep.subr.bf16.mxu0 %v3990_v3  ;;  %3995 = vmatprep.subr.bf16.mxu1 %v3994_v24  ;;  %v1704_v24 = vld [vmem:[#allocation7 + $0x648] sm:$0xff] }
 0x289   : > { %1303 = vmatmul.mubr.f32.gmra.mrb[38].mxu0 %v4906_v16  ;;  %v1695_v16 = vld [vmem:[#allocation7 + $0x600] sm:$0xff]  ;;  %3997 = vmatpush3.bf16.msra.mxu1 %v3996_v39  ;;  %v4044_v29 = vpack.c.bf16 %v1704_v24, %v1703_v30  ;;  %v4014_v39 = vpack.c.bf16 %v1690_v37, %v1689_v35 }
 0x28a   : > { %1408 = vmatmul.mubr.f32.gmra.mrb[38].mxu1 %v1055_v14  ;;  %3676 = vmatprep.mubr.f32.mxu0 %v1091_v27  ;;  %v4028_v57 = vpack.c.bf16 %v1696_v40, %v1695_v16  ;;  %v1686_v14 = vld [vmem:[#allocation7 + $0x5b8] sm:$0xff]  ;;  %v1717_v27 = vld [vmem:[#allocation7 + $0x6b0] sm:$0xff] }
 0x28b   : > { %3993 = vmatpush3.bf16.msra.mxu0 %v3990_v3  ;;  %3999 = vmatprep.subr.bf16.mxu1 %v3998_v44  ;;  %v4006_v43 = vpack.c.bf16 %v1686_v14, %v1685_v10  ;;  %v1672_v3 = vld [vmem:[#allocation7 + $0x548] sm:$0xff]  ;;  %v1722_v16 = vld [vmem:[#allocation7 + $0x6d8] sm:$0xff]  ;;  %v1673_v40 = vld [vmem:[#allocation7 + $0x550] sm:$0xff] }
 0x28c   : > { %4027 = vmatprep.subr.bf16.mxu0 %v4026_v38  ;;  %v4012_v34 = vpack.c.bf16 %v1672_v3, %v1671_v53  ;;  %v1721_v38 = vld [vmem:[#allocation7 + $0x6d0] sm:$0xff]  ;;  %v1706_v44 = vld [vmem:[#allocation7 + $0x658] sm:$0xff] }
 0x28d   : > { %4001 = vmatpush3.bf16.msra.mxu1 %v4000_v36  ;;  %v4046_v41 = vpack.c.bf16 %v1722_v16, %v1721_v38  ;;  %v4048_v45 = vpack.c.bf16 %v1706_v44, %v1705_v42  ;;  %v4018_v36 = vpack.c.bf16 %v1692_v12, %v1691_v47 }
 0x28e   : > { %3677 = vmatmul.mubr.f32.vlgmr.msra.gmra.mrb[40].mxu0 %v1093_v11  ;;  %4003 = vmatprep.subr.bf16.mxu1 %v4002_v63  ;;  %v1718_v11 = vld [vmem:[#allocation7 + $0x6b8] sm:$0xff]  ;;  %v1708_v63 = vld [vmem:[#allocation7 + $0x668] sm:$0xff] }
 0x28f   : > { %3679 = vmatprep.mubr.f32.mxu0 %v1095_v56  ;;  %4029 = vmatpush3.bf16.msra.mxu0 %v4028_v57  ;;  %v1669_v56 = vld [vmem:[#allocation7 + $0x530] sm:$0xff]  ;;  %v1674_v57 = vld [vmem:[#allocation7 + $0x558] sm:$0xff]  ;;  %v4052_v23 = vpack.c.bf16 %v1708_v63, %v1707_v62 }
 0x290   : > { %4031 = vmatprep.subr.bf16.mxu0 %v4030_v51  ;;  %v4016_v22 = vpack.c.bf16 %v1674_v57, %v1673_v40  ;;  %v1723_v51 = vld [vmem:[#allocation7 + $0x6e0] sm:$0xff] }
 0x291   : > { %4005 = vmatpush3.bf16.msra.mxu1 %v4004_v61  ;;  %v4050_v59 = vpack.c.bf16 %v1724_v52, %v1723_v51  ;;  %v4022_v61 = vpack.c.bf16 %v1694_v1, %v1693_v0 }
 0x292   : > { %3680 = vmatmul.mubr.f32.gmra.mrb[42].mxu0 %v1097_v15  ;;  %v1670_v15 = vld [vmem:[#allocation7 + $0x538] sm:$0xff]  ;;  %4007 = vmatprep.subr.bf16.mxu1 %v4006_v43 }
 0x293   : > { %3682 = vmatprep.mubr.f32.mxu0 %v1099_v25  ;;  %4033 = vmatpush3.bf16.msra.mxu0 %v4032_v55  ;;  %v4038_v25 = vpack.c.bf16 %v1718_v11, %v1717_v27  ;;  %v4008_v17 = vpack.c.bf16 %v1670_v15, %v1669_v56  ;;  %v1676_v55 = vld [vmem:[#allocation7 + $0x568] sm:$0xff]  ;;  %v1709_v27 = vld [vmem:[#allocation7 + $0x670] sm:$0xff]  ;;  %v1710_v43 = vld [vmem:[#allocation7 + $0x678] sm:$0xff] }
 0x294   : > { %4035 = vmatprep.subr.bf16.mxu0 %v4034_v2  ;;  %v4020_v60 = vpack.c.bf16 %v1676_v55, %v1675_v33  ;;  %v1725_v2 = vld [vmem:[#allocation7 + $0x6f0] sm:$0xff]  ;;  %v4056_v11 = vpack.c.bf16 %v1710_v43, %v1709_v27  ;;  %v1727_v56 = vld [vmem:[#allocation7 + $0x700] sm:$0xff]  ;;  %v1728_v15 = vld [vmem:[#allocation7 + $0x708] sm:$0xff] }
 0x295   : > { %4009 = vmatpush3.bf16.msra.mxu1 %v4008_v17  ;;  %v4054_v10 = vpack.c.bf16 %v1726_v5, %v1725_v2 }
 0x296   : > { %3683 = vmatmul.mubr.f32.gmra.mrb[44].mxu0 %v1101_v28  ;;  %v1702_v28 = vld [vmem:[#allocation7 + $0x638] sm:$0xff] }
 0x297   : > { %3685 = vmatprep.mubr.f32.mxu0 %v1103_v46  ;;  %4037 = vmatpush3.bf16.msra.mxu0 %v4036_v9  ;;  %v4040_v49 = vpack.c.bf16 %v1702_v28, %v1701_v18  ;;  %v1688_v46 = vld [vmem:[#allocation7 + $0x5c8] sm:$0xff]  ;;  %v1678_v9 = vld [vmem:[#allocation7 + $0x578] sm:$0xff]  ;;  %v2994_v28 = vld [vmem:[#allocation8 + $0x1] ss:$0 sm:$0xff] }
 0x298   : > { %4039 = vmatprep.subr.bf16.mxu0 %v4038_v25  ;;  %v4010_v8 = vpack.c.bf16 %v1688_v46, %v1687_v19  ;;  %v4024_v14 = vpack.c.bf16 %v1678_v9, %v1677_v6  ;;  %v4968_v25 = vpack.c.bf16 %v1728_v15, %v1727_v56 }
 0x29a   : > { %3686 = vmatmul.mubr.f32.gmra.mrb[46].mxu0 %v1105_v20  ;;  %v1719_v20 = vld [vmem:[#allocation7 + $0x6c0] sm:$0xff]  ;;  %4011 = vmatprep.subr.bf16.mxu1 %v4010_v8 }
 0x29b   : > { %4041 = vmatpush3.bf16.msra.mxu0 %v4040_v49  ;;  %v4042_v26 = vpack.c.bf16 %v1720_v21, %v1719_v20  ;;  %4013 = vmatpush3.bf16.msra.mxu1 %v4012_v34 }
 0x29c   : > { %4015 = vmatprep.subr.bf16.mxu1 %v4014_v39 }
 0x29d   : > { %4043 = vmatprep.subr.bf16.mxu0 %v4042_v26 }
 0x29f   : > { %4045 = vmatpush3.bf16.msra.mxu0 %v4044_v29  ;;  %4017 = vmatpush3.bf16.msra.mxu1 %v4016_v22 }
 0x2a0   : > { %4047 = vmatprep.subr.bf16.mxu0 %v4046_v41  ;;  %4019 = vmatprep.subr.bf16.mxu1 %v4018_v36 }
 0x2a3   : > { %4049 = vmatpush3.bf16.msra.mxu0 %v4048_v45  ;;  %4021 = vmatpush3.bf16.msra.mxu1 %v4020_v60 }
 0x2a4   : > { %4051 = vmatprep.subr.bf16.mxu0 %v4050_v59  ;;  %4023 = vmatprep.subr.bf16.mxu1 %v4022_v61 }
 0x2a7   : > { %4053 = vmatpush3.bf16.msra.mxu0 %v4052_v23  ;;  %4025 = vmatpush3.bf16.msra.mxu1 %v4024_v14 }
 0x2a8   : > { %4055 = vmatprep.subr.bf16.mxu0 %v4054_v10  ;;  %4059 = vmatprep.subr.bf16.mxu1 %v4968_v25 }
 0x2ab   : > { %4057 = vmatpush3.bf16.msra.mxu0 %v4056_v11 }
 0x340   : > { %v3196_v17 = vpop.f32.mrb[24].mxu0 }
 0x341   : > { %v3252_v18 = vpop.f32.mrb[24].mxu1  ;;  %v3197_v49 = vpop.f32.mrb[25].mxu0 }
 0x342   : > { %v3198_v19 = vadd.f32 %v3197_v49, %v3196_v17  ;;  %v3253_v46 = vpop.f32.mrb[25].mxu1 }
 0x343   : > { %v3254_v20 = vadd.f32 %v3253_v46, %v3252_v18 }
 0x344   : > { %v1270_v8 = vadd.f32 %v3198_v19, %v2994_v28  ;;  %v3199_v21 = vpop.f32.mrb[26].mxu0 }
 0x345   : > { %v3255_v53 = vpop.f32.mrb[26].mxu1  ;;  %v3200_v3 = vpop.f32.mrb[27].mxu0 }
 0x346   : > { %v3201_v26 = vadd.f32 %v3200_v3, %v3199_v21  ;;  %v3256_v34 = vpop.f32.mrb[27].mxu1  ;;  %v1375_v30 = vadd.f32 %v3254_v20, %v1270_v8 }
 0x347   : > { %v3257_v24 = vadd.f32 %v3256_v34, %v3255_v53 }
 0x348   : > { %v1275_v29 = vadd.f32 %v3201_v26, %v2994_v28  ;;  %v3202_v35 = vpop.f32.mrb[28].mxu0 }
 0x349   : > { %v3258_v37 = vpop.f32.mrb[28].mxu1  ;;  %v3203_v38 = vpop.f32.mrb[29].mxu0 }
 0x34a   : > { %v3204_v39 = vadd.f32 %v3203_v38, %v3202_v35  ;;  %v3259_v16 = vpop.f32.mrb[29].mxu1  ;;  %v1380_v40 = vadd.f32 %v3257_v24, %v1275_v29 }
 0x34b   : > { %v3260_v57 = vadd.f32 %v3259_v16, %v3258_v37  ;;  %v1729_v16 = vld [vmem:[#allocation7 + $0x710] sm:$0xff] }
 0x34c   : > { %v1280_v41 = vadd.f32 %v3204_v39, %v2994_v28  ;;  %v3205_v22 = vpop.f32.mrb[30].mxu0 }
 0x34d   : > { %v3261_v42 = vpop.f32.mrb[30].mxu1  ;;  %v3206_v44 = vpop.f32.mrb[31].mxu0 }
 0x34e   : > { %v3207_v45 = vadd.f32 %v3206_v44, %v3205_v22  ;;  %v3262_v47 = vpop.f32.mrb[31].mxu1  ;;  %v1385_v12 = vadd.f32 %v3260_v57, %v1280_v41  ;;  %v1730_v57 = vld [vmem:[#allocation7 + $0x718] sm:$0xff]  ;;  %v1731_v44 = vld [vmem:[#allocation7 + $0x720] sm:$0xff] }
 0x34f   : > { %v3263_v51 = vadd.f32 %v3262_v47, %v3261_v42 }
 0x350   : > { %v1285_v36 = vadd.f32 %v3207_v45, %v2994_v28  ;;  %v3208_v52 = vpop.f32.mrb[32].mxu0 }
 0x351   : > { %v3264_v33 = vpop.f32.mrb[32].mxu1  ;;  %v3209_v55 = vpop.f32.mrb[33].mxu0 }
 0x352   : > { %v3210_v59 = vadd.f32 %v3209_v55, %v3208_v52  ;;  %v3265_v60 = vpop.f32.mrb[33].mxu1  ;;  %v1390_v62 = vadd.f32 %v3263_v51, %v1285_v36 }
 0x353   : > { %v3266_v63 = vadd.f32 %v3265_v60, %v3264_v33 }
 0x354   : > { %v1290_v23 = vadd.f32 %v3210_v59, %v2994_v28  ;;  %v3211_v0 = vpop.f32.mrb[34].mxu0 }
 0x355   : > { %v3267_v1 = vpop.f32.mrb[34].mxu1  ;;  %v3212_v2 = vpop.f32.mrb[35].mxu0 }
 0x356   : > { %v3213_v61 = vadd.f32 %v3212_v2, %v3211_v0  ;;  %v3268_v5 = vpop.f32.mrb[35].mxu1  ;;  %v1395_v6 = vadd.f32 %v3266_v63, %v1290_v23 }
 0x357   : > { %v3269_v9 = vadd.f32 %v3268_v5, %v3267_v1 }
 0x358   : > { %v1295_v10 = vadd.f32 %v3213_v61, %v2994_v28  ;;  %v3214_v14 = vpop.f32.mrb[36].mxu0 }
 0x359   : > { %v3270_v27 = vpop.f32.mrb[36].mxu1  ;;  %v3215_v43 = vpop.f32.mrb[37].mxu0 }
 0x35a   : > { %v3216_v11 = vadd.f32 %v3215_v43, %v3214_v14  ;;  %v3271_v56 = vpop.f32.mrb[37].mxu1  ;;  %v1400_v15 = vadd.f32 %v3269_v9, %v1295_v10 }
 0x35b   : > { %v3272_v17 = vadd.f32 %v3271_v56, %v3270_v27 }
 0x35c   : > { %v1300_v18 = vadd.f32 %v3216_v11, %v2994_v28  ;;  %v3217_v49 = vpop.f32.mrb[38].mxu0 }
 0x35d   : > { %v3273_v19 = vpop.f32.mrb[38].mxu1  ;;  %v3218_v46 = vpop.f32.mrb[39].mxu0 }
 0x35e   : > { %v3219_v20 = vadd.f32 %v3218_v46, %v3217_v49  ;;  %v3274_v8 = vpop.f32.mrb[39].mxu1  ;;  %v1405_v21 = vadd.f32 %v3272_v17, %v1300_v18 }
 0x35f   : > { %v3275_v53 = vadd.f32 %v3274_v8, %v3273_v19 }
 0x360   : > { %v1305_v3 = vadd.f32 %v3219_v20, %v2994_v28  ;;  %v1732_v28 = vld [vmem:[#allocation7 + $0x728] sm:$0xff] }
 0x361   : > { %v3678_v26 = vpop.f32.mrb[40].mxu0  ;;  %v4991_v52 = vpack.c.bf16 %v1732_v28, %v1731_v44  ;;  %v1736_v44 = vld [vmem:[#allocation7 + $0x748] sm:$0xff] }
 0x362   : > { %v1485_v34 = vadd.f32 %v3678_v26, %v1380_v40  ;;  %v1479_v24 = vpop.f32.mrb[41].mxu0  ;;  %v1410_v29 = vadd.f32 %v3275_v53, %v1305_v3  ;;  %v1733_v26 = vld [vmem:[#allocation7 + $0x730] sm:$0xff] }
 0x363   : > { %v1480_v35 = vadd.f32 %v1479_v24, %v1375_v30 }
 0x364   : > { %v4972_v37 = vadd.f32 %v1485_v34, %v4705_v48  ;;  %v4062_v48 = vpack.c.bf16 %v1730_v57, %v1729_v16  ;;  %v1734_v34 = vld [vmem:[#allocation7 + $0x738] sm:$0xff] }
 0x365   : > { %v4975_v38 = vadd.f32 %v1480_v35, %v4707_v50  ;;  %v3681_v39 = vpop.f32.mrb[42].mxu0 }
 0x366   : > { %v1535_v41 = vrot.slane %v4972_v37, 6  ;;  %v1495_v22 = vadd.f32 %v3681_v39, %v1390_v62  ;;  %v1489_v42 = vpop.f32.mrb[43].mxu0  ;;  %v4070_v39 = vpack.c.bf16 %v1734_v34, %v1733_v26 }
 0x367   : > { %v1534_v40 = vrot.slane %v4975_v38, 6  ;;  %v1490_v45 = vadd.f32 %v1489_v42, %v1385_v12  ;;  %v1735_v42 = vld [vmem:[#allocation7 + $0x740] sm:$0xff] }
 0x368   : > { %v4980_v30 = vadd.f32 %v1495_v22, %v4711_v54 }
 0x369   : > { %v4983_v47 = vsel %vm435_vm1, %v1534_v40, %v1535_v41  ;;  %v4986_v50 = vsel %vm435_vm1, 0.0, %v1534_v40  ;;  %v4989_v51 = vadd.f32 %v1490_v45, %v4719_v58  ;;  %v3684_v36 = vpop.f32.mrb[44].mxu0 }
 0x36a   : > { %v1539_v33 = vrot.slane %v4980_v30, 6  ;;  %v1505_v55 = vadd.f32 %v3684_v36, %v1400_v15  ;;  %v1499_v12 = vpop.f32.mrb[45].mxu0  ;;  %v1562_v54 = vrot.slane %v4986_v50, 1  ;;  %v1563_v59 = vrot.slane %v4983_v47, 1 }
 0x36b   : > { %v1537_v60 = vrot.slane %v4989_v51, 6  ;;  %v1500_v62 = vadd.f32 %v1499_v12, %v1395_v6  ;;  %v1612_v63 = vrot.slane %v4986_v50, 3  ;;  %v1613_v23 = vrot.slane %v4983_v47, 3 }
 0x36c   : > { %v5000_v58 = vadd.f32 %v1505_v55, %v4734_v7  ;;  %v1564_v0 = vsel %vm464_vm2, %v1562_v54, %v1563_v59  ;;  %v1587_v1 = vrot.slane %v4986_v50, 2  ;;  %v1588_v2 = vrot.slane %v4983_v47, 2 }
 0x36d   : > { %v5006_v61 = vsel %vm435_vm1, %v1535_v41, %v1537_v60  ;;  %v5009_v5 = vsel %vm435_vm1, %v1537_v60, %v1539_v33  ;;  %v5012_v6 = vadd.f32 %v1500_v62, %v4743_v13  ;;  %v3687_v9 = vpop.f32.mrb[46].mxu0  ;;  %1815 = vmatprep.mubr.f32.mxu1 %v1564_v0  ;;  %v1614_v7 = vsel %vm516_vm3, %v1612_v63, %v1613_v23  ;;  %v1738_v60 = vld [vmem:[#allocation7 + $0x758] sm:$0xff] }
 0x36e   : > { %v1543_v10 = vrot.slane %v5000_v58, 6  ;;  %v1515_v14 = vadd.f32 %v3687_v9, %v1410_v29  ;;  %1920 = vmatprep.mubr.f32.mxu0 %v1614_v7  ;;  %v1509_v27 = vpop.f32.mrb[47].mxu0  ;;  %2999 = vmatmul.mubr.msk.f32.vlgmr.msra.gmra.mrb[40].mxu1 %vm4728_vm5, %v1534_v40  ;;  %v1589_v43 = vsel %vm490_vm4, %v1587_v1, %v1588_v2  ;;  %v1565_v11 = vrot.slane %v5006_v61, 1  ;;  %v1739_v7 = vld [vmem:[#allocation7 + $0x760] sm:$0xff] }
 0x36f   : > { %v1541_v56 = vrot.slane %v5012_v6, 6  ;;  %v1510_v13 = vadd.f32 %v1509_v27, %v1405_v21  ;;  %1921 = vmatmul.mubr.f32.vlgmr.msra.gmra.mrb[48].mxu0 %v1589_v43  ;;  %4061 = vmatpush3.bf16.msra.mxu1 %v4968_v25  ;;  %v1615_v15 = vrot.slane %v5006_v61, 3  ;;  %v1590_v17 = vrot.slane %v5006_v61, 2 }
 0x370   : > { %v5025_v18 = vadd.f32 %v1515_v14, %v4761_v31  ;;  %v1566_v49 = vsel %vm464_vm2, %v1563_v59, %v1565_v11  ;;  %4063 = vmatprep.subr.bf16.mxu1 %v4062_v48  ;;  %v1567_v19 = vrot.slane %v5009_v5, 1  ;;  %v1617_v46 = vrot.slane %v5009_v5, 3  ;;  %v1737_v59 = vld [vmem:[#allocation7 + $0x750] sm:$0xff] }
 0x371   : > { %v5031_v20 = vsel %vm435_vm1, %v1539_v33, %v1541_v56  ;;  %v5034_v8 = vsel %vm435_vm1, %v1541_v56, %v1543_v10  ;;  %v5037_v25 = vadd.f32 %v1510_v13, %v4763_v32  ;;  %1820 = vmatprep.mubr.f32.mxu1 %v1566_v49  ;;  %v1616_v31 = vsel %vm516_vm3, %v1613_v23, %v1615_v15  ;;  %v1741_v49 = vld [vmem:[#allocation7 + $0x770] sm:$0xff] }
 0x372   : > { %1925 = vmatprep.mubr.f32.mxu0 %v1616_v31  ;;  %1821 = vmatmul.mubr.f32.gmra.mrb[42].mxu1 %v4983_v47  ;;  %v1591_v21 = vsel %vm490_vm4, %v1588_v2, %v1590_v17  ;;  %v1568_v53 = vsel %vm464_vm2, %v1565_v11, %v1567_v19  ;;  %v1618_v3 = vsel %vm516_vm3, %v1615_v15, %v1617_v46  ;;  %v1592_v32 = vrot.slane %v5009_v5, 2 }
 0x373   : > { %v1545_v24 = vrot.slane %v5037_v25, 6  ;;  %1926 = vmatmul.mubr.f32.gmra.mrb[50].mxu0 %v1591_v21  ;;  %1825 = vmatprep.mubr.f32.mxu1 %v1568_v53  ;;  %v1569_v29 = vrot.slane %v5031_v20, 1  ;;  %v1619_v35 = vrot.slane %v5031_v20, 3  ;;  %v1594_v41 = vrot.slane %v5031_v20, 2 }
 0x374   : > { %1930 = vmatprep.mubr.f32.mxu0 %v1618_v3  ;;  %4065 = vmatpush3.bf16.msra.mxu1 %v4062_v48  ;;  %v1593_v16 = vsel %vm490_vm4, %v1590_v17, %v1592_v32  ;;  %v1571_v22 = vrot.slane %v5034_v8, 1  ;;  %v1547_v28 = vrot.slane %v5025_v18, 6  ;;  %v1621_v48 = vrot.slane %v5034_v8, 3 }
 0x375   : > { %4067 = vmatprep.subr.bf16.mxu1 %v4991_v52  ;;  %v1570_v57 = vsel %vm464_vm2, %v1567_v19, %v1569_v29  ;;  %v5056_v40 = vsel %vm435_vm1, %v1543_v10, %v1545_v24  ;;  %v1620_v45 = vsel %vm516_vm3, %v1617_v46, %v1619_v35  ;;  %v4074_v36 = vpack.c.bf16 %v1736_v44, %v1735_v42  ;;  %v1740_v10 = vld [vmem:[#allocation7 + $0x768] sm:$0xff]  ;;  %v1742_v19 = vld [vmem:[#allocation7 + $0x778] sm:$0xff] }
 0x376   : > { %1826 = vmatmul.mubr.f32.gmra.mrb[44].mxu1 %v5006_v61  ;;  %v1595_v33 = vsel %vm490_vm4, %v1592_v32, %v1594_v41  ;;  %v1572_v55 = vsel %vm464_vm2, %v1569_v29, %v1571_v22  ;;  %v1596_v12 = vrot.slane %v5034_v8, 2  ;;  %v1573_v54 = vrot.slane %v5056_v40, 1 }
 0x377   : > { %1931 = vmatmul.mubr.f32.gmra.mrb[52].mxu0 %v1593_v16  ;;  %1830 = vmatprep.mubr.f32.mxu1 %v1570_v57  ;;  %v5067_v62 = vsel %vm435_vm1, %v1545_v24, %v1547_v28  ;;  %v1623_v63 = vrot.slane %v5056_v40, 3  ;;  %v4078_v23 = vpack.c.bf16 %v1738_v60, %v1737_v59  ;;  %v1598_v2 = vrot.slane %v5056_v40, 2  ;;  %v2243_v60 = vld [vmem:[#allocation7 + $0x880] sm:$0xff] }
 0x378   : > { %1935 = vmatprep.mubr.f32.mxu0 %v1620_v45  ;;  %4069 = vmatpush3.bf16.msra.mxu1 %v4991_v52  ;;  %v1622_v52 = vsel %vm516_vm3, %v1619_v35, %v1621_v48  ;;  %v1597_v0 = vsel %vm490_vm4, %v1594_v41, %v1596_v12  ;;  %v1574_v1 = vsel %vm464_vm2, %v1571_v22, %v1573_v54  ;;  %v1575_v9 = vrot.slane %v5067_v62, 1  ;;  %v2227_v45 = vld [vmem:[#allocation7 + $0x800] sm:$0xff] }
 0x379   : > { %4071 = vmatprep.subr.bf16.mxu1 %v4070_v39  ;;  %v5077_v14 = vsel %vm435_vm1, %v1547_v28, 0.0  ;;  %v1624_v27 = vsel %vm516_vm3, %v1621_v48, %v1623_v63  ;;  %v1625_v43 = vrot.slane %v5067_v62, 3  ;;  %v1600_v11 = vrot.slane %v5067_v62, 2  ;;  %v2228_v48 = vld [vmem:[#allocation7 + $0x808] sm:$0xff] }
 0x37a   : > { %1831 = vmatmul.mubr.f32.gmra.mrb[46].mxu1 %v5009_v5  ;;  %v4082_v56 = vpack.c.bf16 %v1740_v10, %v1739_v7  ;;  %v1599_v13 = vsel %vm490_vm4, %v1596_v12, %v1598_v2  ;;  %v1576_v15 = vsel %vm464_vm2, %v1573_v54, %v1575_v9  ;;  %v1577_v17 = vrot.slane %v5077_v14, 1  ;;  %v2212_v12 = vld [vmem:[#allocation7 + $0x788] sm:$0xff]  ;;  %v2214_v7 = vld [vmem:[#allocation7 + $0x798] sm:$0xff] }
 0x37b   : > { %1936 = vmatmul.mubr.f32.gmra.mrb[54].mxu0 %v1595_v33  ;;  %1835 = vmatprep.mubr.f32.mxu1 %v1572_v55  ;;  %v1626_v46 = vsel %vm516_vm3, %v1623_v63, %v1625_v43  ;;  %v1627_v31 = vrot.slane %v5077_v14, 3  ;;  %v1601_v21 = vsel %vm490_vm4, %v1598_v2, %v1600_v11  ;;  %v4086_v53 = vpack.c.bf16 %v1742_v19, %v1741_v49  ;;  %v2260_v33 = vld [vmem:[#allocation7 + $0x908] sm:$0xff]  ;;  %v2211_v55 = vld [vmem:[#allocation7 + $0x780] sm:$0xff]  ;;  %v2229_v63 = vld [vmem:[#allocation7 + $0x810] sm:$0xff] }
 0x37c   : > { %1940 = vmatprep.mubr.f32.mxu0 %v1622_v52  ;;  %4073 = vmatpush3.bf16.msra.mxu1 %v4070_v39  ;;  %v1578_v3 = vsel %vm464_vm2, %v1575_v9, %v1577_v17  ;;  %v1602_v26 = vrot.slane %v5077_v14, 2  ;;  %v1637_v34 = vrot.slane %v4986_v50, 4  ;;  %v1638_v24 = vrot.slane %v4983_v47, 4  ;;  %v2262_v2 = vld [vmem:[#allocation7 + $0x918] sm:$0xff]  ;;  %v2213_v9 = vld [vmem:[#allocation7 + $0x790] sm:$0xff]  ;;  %v2264_v49 = vld [vmem:[#allocation7 + $0x928] sm:$0xff] }
 0x37d   : > { %4075 = vmatprep.subr.bf16.mxu1 %v4074_v36  ;;  %v1628_v32 = vsel %vm516_vm3, %v1625_v43, %v1627_v31  ;;  %v1640_v39 = vrot.slane %v5006_v61, 4  ;;  %v1642_v50 = vrot.slane %v5009_v5, 4  ;;  %v1644_v16 = vrot.slane %v5031_v20, 4  ;;  %v2246_v43 = vld [vmem:[#allocation7 + $0x898] sm:$0xff]  ;;  %v2215_v19 = vld [vmem:[#allocation7 + $0x7a0] sm:$0xff] }
 0x37e   : > { %1836 = vmatmul.mubr.f32.gmra.mrb[48].mxu1 %v5031_v20  ;;  %v1603_v29 = vsel %vm490_vm4, %v1600_v11, %v1602_v26  ;;  %v1639_v35 = vsel %vm542_vm6, %v1637_v34, %v1638_v24  ;;  %v1646_v41 = vrot.slane %v5034_v8, 4  ;;  %v1648_v42 = vrot.slane %v5056_v40, 4  ;;  %v2233_v34 = vld [vmem:[#allocation7 + $0x830] sm:$0xff] }
 0x37f   : > { %1941 = vmatmul.mubr.f32.gmra.mrb[56].mxu0 %v1597_v0  ;;  %1840 = vmatprep.mubr.f32.mxu1 %v1574_v1  ;;  %v1641_v47 = vsel %vm542_vm6, %v1638_v24, %v1640_v39  ;;  %v1643_v57 = vsel %vm542_vm6, %v1640_v39, %v1642_v50  ;;  %v1645_v22 = vsel %vm542_vm6, %v1642_v50, %v1644_v16  ;;  %v1650_v5 = vrot.slane %v5067_v62, 4  ;;  %v2261_v0 = vld [vmem:[#allocation7 + $0x910] sm:$0xff]  ;;  %v2234_v24 = vld [vmem:[#allocation7 + $0x838] sm:$0xff] }
 0x380   : > { %1945 = vmatprep.mubr.f32.mxu0 %v1624_v27  ;;  %4077 = vmatpush3.bf16.msra.mxu1 %v4074_v36  ;;  %v1647_v61 = vsel %vm542_vm6, %v1644_v16, %v1646_v41  ;;  %v1649_v44 = vsel %vm542_vm6, %v1646_v41, %v1648_v42  ;;  %v1652_v20 = vrot.slane %v5077_v14, 4  ;;  %v4090_v36 = vpack.c.bf16 %v2228_v48, %v2227_v45  ;;  %v2245_v27 = vld [vmem:[#allocation7 + $0x890] sm:$0xff]  ;;  %v2218_v50 = vld [vmem:[#allocation7 + $0x7b8] sm:$0xff] }
 0x381   : > { %4079 = vmatprep.subr.bf16.mxu1 %v4078_v23  ;;  %v1651_v28 = vsel %vm542_vm6, %v1648_v42, %v1650_v5  ;;  %v4092_v59 = vpack.c.bf16 %v2212_v12, %v2211_v55  ;;  %v4126_v10 = vpack.c.bf16 %v2262_v2, %v2261_v0  ;;  %v4096_v14 = vpack.c.bf16 %v2214_v7, %v2213_v9  ;;  %v2217_v39 = vld [vmem:[#allocation7 + $0x7b0] sm:$0xff]  ;;  %v2250_v41 = vld [vmem:[#allocation7 + $0x8b8] sm:$0xff]  ;;  %v2235_v42 = vld [vmem:[#allocation7 + $0x840] sm:$0xff] }
 0x382   : > { %1841 = vmatmul.mubr.f32.gmra.mrb[50].mxu1 %v5034_v8  ;;  %v1653_v8 = vsel %vm542_vm6, %v1650_v5, %v1652_v20  ;;  %4091 = vmatprep.subr.bf16.mxu0 %v4090_v36  ;;  %v4128_v11 = vpack.c.bf16 %v2246_v43, %v2245_v27  ;;  %v4104_v16 = vpack.c.bf16 %v2218_v50, %v2217_v39  ;;  %v2267_v5 = vld [vmem:[#allocation7 + $0x940] sm:$0xff]  ;;  %v2268_v20 = vld [vmem:[#allocation7 + $0x948] sm:$0xff]  ;;  %v2237_v55 = vld [vmem:[#allocation7 + $0x850] sm:$0xff] }
 0x383   : > { %1946 = vmatmul.mubr.f32.gmra.mrb[58].mxu0 %v1599_v13  ;;  %1845 = vmatprep.mubr.f32.mxu1 %v1576_v15  ;;  %v2232_v13 = vld [vmem:[#allocation7 + $0x828] sm:$0xff]  ;;  %v2263_v15 = vld [vmem:[#allocation7 + $0x920] sm:$0xff]  ;;  %v4138_v45 = vpack.c.bf16 %v2268_v20, %v2267_v5  ;;  %v2238_v12 = vld [vmem:[#allocation7 + $0x858] sm:$0xff] }
 0x384   : > { %1950 = vmatprep.mubr.f32.mxu0 %v1626_v46  ;;  %4081 = vmatpush3.bf16.msra.mxu1 %v4078_v23  ;;  %v2230_v23 = vld [vmem:[#allocation7 + $0x818] sm:$0xff]  ;;  %v2216_v46 = vld [vmem:[#allocation7 + $0x7a8] sm:$0xff]  ;;  %v4130_v31 = vpack.c.bf16 %v2264_v49, %v2263_v15  ;;  %v2253_v0 = vld [vmem:[#allocation7 + $0x8d0] sm:$0xff] }
 0x385   : > { %4083 = vmatprep.subr.bf16.mxu1 %v4082_v56  ;;  %4093 = vmatpush3.bf16.msra.mxu0 %v4092_v59  ;;  %v4094_v1 = vpack.c.bf16 %v2230_v23, %v2229_v63  ;;  %v2252_v36 = vld [vmem:[#allocation7 + $0x8c8] sm:$0xff]  ;;  %v4110_v59 = vpack.c.bf16 %v2238_v12, %v2237_v55  ;;  %v2239_v9 = vld [vmem:[#allocation7 + $0x860] sm:$0xff] }
 0x386   : > { %1846 = vmatmul.mubr.f32.gmra.mrb[52].mxu1 %v5056_v40  ;;  %v2259_v40 = vld [vmem:[#allocation7 + $0x900] sm:$0xff]  ;;  %v2240_v7 = vld [vmem:[#allocation7 + $0x868] sm:$0xff] }
 0x387   : > { %1951 = vmatmul.mubr.f32.gmra.mrb[60].mxu0 %v1601_v21  ;;  %1850 = vmatprep.mubr.f32.mxu1 %v1578_v3  ;;  %v4122_v54 = vpack.c.bf16 %v2260_v33, %v2259_v40  ;;  %v4100_v21 = vpack.c.bf16 %v2216_v46, %v2215_v19  ;;  %v2248_v3 = vld [vmem:[#allocation7 + $0x8a8] sm:$0xff]  ;;  %v2251_v40 = vld [vmem:[#allocation7 + $0x8c0] sm:$0xff]  ;;  %v2241_v19 = vld [vmem:[#allocation7 + $0x870] sm:$0xff] }
 0x388   : > { %1955 = vmatprep.mubr.f32.mxu0 %v1628_v32  ;;  %4085 = vmatpush3.bf16.msra.mxu1 %v4082_v56  ;;  %v2231_v56 = vld [vmem:[#allocation7 + $0x820] sm:$0xff]  ;;  %v2265_v32 = vld [vmem:[#allocation7 + $0x930] sm:$0xff]  ;;  %v4140_v33 = vpack.c.bf16 %v2252_v36, %v2251_v40  ;;  %v2272_v27 = vld [vmem:[#allocation7 + $0x968] sm:$0xff] }
 0x389   : > { %4087 = vmatprep.subr.bf16.mxu1 %v4086_v53  ;;  %4095 = vmatprep.subr.bf16.mxu0 %v4094_v1  ;;  %v4098_v17 = vpack.c.bf16 %v2232_v13, %v2231_v56  ;;  %v2254_v1 = vld [vmem:[#allocation7 + $0x8d8] sm:$0xff]  ;;  %v2223_v43 = vld [vmem:[#allocation7 + $0x7e0] sm:$0xff]  ;;  %v2276_v50 = vld [vmem:[#allocation7 + $0x988] sm:$0xff] }
 0x38a   : > { %1851 = vmatmul.mubr.f32.gmra.mrb[54].mxu1 %v5067_v62  ;;  %v2244_v62 = vld [vmem:[#allocation7 + $0x888] sm:$0xff]  ;;  %4097 = vmatpush3.bf16.msra.mxu0 %v4096_v14  ;;  %v4144_v2 = vpack.c.bf16 %v2254_v1, %v2253_v0  ;;  %v4114_v14 = vpack.c.bf16 %v2240_v7, %v2239_v9  ;;  %v2255_v15 = vld [vmem:[#allocation7 + $0x8e0] sm:$0xff]  ;;  %v2242_v46 = vld [vmem:[#allocation7 + $0x878] sm:$0xff] }
 0x38b   : > { %1956 = vmatmul.mubr.f32.gmra.mrb[62].mxu0 %v1603_v29  ;;  %3720 = vmatprep.mubr.f32.mxu1 %v1639_v35  ;;  %v4124_v52 = vpack.c.bf16 %v2244_v62, %v2243_v60  ;;  %v4102_v29 = vpack.c.bf16 %v2234_v24, %v2233_v34  ;;  %v2266_v35 = vld [vmem:[#allocation7 + $0x938] sm:$0xff]  ;;  %v2221_v62 = vld [vmem:[#allocation7 + $0x7d0] sm:$0xff]  ;;  %v2275_v39 = vld [vmem:[#allocation7 + $0x980] sm:$0xff] }
 0x38c   : > { %4089 = vmatpush3.bf16.msra.mxu1 %v4086_v53  ;;  %v2247_v53 = vld [vmem:[#allocation7 + $0x8a0] sm:$0xff]  ;;  %4099 = vmatprep.subr.bf16.mxu0 %v4098_v17  ;;  %v2270_v60 = vld [vmem:[#allocation7 + $0x958] sm:$0xff]  ;;  %v2256_v17 = vld [vmem:[#allocation7 + $0x8e8] sm:$0xff] }
 0x38d   : > { %4123 = vmatprep.subr.bf16.mxu1 %v4122_v54  ;;  %v4132_v26 = vpack.c.bf16 %v2248_v3, %v2247_v53  ;;  %v2269_v54 = vld [vmem:[#allocation7 + $0x950] sm:$0xff]  ;;  %v4148_v49 = vpack.c.bf16 %v2256_v17, %v2255_v15  ;;  %v2274_v53 = vld [vmem:[#allocation7 + $0x978] sm:$0xff] }
 0x38e   : > { %4101 = vmatpush3.bf16.msra.mxu0 %v4100_v21  ;;  %v4142_v63 = vpack.c.bf16 %v2270_v60, %v2269_v54  ;;  %v4118_v21 = vpack.c.bf16 %v2242_v46, %v2241_v19  ;;  %v2225_v3 = vld [vmem:[#allocation7 + $0x7f0] sm:$0xff] }
 0x38f   : > { %3721 = vmatmul.mubr.f32.vlgmr.msra.gmra.mrb[56].mxu1 %v1641_v47  ;;  %v4134_v47 = vpack.c.bf16 %v2266_v35, %v2265_v32  ;;  %4103 = vmatprep.subr.bf16.mxu0 %v4102_v29  ;;  %v2257_v32 = vld [vmem:[#allocation7 + $0x8f0] sm:$0xff]  ;;  %v2258_v29 = vld [vmem:[#allocation7 + $0x8f8] sm:$0xff] }
 0x390   : > { %3723 = vmatprep.mubr.f32.mxu1 %v1643_v57  ;;  %4125 = vmatpush3.bf16.msra.mxu1 %v4124_v52  ;;  %v2249_v57 = vld [vmem:[#allocation7 + $0x8b0] sm:$0xff]  ;;  %v2222_v52 = vld [vmem:[#allocation7 + $0x7d8] sm:$0xff]  ;;  %v4152_v35 = vpack.c.bf16 %v2258_v29, %v2257_v32 }
 0x391   : > { %4127 = vmatprep.subr.bf16.mxu1 %v4126_v10  ;;  %v4112_v23 = vpack.c.bf16 %v2222_v52, %v2221_v62  ;;  %v2271_v10 = vld [vmem:[#allocation7 + $0x960] sm:$0xff] }
 0x392   : > { %4105 = vmatpush3.bf16.msra.mxu0 %v4104_v16  ;;  %v4146_v56 = vpack.c.bf16 %v2272_v27, %v2271_v10 }
 0x393   : > { %3724 = vmatmul.mubr.f32.gmra.mrb[58].mxu1 %v1645_v22  ;;  %v4136_v22 = vpack.c.bf16 %v2250_v41, %v2249_v57  ;;  %v2997_v41 = vld [vmem:[#allocation8 + $0x2] ss:$0 sm:$0xff] }
 0x394   : > { %3726 = vmatprep.mubr.f32.mxu1 %v1647_v61  ;;  %4129 = vmatpush3.bf16.msra.mxu1 %v4128_v11  ;;  %v2236_v61 = vld [vmem:[#allocation7 + $0x848] sm:$0xff] }
 0x395   : > { %4131 = vmatprep.subr.bf16.mxu1 %v4130_v31  ;;  %v2224_v11 = vld [vmem:[#allocation7 + $0x7e8] sm:$0xff]  ;;  %v2273_v31 = vld [vmem:[#allocation7 + $0x970] sm:$0xff] }
 0x396   : > { %v4116_v13 = vpack.c.bf16 %v2224_v11, %v2223_v43  ;;  %v4150_v34 = vpack.c.bf16 %v2274_v53, %v2273_v31 }
 0x397   : > { %3727 = vmatmul.mubr.f32.gmra.mrb[60].mxu1 %v1649_v44  ;;  %v4106_v44 = vpack.c.bf16 %v2236_v61, %v2235_v42 }
 0x398   : > { %3729 = vmatprep.mubr.f32.mxu1 %v1651_v28  ;;  %4133 = vmatpush3.bf16.msra.mxu1 %v4132_v26  ;;  %v2219_v28 = vld [vmem:[#allocation7 + $0x7c0] sm:$0xff]  ;;  %v2226_v26 = vld [vmem:[#allocation7 + $0x7f8] sm:$0xff] }
 0x399   : > { %4135 = vmatprep.subr.bf16.mxu1 %v4134_v47  ;;  %4107 = vmatprep.subr.bf16.mxu0 %v4106_v44  ;;  %v4120_v24 = vpack.c.bf16 %v2226_v26, %v2225_v3  ;;  %v5112_v47 = vpack.c.bf16 %v2276_v50, %v2275_v39 }
 0x39b   : > { %3730 = vmatmul.mubr.f32.gmra.mrb[62].mxu1 %v1653_v8  ;;  %v2220_v8 = vld [vmem:[#allocation7 + $0x7c8] sm:$0xff] }
 0x39c   : > { %4137 = vmatpush3.bf16.msra.mxu1 %v4136_v22  ;;  %v4108_v48 = vpack.c.bf16 %v2220_v8, %v2219_v28 }
 0x39d   : > { %4139 = vmatprep.subr.bf16.mxu1 %v4138_v45 }
 0x39e   : > { %4109 = vmatpush3.bf16.msra.mxu0 %v4108_v48 }
 0x39f   : > { %4111 = vmatprep.subr.bf16.mxu0 %v4110_v59 }
 0x3a0   : > { %4141 = vmatpush3.bf16.msra.mxu1 %v4140_v33 }
 0x3a1   : > { %4143 = vmatprep.subr.bf16.mxu1 %v4142_v63 }
 0x3a2   : > { %4113 = vmatpush3.bf16.msra.mxu0 %v4112_v23 }
 0x3a3   : > { %4115 = vmatprep.subr.bf16.mxu0 %v4114_v14 }
 0x3a4   : > { %4145 = vmatpush3.bf16.msra.mxu1 %v4144_v2 }
 0x3a5   : > { %4147 = vmatprep.subr.bf16.mxu1 %v4146_v56 }
 0x3a6   : > { %4117 = vmatpush3.bf16.msra.mxu0 %v4116_v13 }
 0x3a7   : > { %4119 = vmatprep.subr.bf16.mxu0 %v4118_v21 }
 0x3a8   : > { %4149 = vmatpush3.bf16.msra.mxu1 %v4148_v49 }
 0x3a9   : > { %4151 = vmatprep.subr.bf16.mxu1 %v4150_v34 }
 0x3aa   : > { %4121 = vmatpush3.bf16.msra.mxu0 %v4120_v24 }
 0x3ab   : > { %4155 = vmatprep.subr.bf16.mxu0 %v5112_v47 }
 0x3ac   : > { %4153 = vmatpush3.bf16.msra.mxu1 %v4152_v35 }
 0x441   : > { %v3332_v16 = vpop.f32.mrb[40].mxu1 }
 0x442   : > { %v3388_v57 = vpop.f32.mrb[48].mxu0  ;;  %v3333_v22 = vpop.f32.mrb[41].mxu1 }
 0x443   : > { %v3334_v42 = vadd.f32 %v3333_v22, %v3332_v16  ;;  %v3389_v61 = vpop.f32.mrb[49].mxu0 }
 0x444   : > { %v3390_v5 = vadd.f32 %v3389_v61, %v3388_v57 }
 0x445   : > { %v1818_v44 = vadd.f32 %v3334_v42, %v2997_v41  ;;  %v3335_v20 = vpop.f32.mrb[42].mxu1 }
 0x446   : > { %v3391_v28 = vpop.f32.mrb[50].mxu0  ;;  %v3336_v8 = vpop.f32.mrb[43].mxu1 }
 0x447   : > { %v3337_v45 = vadd.f32 %v3336_v8, %v3335_v20  ;;  %v3392_v48 = vpop.f32.mrb[51].mxu0  ;;  %v1923_v40 = vadd.f32 %v3390_v5, %v1818_v44 }
 0x448   : > { %v3393_v36 = vadd.f32 %v3392_v48, %v3391_v28 }
 0x449   : > { %v1823_v33 = vadd.f32 %v3337_v45, %v2997_v41  ;;  %v3338_v55 = vpop.f32.mrb[44].mxu1 }
 0x44a   : > { %v3394_v12 = vpop.f32.mrb[52].mxu0  ;;  %v3339_v54 = vpop.f32.mrb[45].mxu1 }
 0x44b   : > { %v3340_v59 = vadd.f32 %v3339_v54, %v3338_v55  ;;  %v3395_v60 = vpop.f32.mrb[53].mxu0  ;;  %v1928_v62 = vadd.f32 %v3393_v36, %v1823_v33  ;;  %v2278_v54 = vld [vmem:[#allocation7 + $0x998] sm:$0xff] }
 0x44c   : > { %v3396_v52 = vadd.f32 %v3395_v60, %v3394_v12  ;;  %v2277_v12 = vld [vmem:[#allocation7 + $0x990] sm:$0xff]  ;;  %v2279_v60 = vld [vmem:[#allocation7 + $0x9a0] sm:$0xff] }
 0x44d   : > { %v1828_v63 = vadd.f32 %v3340_v59, %v2997_v41  ;;  %v3341_v23 = vpop.f32.mrb[46].mxu1 }
 0x44e   : > { %v3397_v0 = vpop.f32.mrb[54].mxu0  ;;  %v3342_v1 = vpop.f32.mrb[47].mxu1 }
 0x44f   : > { %v3343_v2 = vadd.f32 %v3342_v1, %v3341_v23  ;;  %v3398_v9 = vpop.f32.mrb[55].mxu0  ;;  %v1933_v7 = vadd.f32 %v3396_v52, %v1828_v63  ;;  %v2280_v52 = vld [vmem:[#allocation7 + $0x9a8] sm:$0xff]  ;;  %v2281_v63 = vld [vmem:[#allocation7 + $0x9b0] sm:$0xff]  ;;  %v2282_v1 = vld [vmem:[#allocation7 + $0x9b8] sm:$0xff] }
 0x450   : > { %v3399_v10 = vadd.f32 %v3398_v9, %v3397_v0  ;;  %v2284_v9 = vld [vmem:[#allocation7 + $0x9c8] sm:$0xff] }
 0x451   : > { %v1833_v14 = vadd.f32 %v3343_v2, %v2997_v41  ;;  %v3344_v27 = vpop.f32.mrb[48].mxu1  ;;  %v2283_v2 = vld [vmem:[#allocation7 + $0x9c0] sm:$0xff] }
 0x452   : > { %v3400_v43 = vpop.f32.mrb[56].mxu0  ;;  %v3345_v11 = vpop.f32.mrb[49].mxu1 }
 0x453   : > { %v3346_v56 = vadd.f32 %v3345_v11, %v3344_v27  ;;  %v3401_v13 = vpop.f32.mrb[57].mxu0  ;;  %v1938_v15 = vadd.f32 %v3399_v10, %v1833_v14 }
 0x454   : > { %v3402_v17 = vadd.f32 %v3401_v13, %v3400_v43  ;;  %v2286_v43 = vld [vmem:[#allocation7 + $0x9d8] sm:$0xff]  ;;  %v5117_v13 = vpack.c.bf16 %v2280_v52, %v2279_v60 }
 0x455   : > { %v1838_v49 = vadd.f32 %v3346_v56, %v2997_v41  ;;  %v3347_v19 = vpop.f32.mrb[50].mxu1  ;;  %v5115_v56 = vpack.c.bf16 %v2278_v54, %v2277_v12 }
 0x456   : > { %v3403_v46 = vpop.f32.mrb[58].mxu0  ;;  %v3348_v31 = vpop.f32.mrb[51].mxu1 }
 0x457   : > { %v3349_v21 = vadd.f32 %v3348_v31, %v3347_v19  ;;  %v3404_v53 = vpop.f32.mrb[59].mxu0  ;;  %v1943_v3 = vadd.f32 %v3402_v17, %v1838_v49  ;;  %v5119_v17 = vpack.c.bf16 %v2282_v1, %v2281_v63  ;;  %v5121_v49 = vpack.c.bf16 %v2284_v9, %v2283_v2 }
 0x458   : > { %v3405_v26 = vadd.f32 %v3404_v53, %v3403_v46 }
 0x459   : > { %v1843_v34 = vadd.f32 %v3349_v21, %v2997_v41  ;;  %v3350_v24 = vpop.f32.mrb[52].mxu1 }
 0x45a   : > { %v3406_v32 = vpop.f32.mrb[60].mxu0  ;;  %v3351_v29 = vpop.f32.mrb[53].mxu1 }
 0x45b   : > { %v3352_v35 = vadd.f32 %v3351_v29, %v3350_v24  ;;  %v3407_v39 = vpop.f32.mrb[61].mxu0  ;;  %v1948_v50 = vadd.f32 %v3405_v26, %v1843_v34 }
 0x45c   : > { %v3408_v16 = vadd.f32 %v3407_v39, %v3406_v32 }
 0x45d   : > { %v1848_v57 = vadd.f32 %v3352_v35, %v2997_v41  ;;  %v3353_v22 = vpop.f32.mrb[54].mxu1 }
 0x45e   : > { %v3409_v42 = vpop.f32.mrb[62].mxu0  ;;  %v3354_v61 = vpop.f32.mrb[55].mxu1 }
 0x45f   : > { %v3355_v5 = vadd.f32 %v3354_v61, %v3353_v22  ;;  %v3410_v44 = vpop.f32.mrb[63].mxu0  ;;  %v1953_v20 = vadd.f32 %v3408_v16, %v1848_v57 }
 0x460   : > { %v3411_v28 = vadd.f32 %v3410_v44, %v3409_v42 }
 0x461   : > { %v1853_v8 = vadd.f32 %v3355_v5, %v2997_v41  ;;  %v2285_v41 = vld [vmem:[#allocation7 + $0x9d0] sm:$0xff] }
 0x462   : > { %v3722_v45 = vpop.f32.mrb[56].mxu1  ;;  %v5129_v21 = vpack.c.bf16 %v2286_v43, %v2285_v41 }
 0x463   : > { %v2033_v48 = vadd.f32 %v3722_v45, %v1928_v62  ;;  %v2027_v36 = vpop.f32.mrb[57].mxu1  ;;  %v1958_v33 = vadd.f32 %v3411_v28, %v1853_v8 }
 0x464   : > { %v2028_v55 = vadd.f32 %v2027_v36, %v1923_v40 }
 0x465   : > { %v2067_v59 = vmax.f32 %v2033_v48, 0.0 }
 0x466   : > { %v2066_v23 = vmax.f32 %v2028_v55, 0.0  ;;  %v3725_v0 = vpop.f32.mrb[58].mxu1 }
 0x467   : > { %v2083_v10 = vrot.slane %v2067_v59, 6  ;;  %v2043_v14 = vadd.f32 %v3725_v0, %v1938_v15  ;;  %v2037_v27 = vpop.f32.mrb[59].mxu1 }
 0x468   : > { %v2082_v62 = vrot.slane %v2066_v23, 6  ;;  %v2038_v11 = vadd.f32 %v2037_v27, %v1933_v7 }
 0x469   : > { %v2069_v40 = vmax.f32 %v2043_v14, 0.0 }
 0x46a   : > { %v5124_v19 = vsel %vm435_vm1, %v2082_v62, %v2083_v10  ;;  %v5127_v46 = vsel %vm435_vm1, 0.0, %v2082_v62  ;;  %v2068_v15 = vmax.f32 %v2038_v11, 0.0  ;;  %v3728_v31 = vpop.f32.mrb[60].mxu1 }
 0x46b   : > { %v2135_v7 = vrot.slane %v5127_v46, 2  ;;  %v2087_v53 = vrot.slane %v2069_v40, 6  ;;  %v2053_v26 = vadd.f32 %v3728_v31, %v1948_v50  ;;  %v2047_v34 = vpop.f32.mrb[61].mxu1  ;;  %v2110_v24 = vrot.slane %v5127_v46, 1 }
 0x46c   : > { %v2085_v32 = vrot.slane %v2068_v15, 6  ;;  %v2048_v29 = vadd.f32 %v2047_v34, %v1943_v3  ;;  %v2111_v35 = vrot.slane %v5124_v19, 1  ;;  %v2160_v39 = vrot.slane %v5127_v46, 3 }
 0x46d   : > { %v2071_v16 = vmax.f32 %v2053_v26, 0.0  ;;  %v2161_v57 = vrot.slane %v5124_v19, 3  ;;  %v2136_v22 = vrot.slane %v5124_v19, 2  ;;  %v2185_v42 = vrot.slane %v5127_v46, 4 }
 0x46e   : > { %v5139_v61 = vsel %vm435_vm1, %v2083_v10, %v2085_v32  ;;  %v5142_v50 = vsel %vm435_vm1, %v2085_v32, %v2087_v53  ;;  %v2070_v5 = vmax.f32 %v2048_v29, 0.0  ;;  %v3731_v44 = vpop.f32.mrb[62].mxu1  ;;  %v2112_v3 = vsel %vm464_vm2, %v2110_v24, %v2111_v35 }
 0x46f   : > { %v2091_v28 = vrot.slane %v2071_v16, 6  ;;  %v2063_v8 = vadd.f32 %v3731_v44, %v1958_v33  ;;  %2363 = vmatprep.mubr.f32.mxu0 %v2112_v3  ;;  %v2162_v45 = vsel %vm516_vm3, %v2160_v39, %v2161_v57  ;;  %v2057_v48 = vpop.f32.mrb[63].mxu1  ;;  %v2137_v36 = vsel %vm490_vm4, %v2135_v7, %v2136_v22 }
 0x470   : > { %v2089_v55 = vrot.slane %v2070_v5, 6  ;;  %2468 = vmatprep.mubr.f32.mxu1 %v2162_v45  ;;  %v2058_v12 = vadd.f32 %v2057_v48, %v1953_v20  ;;  %3002 = vmatmul.mubr.msk.f32.vlgmr.msra.gmra.mrb[64].mxu0 %vm4728_vm5, %v2082_v62  ;;  %v2113_v54 = vrot.slane %v5139_v61, 1  ;;  %v2163_v59 = vrot.slane %v5139_v61, 3 }
 0x471   : > { %v2073_v60 = vmax.f32 %v2063_v8, 0.0  ;;  %2469 = vmatmul.mubr.f32.vlgmr.msra.gmra.mrb[64].mxu1 %v2137_v36  ;;  %4157 = vmatpush3.bf16.msra.mxu0 %v5112_v47  ;;  %v2138_v33 = vrot.slane %v5139_v61, 2  ;;  %v2115_v52 = vrot.slane %v5142_v50, 1  ;;  %v2165_v63 = vrot.slane %v5142_v50, 3 }
 0x472   : > { %v5156_v23 = vsel %vm435_vm1, %v2087_v53, %v2089_v55  ;;  %v5159_v4 = vsel %vm435_vm1, %v2089_v55, %v2091_v28  ;;  %v2072_v20 = vmax.f32 %v2058_v12, 0.0  ;;  %v2114_v0 = vsel %vm464_vm2, %v2111_v35, %v2113_v54  ;;  %4159 = vmatprep.subr.bf16.mxu0 %v5115_v56 }
 0x473   : > { %v2095_v1 = vrot.slane %v2073_v60, 6  ;;  %2368 = vmatprep.mubr.f32.mxu0 %v2114_v0  ;;  %v2164_v47 = vsel %vm516_vm3, %v2161_v57, %v2163_v59  ;;  %v2139_v2 = vsel %vm490_vm4, %v2136_v22, %v2138_v33  ;;  %v2116_v9 = vsel %vm464_vm2, %v2113_v54, %v2115_v52 }
 0x474   : > { %v2093_v10 = vrot.slane %v2072_v20, 6  ;;  %2473 = vmatprep.mubr.f32.mxu1 %v2164_v47  ;;  %2369 = vmatmul.mubr.f32.gmra.mrb[66].mxu0 %v5124_v19  ;;  %v2166_v14 = vsel %vm516_vm3, %v2163_v59, %v2165_v63  ;;  %v2140_v27 = vrot.slane %v5142_v50, 2  ;;  %v2117_v41 = vrot.slane %v5156_v23, 1 }
 0x475   : > { %v5171_v43 = vsel %vm435_vm1, %v2095_v1, 0.0  ;;  %2474 = vmatmul.mubr.f32.gmra.mrb[66].mxu1 %v2139_v2  ;;  %2373 = vmatprep.mubr.f32.mxu0 %v2116_v9  ;;  %v2167_v62 = vrot.slane %v5156_v23, 3  ;;  %v2142_v11 = vrot.slane %v5156_v23, 2  ;;  %v2119_v40 = vrot.slane %v5159_v4, 1  ;;  %v2287_v2 = vld [vmem:[#allocation7 + $0x9e0] sm:$0xff]  ;;  %v2288_v9 = vld [vmem:[#allocation7 + $0x9e8] sm:$0xff] }
 0x476   : > { %v5177_v15 = vsel %vm435_vm1, %v2091_v28, %v2093_v10  ;;  %v5180_v31 = vsel %vm435_vm1, %v2093_v10, %v2095_v1  ;;  %2478 = vmatprep.mubr.f32.mxu1 %v2166_v14  ;;  %4161 = vmatpush3.bf16.msra.mxu0 %v5115_v56  ;;  %v2141_v7 = vsel %vm490_vm4, %v2138_v33, %v2140_v27  ;;  %v2169_v53 = vrot.slane %v5159_v4, 3 }
 0x477   : > { %4163 = vmatprep.subr.bf16.mxu0 %v5117_v13  ;;  %v2118_v26 = vsel %vm464_vm2, %v2115_v52, %v2117_v41  ;;  %v2168_v34 = vsel %vm516_vm3, %v2165_v63, %v2167_v62  ;;  %v2143_v24 = vsel %vm490_vm4, %v2140_v27, %v2142_v11  ;;  %v2120_v32 = vsel %vm464_vm2, %v2117_v41, %v2119_v40  ;;  %v2289_v41 = vld [vmem:[#allocation7 + $0x9f0] sm:$0xff] }
 0x478   : > { %2374 = vmatmul.mubr.f32.gmra.mrb[68].mxu0 %v5139_v61  ;;  %v2170_v29 = vsel %vm516_vm3, %v2167_v62, %v2169_v53  ;;  %v2144_v56 = vrot.slane %v5159_v4, 2  ;;  %v2121_v35 = vrot.slane %v5177_v15, 1  ;;  %v2171_v39 = vrot.slane %v5177_v15, 3  ;;  %v2290_v62 = vld [vmem:[#allocation7 + $0x9f8] sm:$0xff] }
 0x479   : > { %2479 = vmatmul.mubr.f32.gmra.mrb[68].mxu1 %v2141_v7  ;;  %2378 = vmatprep.mubr.f32.mxu0 %v2118_v26  ;;  %v2146_v16 = vrot.slane %v5177_v15, 2  ;;  %v2123_v57 = vrot.slane %v5180_v31, 1  ;;  %v2173_v22 = vrot.slane %v5180_v31, 3  ;;  %v2148_v5 = vrot.slane %v5180_v31, 2 }
 0x47a   : > { %2483 = vmatprep.mubr.f32.mxu1 %v2168_v34  ;;  %4165 = vmatpush3.bf16.msra.mxu0 %v5117_v13  ;;  %v2145_v44 = vsel %vm490_vm4, %v2142_v11, %v2144_v56  ;;  %v2122_v3 = vsel %vm464_vm2, %v2119_v40, %v2121_v35  ;;  %v2172_v28 = vsel %vm516_vm3, %v2169_v53, %v2171_v39  ;;  %v2125_v8 = vrot.slane %v5171_v43, 1 }
 0x47b   : > { %4167 = vmatprep.subr.bf16.mxu0 %v5119_v17  ;;  %v2147_v45 = vsel %vm490_vm4, %v2144_v56, %v2146_v16  ;;  %v2124_v48 = vsel %vm464_vm2, %v2121_v35, %v2123_v57  ;;  %v2174_v36 = vsel %vm516_vm3, %v2171_v39, %v2173_v22  ;;  %v2149_v55 = vsel %vm490_vm4, %v2146_v16, %v2148_v5  ;;  %v3000_v16 = vld [vmem:[#allocation8 + $0x3] ss:$0 sm:$0xff] }
 0x47c   : > { %2379 = vmatmul.mubr.f32.gmra.mrb[70].mxu0 %v5142_v50  ;;  %v2126_v13 = vsel %vm464_vm2, %v2123_v57, %v2125_v8  ;;  %v2175_v12 = vrot.slane %v5171_v43, 3  ;;  %v2150_v54 = vrot.slane %v5171_v43, 2  ;;  %v2186_v59 = vrot.slane %v5124_v19, 4 }
 0x47d   : > { %2484 = vmatmul.mubr.f32.gmra.mrb[70].mxu1 %v2143_v24  ;;  %2383 = vmatprep.mubr.f32.mxu0 %v2120_v32  ;;  %v2188_v60 = vrot.slane %v5139_v61, 4  ;;  %v2190_v33 = vrot.slane %v5142_v50, 4  ;;  %v2192_v52 = vrot.slane %v5156_v23, 4  ;;  %v2194_v63 = vrot.slane %v5159_v4, 4 }
 0x47e   : > { %2488 = vmatprep.mubr.f32.mxu1 %v2170_v29  ;;  %4169 = vmatpush3.bf16.msra.mxu0 %v5119_v17  ;;  %v2176_v20 = vsel %vm516_vm3, %v2173_v22, %v2175_v12  ;;  %v2151_v0 = vsel %vm490_vm4, %v2148_v5, %v2150_v54  ;;  %v2187_v19 = vsel %vm542_vm6, %v2185_v42, %v2186_v59  ;;  %v2196_v1 = vrot.slane %v5177_v15, 4 }
 0x47f   : > { %4171 = vmatprep.subr.bf16.mxu0 %v5121_v49  ;;  %v2189_v61 = vsel %vm542_vm6, %v2186_v59, %v2188_v60  ;;  %v2191_v50 = vsel %vm542_vm6, %v2188_v60, %v2190_v33  ;;  %v2193_v47 = vsel %vm542_vm6, %v2190_v33, %v2192_v52  ;;  %v2195_v17 = vsel %vm542_vm6, %v2192_v52, %v2194_v63 }
 0x480   : > { %2384 = vmatmul.mubr.f32.gmra.mrb[72].mxu0 %v5156_v23  ;;  %v2197_v46 = vsel %vm542_vm6, %v2194_v63, %v2196_v1  ;;  %v2198_v42 = vrot.slane %v5180_v31, 4  ;;  %v2200_v10 = vrot.slane %v5171_v43, 4  ;;  %v4178_v23 = vpack.c.bf16 %v2288_v9, %v2287_v2 }
 0x481   : > { %2489 = vmatmul.mubr.f32.gmra.mrb[72].mxu1 %v2145_v44  ;;  %2388 = vmatprep.mubr.f32.mxu0 %v2122_v3  ;;  %v4182_v43 = vpack.c.bf16 %v2290_v62, %v2289_v41  ;;  %v4485_v26 = vmov 0.0  }
 0x482   : > { %2493 = vmatprep.mubr.f32.mxu1 %v2172_v28  ;;  %4173 = vmatpush3.bf16.msra.mxu0 %v5121_v49  ;;  %v2199_v14 = vsel %vm542_vm6, %v2196_v1, %v2198_v42  ;;  %v2201_v27 = vsel %vm542_vm6, %v2198_v42, %v2200_v10  ;;  %v2725_v49 = vlaneseq }
 0x483   : > { %4175 = vmatprep.subr.bf16.mxu0 %v5129_v21 }
 0x484   : > { %2389 = vmatmul.mubr.f32.gmra.mrb[74].mxu0 %v5159_v4  ;;  %v2731_v4 = vand.u32 127, %v2725_v49 }
 0x485   : > { %2494 = vmatmul.mubr.f32.gmra.mrb[74].mxu1 %v2147_v45  ;;  %2393 = vmatprep.mubr.f32.mxu0 %v2124_v48 }
 0x486   : > { %2498 = vmatprep.mubr.f32.mxu1 %v2174_v36  ;;  %4177 = vmatpush3.bf16.msra.mxu0 %v5129_v21  ;;  %v2726_v21 = vshrl.u32 %v2725_v49, 7 }
 0x487   : > { %4179 = vmatprep.subr.bf16.mxu0 %v4178_v23 }
 0x488   : > { %2394 = vmatmul.mubr.f32.gmra.mrb[76].mxu0 %v5177_v15  ;;  %v2732_v11 = vmul.u32 2, %v2726_v21  ;;  %v2727_v40 = vadd.s32 8, %v2726_v21  ;;  %v2728_v15 = vadd.s32 16, %v2726_v21  ;;  %v2729_v7 = vadd.s32 24, %v2726_v21 }
 0x489   : > { %2499 = vmatmul.mubr.f32.gmra.mrb[76].mxu1 %v2149_v55  ;;  %2398 = vmatprep.mubr.f32.mxu0 %v2126_v13 }
 0x48a   : > { %2503 = vmatprep.mubr.f32.mxu1 %v2176_v20  ;;  %4181 = vmatpush3.bf16.msra.mxu0 %v4178_v23  ;;  %vm2736_vm8 = vcmp.eq.s32.totalorder %v2731_v4, %v2732_v11  ;;  %v2734_v53 = vmul.u32 2, %v2728_v15  ;;  %v2735_v24 = vmul.u32 2, %v2729_v7 }
 0x48b   : > { %4183 = vmatprep.subr.bf16.mxu0 %v4182_v43  ;;  %v3003_v34 = vsel %vm2736_vm8, 1.0, %v4485_v26 }
 0x48c   : > { %2399 = vmatmul.mubr.f32.gmra.mrb[78].mxu0 %v5180_v31  ;;  %v2733_v31 = vmul.u32 2, %v2727_v40  ;;  %vm2738_vm10 = vcmp.eq.s32.totalorder %v2731_v4, %v2734_v53  ;;  %vm2739_vm11 = vcmp.eq.s32.totalorder %v2731_v4, %v2735_v24 }
 0x48d   : > { %2504 = vmatmul.mubr.f32.gmra.mrb[78].mxu1 %v2151_v0  ;;  %3764 = vmatprep.mubr.f32.mxu0 %v2187_v19  ;;  %v5245_v29 = vsel %vm2738_vm10, 1.0, %v4485_v26  ;;  %v5247_v56 = vsel %vm2739_vm11, 1.0, %v4485_v26 }
 0x48e   : > { %4185 = vmatpush3.bf16.msra.mxu0 %v4182_v43  ;;  %vm2737_vm9 = vcmp.eq.s32.totalorder %v2731_v4, %v2733_v31 }
 0x48f   : > { %v5243_v32 = vsel %vm2737_vm9, 1.0, %v4485_v26 }
 0x491   : > { %3765 = vmatmul.mubr.f32.vlgmr.msra.gmra.mrb[80].mxu0 %v2189_v61 }
 0x492   : > { %3767 = vmatprep.mubr.f32.mxu0 %v2191_v50 }
 0x495   : > { %3768 = vmatmul.mubr.f32.gmra.mrb[82].mxu0 %v2193_v47 }
 0x496   : > { %3770 = vmatprep.mubr.f32.mxu0 %v2195_v17 }
 0x499   : > { %3771 = vmatmul.mubr.f32.gmra.mrb[84].mxu0 %v2197_v46 }
 0x49a   : > { %3773 = vmatprep.mubr.f32.mxu0 %v2199_v14 }
 0x49d   : > { %3774 = vmatmul.mubr.f32.gmra.mrb[86].mxu0 %v2201_v27 }
 0x49e   : > { %3792 = vmatprep.mubr.msk.f32.mxu0 %vm2748_vm7, %v3003_v34 }
 0x543   : > { %v3468_v35 = vpop.f32.mrb[64].mxu0 }
 0x544   : > { %v3524_v39 = vpop.f32.mrb[64].mxu1  ;;  %v3469_v57 = vpop.f32.mrb[65].mxu0 }
 0x545   : > { %v3470_v22 = vadd.f32 %v3469_v57, %v3468_v35  ;;  %v3525_v5 = vpop.f32.mrb[65].mxu1 }
 0x546   : > { %v3526_v44 = vadd.f32 %v3525_v5, %v3524_v39 }
 0x547   : > { %v2366_v3 = vadd.f32 %v3470_v22, %v3000_v16  ;;  %v3471_v28 = vpop.f32.mrb[66].mxu0 }
 0x548   : > { %v3527_v8 = vpop.f32.mrb[66].mxu1  ;;  %v3472_v45 = vpop.f32.mrb[67].mxu0 }
 0x549   : > { %v3473_v48 = vadd.f32 %v3472_v45, %v3471_v28  ;;  %v3528_v36 = vpop.f32.mrb[67].mxu1  ;;  %v2471_v55 = vadd.f32 %v3526_v44, %v2366_v3 }
 0x54a   : > { %v3529_v13 = vadd.f32 %v3528_v36, %v3527_v8 }
 0x54b   : > { %v2371_v12 = vadd.f32 %v3473_v48, %v3000_v16  ;;  %v3474_v54 = vpop.f32.mrb[68].mxu0 }
 0x54c   : > { %v3530_v59 = vpop.f32.mrb[68].mxu1  ;;  %v3475_v60 = vpop.f32.mrb[69].mxu0 }
 0x54d   : > { %v3476_v33 = vadd.f32 %v3475_v60, %v3474_v54  ;;  %v3531_v52 = vpop.f32.mrb[69].mxu1  ;;  %v2476_v63 = vadd.f32 %v3529_v13, %v2371_v12 }
 0x54e   : > { %v3532_v20 = vadd.f32 %v3531_v52, %v3530_v59 }
 0x54f   : > { %v2376_v0 = vadd.f32 %v3476_v33, %v3000_v16  ;;  %v3477_v19 = vpop.f32.mrb[70].mxu0 }
 0x550   : > { %v3533_v1 = vpop.f32.mrb[70].mxu1  ;;  %v3478_v61 = vpop.f32.mrb[71].mxu0 }
 0x551   : > { %v3479_v50 = vadd.f32 %v3478_v61, %v3477_v19  ;;  %v3534_v47 = vpop.f32.mrb[71].mxu1  ;;  %v2481_v17 = vadd.f32 %v3532_v20, %v2376_v0 }
 0x552   : > { %v3535_v2 = vadd.f32 %v3534_v47, %v3533_v1 }
 0x553   : > { %v2381_v9 = vadd.f32 %v3479_v50, %v3000_v16  ;;  %v3480_v46 = vpop.f32.mrb[72].mxu0 }
 0x554   : > { %v3536_v42 = vpop.f32.mrb[72].mxu1  ;;  %v3481_v10 = vpop.f32.mrb[73].mxu0 }
 0x555   : > { %v3482_v14 = vadd.f32 %v3481_v10, %v3480_v46  ;;  %v3537_v27 = vpop.f32.mrb[73].mxu1  ;;  %v2486_v23 = vadd.f32 %v3535_v2, %v2381_v9 }
 0x556   : > { %v3538_v41 = vadd.f32 %v3537_v27, %v3536_v42 }
 0x557   : > { %v2386_v62 = vadd.f32 %v3482_v14, %v3000_v16  ;;  %v3483_v43 = vpop.f32.mrb[74].mxu0 }
 0x558   : > { %v3539_v49 = vpop.f32.mrb[74].mxu1  ;;  %v3484_v21 = vpop.f32.mrb[75].mxu0 }
 0x559   : > { %v3485_v4 = vadd.f32 %v3484_v21, %v3483_v43  ;;  %v3540_v11 = vpop.f32.mrb[75].mxu1  ;;  %v2491_v40 = vadd.f32 %v3538_v41, %v2386_v62 }
 0x55a   : > { %v3541_v15 = vadd.f32 %v3540_v11, %v3539_v49 }
 0x55b   : > { %v2391_v7 = vadd.f32 %v3485_v4, %v3000_v16  ;;  %v3486_v31 = vpop.f32.mrb[76].mxu0 }
 0x55c   : > { %v3542_v53 = vpop.f32.mrb[76].mxu1  ;;  %v3487_v26 = vpop.f32.mrb[77].mxu0 }
 0x55d   : > { %v3488_v34 = vadd.f32 %v3487_v26, %v3486_v31  ;;  %v3543_v24 = vpop.f32.mrb[77].mxu1  ;;  %v2496_v35 = vadd.f32 %v3541_v15, %v2391_v7 }
 0x55e   : > { %v3544_v39 = vadd.f32 %v3543_v24, %v3542_v53 }
 0x55f   : > { %v2396_v57 = vadd.f32 %v3488_v34, %v3000_v16  ;;  %v3489_v22 = vpop.f32.mrb[78].mxu0 }
 0x560   : > { %v3545_v5 = vpop.f32.mrb[78].mxu1  ;;  %v3490_v44 = vpop.f32.mrb[79].mxu0 }
 0x561   : > { %v3491_v3 = vadd.f32 %v3490_v44, %v3489_v22  ;;  %v3546_v28 = vpop.f32.mrb[79].mxu1  ;;  %v2501_v8 = vadd.f32 %v3544_v39, %v2396_v57 }
 0x562   : > { %v3547_v45 = vadd.f32 %v3546_v28, %v3545_v5 }
 0x563   : > { %v2401_v48 = vadd.f32 %v3491_v3, %v3000_v16 }
 0x564   : > { %v3766_v36 = vpop.f32.mrb[80].mxu0 }
 0x565   : > { %v2581_v13 = vadd.f32 %v3766_v36, %v2476_v63  ;;  %v2575_v12 = vpop.f32.mrb[81].mxu0  ;;  %v2506_v54 = vadd.f32 %v3547_v45, %v2401_v48 }
 0x566   : > { %v2576_v59 = vadd.f32 %v2575_v12, %v2471_v55 }
 0x567   : > { %v2615_v60 = vadd.f32 %v2581_v13, %v4972_v37 }
 0x568   : > { %v2614_v33 = vadd.f32 %v2576_v59, %v4975_v38  ;;  %v3769_v52 = vpop.f32.mrb[82].mxu0 }
 0x569   : > { %v2632_v20 = vrot.slane %v2615_v60, 7  ;;  %v2591_v0 = vadd.f32 %v3769_v52, %v2486_v23  ;;  %v2585_v19 = vpop.f32.mrb[83].mxu0 }
 0x56a   : > { %v2631_v1 = vrot.slane %v2614_v33, 7  ;;  %v2586_v61 = vadd.f32 %v2585_v19, %v2481_v17 }
 0x56b   : > { %v2617_v50 = vadd.f32 %v2591_v0, %v4980_v30 }
 0x56c   : > { %v2633_v16 = vsel %vm2630_vm12, %v2631_v1, %v2632_v20  ;;  %v2655_v63 = vsel %vm2630_vm12, -3.4028235e+38, %v2631_v1  ;;  %v2616_v47 = vadd.f32 %v2586_v61, %v4989_v51  ;;  %v3772_v55 = vpop.f32.mrb[84].mxu0 }
 0x56d   : > { %v2659_v2 = vrot.slane %v2655_v63, 1  ;;  %v2660_v37 = vrot.slane %v2633_v16, 1  ;;  %v2692_v9 = vrot.slane %v2655_v63, 2  ;;  %v2693_v38 = vrot.slane %v2633_v16, 2  ;;  %v2595_v46 = vpop.f32.mrb[85].mxu0 }
 0x56e   : > { %v2636_v42 = vrot.slane %v2617_v50, 7  ;;  %v2634_v10 = vrot.slane %v2616_v47, 7  ;;  %v2601_v14 = vadd.f32 %v3772_v55, %v2496_v35  ;;  %v2596_v27 = vadd.f32 %v2595_v46, %v2491_v40 }
 0x56f   : > { %v2661_v17 = vsel %vm464_vm2, %v2659_v2, %v2660_v37  ;;  %v2694_v30 = vsel %vm490_vm4, %v2692_v9, %v2693_v38 }
 0x570   : > { %v2684_v23 = vmax.f32 %v2655_v63, %v2661_v17  ;;  %v2635_v41 = vsel %vm2630_vm12, %v2632_v20, %v2634_v10  ;;  %v2637_v62 = vsel %vm2630_vm12, %v2634_v10, %v2636_v42  ;;  %v2619_v51 = vadd.f32 %v2601_v14, %v5000_v58  ;;  %v3775_v43 = vpop.f32.mrb[86].mxu0 }
 0x571   : > { %v2662_v49 = vrot.slane %v2635_v41, 1  ;;  %v2664_v21 = vrot.slane %v2637_v62, 1  ;;  %v2695_v4 = vrot.slane %v2635_v41, 2  ;;  %v2697_v11 = vrot.slane %v2637_v62, 2  ;;  %v2605_v15 = vpop.f32.mrb[87].mxu0 }
 0x572   : > { %v2640_v7 = vrot.slane %v2619_v51, 7  ;;  %v2618_v40 = vadd.f32 %v2596_v27, %v5012_v6  ;;  %v2611_v31 = vadd.f32 %v3775_v43, %v2506_v54  ;;  %v2606_v53 = vadd.f32 %v2605_v15, %v2501_v8 }
 0x573   : > { %v2663_v26 = vsel %vm464_vm2, %v2660_v37, %v2662_v49  ;;  %v2696_v34 = vsel %vm490_vm4, %v2693_v38, %v2695_v4  ;;  %v2717_v24 = vmax.f32 %v2684_v23, %v2694_v30  ;;  %v2665_v35 = vsel %vm464_vm2, %v2662_v49, %v2664_v21 }
 0x574   : > { %v2638_v39 = vrot.slane %v2618_v40, 7  ;;  %v2621_v58 = vadd.f32 %v2611_v31, %v5025_v18  ;;  %v2620_v57 = vadd.f32 %v2606_v53, %v5037_v25  ;;  %v2685_v22 = vmax.f32 %v2633_v16, %v2663_v26 }
 0x575   : > { %v2686_v5 = vmax.f32 %v2635_v41, %v2665_v35  ;;  %v2698_v44 = vsel %vm490_vm4, %v2695_v4, %v2697_v11 }
 0x576   : > { %v2639_v6 = vsel %vm2630_vm12, %v2636_v42, %v2638_v39  ;;  %v2641_v3 = vsel %vm2630_vm12, %v2638_v39, %v2640_v7  ;;  %v2644_v28 = vrot.slane %v2621_v58, 7  ;;  %v2642_v8 = vrot.slane %v2620_v57, 7 }
 0x577   : > { %v2666_v45 = vrot.slane %v2639_v6, 1  ;;  %v2668_v48 = vrot.slane %v2641_v3, 1  ;;  %v2699_v36 = vrot.slane %v2639_v6, 2  ;;  %v2701_v13 = vrot.slane %v2641_v3, 2 }
 0x578   : > { %v2656_v12 = vsel %vm2630_vm12, %v2644_v28, -3.4028235e+38  ;;  %v2643_v18 = vsel %vm2630_vm12, %v2640_v7, %v2642_v8  ;;  %v2645_v25 = vsel %vm2630_vm12, %v2642_v8, %v2644_v28  ;;  %v2718_v54 = vmax.f32 %v2685_v22, %v2696_v34 }
 0x579   : > { %v2674_v59 = vrot.slane %v2656_v12, 1  ;;  %v2707_v60 = vrot.slane %v2656_v12, 2  ;;  %v2670_v33 = vrot.slane %v2643_v18, 1  ;;  %v2672_v52 = vrot.slane %v2645_v25, 1 }
 0x57a   : > { %v2703_v20 = vrot.slane %v2643_v18, 2  ;;  %v2705_v0 = vrot.slane %v2645_v25, 2  ;;  %v4186_v19 = vpack.c.bf16 %v2718_v54, %v2717_v24  ;;  %v2667_v1 = vsel %vm464_vm2, %v2664_v21, %v2666_v45 }
 0x57b   : > { %v2687_v61 = vmax.f32 %v2637_v62, %v2667_v1  ;;  %v2700_v50 = vsel %vm490_vm4, %v2697_v11, %v2699_v36  ;;  %v2719_v16 = vmax.f32 %v2686_v5, %v2698_v44  ;;  %v2669_v63 = vsel %vm464_vm2, %v2666_v45, %v2668_v48 }
 0x57c   : > { %4187 = vmatprep.subr.bf16.mxu0 %v4186_v19  ;;  %v2671_v47 = vsel %vm464_vm2, %v2668_v48, %v2670_v33  ;;  %v2688_v55 = vmax.f32 %v2639_v6, %v2669_v63  ;;  %v2702_v2 = vsel %vm490_vm4, %v2699_v36, %v2701_v13  ;;  %v2704_v37 = vsel %vm490_vm4, %v2701_v13, %v2703_v20 }
 0x57d   : > { %4189 = vmatpush3.bf16.msra.mxu0 %v4186_v19  ;;  %v2720_v9 = vmax.f32 %v2687_v61, %v2700_v50  ;;  %v2689_v38 = vmax.f32 %v2641_v3, %v2671_v47  ;;  %v2673_v46 = vsel %vm464_vm2, %v2670_v33, %v2672_v52  ;;  %v2675_v42 = vsel %vm464_vm2, %v2672_v52, %v2674_v59 }
 0x57e   : > { %v2721_v10 = vmax.f32 %v2688_v55, %v2702_v2  ;;  %v2690_v14 = vmax.f32 %v2643_v18, %v2673_v46  ;;  %v2691_v27 = vmax.f32 %v2645_v25, %v2675_v42  ;;  %v2706_v17 = vsel %vm490_vm4, %v2703_v20, %v2705_v0 }
 0x57f   : > { %v4190_v30 = vpack.c.bf16 %v2720_v9, %v2719_v16  ;;  %v2722_v23 = vmax.f32 %v2689_v38, %v2704_v37  ;;  %v2708_v41 = vsel %vm490_vm4, %v2705_v0, %v2707_v60 }
 0x580   : > { %v2723_v62 = vmax.f32 %v2690_v14, %v2706_v17  ;;  %v2724_v51 = vmax.f32 %v2691_v27, %v2708_v41 }
 0x581   : > { %4191 = vmatprep.subr.bf16.mxu0 %v4190_v30  ;;  %v4194_v43 = vpack.c.bf16 %v2722_v23, %v2721_v10 }
 0x582   : > { %4193 = vmatpush3.bf16.msra.mxu0 %v4190_v30  ;;  %v4198_v49 = vpack.c.bf16 %v2724_v51, %v2723_v62 }
 0x583   : > { %4195 = vmatprep.subr.bf16.mxu0 %v4194_v43 }
 0x586   : > { %4197 = vmatpush3.bf16.msra.mxu0 %v4194_v43 }
 0x587   : > { %4199 = vmatprep.subr.bf16.mxu0 %v4198_v49 }
 0x58a   : > { %4201 = vmatpush3.bf16.msra.mxu0 %v4198_v49 }
 0x58d   : > { %3793 = vmatmul.mubr.msk.f32.vlgmr.msra.gmra.mrb[88].mxu0 %vm2748_vm7, %v5243_v32 }
 0x58e   : > { %3795 = vmatprep.mubr.msk.f32.mxu0 %vm2748_vm7, %v5245_v29 }
 0x591   : > { %3796 = vmatmul.mubr.msk.f32.gmra.mrb[90].mxu0 %vm2748_vm7, %v5247_v56 }
 0x660   : > { %v3794_v21 = vpop.f32.mrb[88].mxu0 }
 0x661   : > { %2847 = vst [vmem:[%s274_s25 + $0x8] sm:$0xff] %v3794_v21  ;;  %v2827_v4 = vpop.f32.mrb[89].mxu0 }
 0x662   : > { %2846 = vst [vmem:[%s274_s25] sm:$0xff] %v2827_v4 }
 0x664   : > { %v3797_v32 = vpop.f32.mrb[90].mxu0 }
 0x665   : > { %2849 = vst [vmem:[%s274_s25 + $0x18] sm:$0xff] %v3797_v32  ;;  %v2837_v29 = vpop.f32.mrb[91].mxu0 }
 0x666   : > { %2848 = vst [vmem:[%s274_s25 + $0x10] sm:$0xff] %v2837_v29 }
 0x667   : > { %4414 = shalt.err (!%p4411_p1)
}
 0x668   : > { %s4415_s30 = scalar_lea.hbm %s5295_s12, 512  ;;  %s4419_s14 = scalar_lea.hbm %s5343_s5, 1024 }
 0x669   : > { %p4416_p0 = scmp.ne.s32.totalorder %s5295_s12, %s4415_s30  ;;  %p4420_p9 = scmp.lt.u32.totalorder %s5295_s12, %s5343_s5 }
 0x66a   : > { %p4421_p12 = scmp.lt.u32.totalorder %s4419_s14, %s4415_s30  ;;  %p4423_p2 = scmp.lt.u32.totalorder %s4415_s30, %s5295_s12 }
 0x66b   : > { %p4417_p6 = pnand %p4416_p0, %p5363_p3 }
 0x66c   : > { %p4422_p10 = por %p4421_p12, %p4420_p9 }
 0x66d   : > { %p4418_p5 = pneg %p4417_p6 }
 0x66e   : > { %p4424_p4 = por %p4423_p2, %p4422_p10 }
 0x670   : > { %p4425_p7 = pnand %p4424_p4, %p4418_p5 }
 0x672   : > { %4428 = shalt.err (!%p4425_p7)
}
 0x673   : > { %s4487_s17 = smov 128   ;;  %s4488_s25 = smov 8  }
 0x674   : > { %4218 = dma.vmem_to_hbm [thread:$0]  (%p5363_p3), %s5290_s26, 512, %s5295_s12, %s5297_s8, %s4487_s17, %s4487_s17, %s4488_s25  }
 0x675 PF: > { %p4245_p8 = scmp.ge.s32.totalorder %s4475_s21, 2  ;;  %s2879_s6 = sand.u32 1, %s4463_s18  }
 0x676   : > { %p5364_p11 = scmp.ne.s32.totalorder %s5349_s29, 0  ;;  %s2880_s7 = scalar_lea.sflag [#allocation4], %s2879_s6 }
 0x678   : > { %p4234_p13 = pnand %p4245_p8, %p5364_p11 }
 0x67a   : > { %4458 = dma.done.wait (!%p4234_p13), %s2880_s7, 512  }
 0x67b   : > { %4460 = vsyncadd (!%p4234_p13), %s2880_s7, 4294966784  ;;  %p18_p1 = scmp.ge.s32.totalorder %s4544_s24, 4   ;;  %s5365_s18 = smov %s4467_s19 }
 0x67c   : > { %s5366_s19 = smov %s4471_s20  ;;  %s5367_s20 = smov %s4555_s27 }
 0x67d   : > { %s5368_s21 = smov %s4544_s24  ;;  %20 = sbr.rel (!%p18_p1) target bundleno = 8 (0x8), region = 98 }
 0x684   :  { %2885 = vsyncpa [#allocation3], 1 }
 0x685   :  { %2887 = vsyncpa [#allocation3 + $0x1], 1 }
 0x686   :  { %2888 = vsyncpa [#allocation6], 1 }
 0x687   :  { %2889 = vsyncpa [#allocation9], 1 }
 0x688   :  { %2890 = vsyncpa [#allocation4], 1 }
 0x689   :  { %2892 = vsyncpa [#allocation4 + $0x1], 1 }

</bundles_post_ra>
